<compile_context>
chip_gen: v6e
topology: v6e:2x2x1
jax: 0.10.0
libtpu: 0.0.40
codegen_flags: <defaults>
</compile_context>

<pallas_src>
import math

import jax
import jax.numpy as jnp
from jax.experimental import pallas as pl
from jax.experimental.pallas import tpu as pltpu


# --------------------------- in-kernel 3x3 conv helper ---------------------------
def _conv3x3_bn_relu(pad_ref, w_ref, shift_ref, rows_out):
    """3x3 conv over a zero-border-padded VMEM slab via 9 per-tap MXU matmuls.

    pad_ref  : (rows_out + 2, PW + 2, Cin_p)  bf16 activations (zero border already set)
    w_ref    : (9, Cin_p, Cout_p)             bf16 weights, BN scale folded in
    shift_ref: (1, Cout_p)                    f32 BN shift
    returns  : (rows_out, PW, Cout_p)         f32, after shift + ReLU
    """
    pw = pad_ref.shape[1] - 2
    cin = pad_ref.shape[2]
    cout = w_ref.shape[2]
    acc = None
    for dy in range(3):
        for dx in range(3):
            # TODO(synk): dx-shifted slabs could use pltpu.roll (XLU) instead of offset slices.
            slab = pad_ref[dy:dy + rows_out, dx:dx + pw, :].reshape(rows_out * pw, cin)
            part = jnp.dot(slab, w_ref[3 * dy + dx],
                           preferred_element_type=jnp.float32)  # bf16 x bf16 -> f32 acc (native MXU)
            acc = part if acc is None else acc + part
    y = jnp.maximum(acc + shift_ref[...], 0.0)                  # folded-BN shift + ReLU
    return y.reshape(rows_out, pw, cout)


# --------------------- fused Down kernel (one (batch, row-tile) per step) ---------------------
def _down_fused_kernel(x_ref, w1_ref, b1_ref, w2_ref, b2_ref, o_ref,
                       pad1_ref, pad2_ref):
    # x_ref : (1, TR+4, 2, PW, 2*Cin_p) bf16  per-tile input rows incl. 2-pooled-row halo,
    #         2x2 pool pairs on a non-layout axis / packed lanes (free wrapper view).
    # w*_ref: (9, C_p, Cnext_p) bf16          per-tap weights, BN scale folded in.
    # b*_ref: (1, Cnext_p) f32                BN shift.
    # o_ref : (1, TR, PW, Cout_p) f32
    # pad1  : (TR+4, PW+2, Cin_p)  bf16 scratch  (conv1 input; zero border columns)
    # pad2  : (TR+2, PW+2, Cmid_p) bf16 scratch  (conv2 input; zero border cols + boundary rows)
    t = pl.program_id(1)
    tr = o_ref.shape[1]
    pw = o_ref.shape[2]
    cin = pad1_ref.shape[2]
    cmid = pad2_ref.shape[2]

    # ----- MaxPool2d(2): two element-wise maxima only (no strided / gather loads) -----
    v = x_ref[0]                                              # (TR+4, 2, PW, 2*Cin_p)
    vert = jnp.maximum(v[:, 0], v[:, 1])                      # (TR+4, PW, 2*Cin_p)
    pooled = jnp.maximum(vert[:, :, :cin], vert[:, :, cin:])  # (TR+4, PW, Cin_p) bf16

    # ----- Conv1 (3x3, pad 1, no bias) + BN + ReLU -----
    # Only the thin zero-border columns are written; halo rows outside the image are already
    # exact zeros because the wrapper zero-padded the input rows before pooling.
    pad1_ref[:, 0:1, :] = jnp.zeros((tr + 4, 1, cin), pad1_ref.dtype)
    pad1_ref[:, pw + 1:pw + 2, :] = jnp.zeros((tr + 4, 1, cin), pad1_ref.dtype)
    pad1_ref[:, 1:pw + 1, :] = pooled
    y1 = _conv3x3_bn_relu(pad1_ref, w1_ref, b1_ref, tr + 2)   # (TR+2, PW, Cmid_p) f32

    # ----- Conv2 (3x3, pad 1, no bias) + BN + ReLU -----
    pad2_ref[:, 0:1, :] = jnp.zeros((tr + 2, 1, cmid), pad2_ref.dtype)
    pad2_ref[:, pw + 1:pw + 2, :] = jnp.zeros((tr + 2, 1, cmid), pad2_ref.dtype)
    pad2_ref[:, 1:pw + 1, :] = y1.astype(pad2_ref.dtype)

    # conv2's zero-padding rows at the image top/bottom exist only on the boundary tiles.
    @pl.when(t == 0)
    def _():
        pad2_ref[0:1, :, :] = jnp.zeros((1, pw + 2, cmid), pad2_ref.dtype)

    @pl.when(t == pl.num_programs(1) - 1)
    def _():
        pad2_ref[tr + 1:tr + 2, :, :] = jnp.zeros((1, pw + 2, cmid), pad2_ref.dtype)

    y2 = _conv3x3_bn_relu(pad2_ref, w2_ref, b2_ref, tr)       # (TR, PW, Cout_p) f32
    o_ref[0] = y2.astype(o_ref.dtype)


# ----------------------------- parameter preparation -----------------------------
def _round_up(x, m):
    return (x + m - 1) // m * m


def fold_bn(gamma, beta, running_mean, running_var, eps=1e-5):
    scale = gamma / jnp.sqrt(running_var + eps)
    shift = beta - running_mean * scale
    return scale, shift


def prepare_params(w1, gamma1, beta1, rm1, rv1, w2, gamma2, beta2, rm2, rv2,
                   eps=1e-5, lane=128):
    """Fold eval-mode BN into the conv weights, zero-pad channels to the 128-lane width,
    and cast the MXU operands to bf16 (shifts stay f32)."""
    cin, cmid = w1.shape[2], w1.shape[3]
    cout = w2.shape[3]
    cin_p, cmid_p, cout_p = (_round_up(c, lane) for c in (cin, cmid, cout))

    s1, b1 = fold_bn(gamma1, beta1, rm1, rv1, eps)
    s2, b2 = fold_bn(gamma2, beta2, rm2, rv2, eps)

    w1f = w1 * s1.reshape(1, 1, 1, -1)            # BN scale folded into conv weights
    w2f = w2 * s2.reshape(1, 1, 1, -1)
    w1p = jnp.pad(w1f, ((0, 0), (0, 0), (0, cin_p - cin), (0, cmid_p - cmid))).astype(jnp.bfloat16)
    w2p = jnp.pad(w2f, ((0, 0), (0, 0), (0, cmid_p - cmid), (0, cout_p - cout))).astype(jnp.bfloat16)
    b1p = jnp.pad(b1, (0, cmid_p - cmid)).reshape(1, cmid_p).astype(jnp.float32)
    b2p = jnp.pad(b2, (0, cout_p - cout)).reshape(1, cout_p).astype(jnp.float32)
    return dict(w1=w1p, b1=b1p, w2=w2p, b2=b2p, cin=cin, cout=cout)


# ----------------------------- Down module forward -----------------------------
def down_forward(x_nchw, prep, tile_rows=16):
    # x_nchw: (N, Cin, H, W) as in PyTorch; output: (N, Cout, H//2, W//2) float32.
    n, cin, h, w = x_nchw.shape
    assert cin == prep["cin"]
    assert h % 2 == 0 and w % 2 == 0, "MaxPool2d(2) assumes even H, W"
    ph, pw = h // 2, w // 2

    cin_p = prep["w1"].shape[2]
    cmid_p = prep["w1"].shape[3]
    cout_p = prep["w2"].shape[3]
    cout = prep["cout"]

    # Output-row tile size (pooled rows): largest divisor of PH that is <= tile_rows.
    tr = min(tile_rows, ph)
    while ph % tr:
        tr -= 1
    n_tiles = ph // tr
    # TODO(synk): handle non-divisible PH with a masked remainder tile instead of shrinking tr.

    # NHWC bf16 activations (native MXU dtype), channels zero-padded to 128 lanes.
    x = jnp.transpose(x_nchw, (0, 2, 3, 1)).astype(jnp.bfloat16)
    x = jnp.pad(x, ((0, 0), (0, 0), (0, 0), (0, cin_p - cin)))
    # 4 zero rows top/bottom: boundary-tile halo rows pool to exact zeros, which doubles as
    # conv1's zero padding at the image top/bottom.
    x = jnp.pad(x, ((0, 0), (4, 4), (0, 0), (0, 0)))

    # Per-tile input slabs (2*tr + 8 rows each: tile + 2-pooled-row halo each side) so the
    # kernel's BlockSpec stays a plain blocked index map.
    # TODO(synk): replace with an in-kernel DMA (memory_space=pl.ANY) to avoid duplicating
    # the 8 halo rows per tile in HBM.
    slabs = [x[:, 2 * tr * t: 2 * tr * t + 2 * tr + 8] for t in range(n_tiles)]
    xt = jnp.concatenate(slabs, axis=1)                       # (N, n_tiles*(2tr+8), W, Cin_p)
    # Free layout view: 2x2 pool pairs -> (row-pair axis, lane-packed column pair).
    xt = xt.reshape(n, n_tiles * (tr + 4), 2, pw, 2 * cin_p)

    w1k = prep["w1"].reshape(9, cin_p, cmid_p)                # per-tap weight matrices
    w2k = prep["w2"].reshape(9, cmid_p, cout_p)

    # VMEM budget: double-buffered in/out/weight blocks + pad scratches, with headroom.
    def nbytes(shape, dtype):
        return math.prod(shape) * jnp.dtype(dtype).itemsize

    est = 2 * (nbytes((1, tr + 4, 2, pw, 2 * cin_p), jnp.bfloat16)
               + nbytes((1, tr, pw, cout_p), jnp.float32)
               + nbytes((9, cin_p, cmid_p), jnp.bfloat16)
               + nbytes((9, cmid_p, cout_p), jnp.bfloat16)
               + nbytes((1, cmid_p), jnp.float32)
               + nbytes((1, cout_p), jnp.float32))
    est += (nbytes((tr + 4, pw + 2, cin_p), jnp.bfloat16)
            + nbytes((tr + 2, pw + 2, cmid_p), jnp.bfloat16))
    vmem_limit = int(min(112 * 2 ** 20, max(32 * 2 ** 20, 2 * est + (8 << 20))))

    out = pl.pallas_call(
        _down_fused_kernel,
        out_shape=jax.ShapeDtypeStruct((n, ph, pw, cout_p), jnp.float32),
        grid_spec=pltpu.PrefetchScalarGridSpec(
            num_scalar_prefetch=0,
            grid=(n, n_tiles),
            in_specs=[
                pl.BlockSpec((1, tr + 4, 2, pw, 2 * cin_p), lambda b, t: (b, t, 0, 0, 0)),
                pl.BlockSpec((9, cin_p, cmid_p),            lambda b, t: (0, 0, 0)),
                pl.BlockSpec((1, cmid_p),                   lambda b, t: (0, 0)),
                pl.BlockSpec((9, cmid_p, cout_p),           lambda b, t: (0, 0, 0)),
                pl.BlockSpec((1, cout_p),                   lambda b, t: (0, 0)),
            ],
            out_specs=pl.BlockSpec((1, tr, pw, cout_p), lambda b, t: (b, t, 0, 0)),
            scratch_shapes=[
                pltpu.VMEM((tr + 4, pw + 2, cin_p), jnp.bfloat16),
                pltpu.VMEM((tr + 2, pw + 2, cmid_p), jnp.bfloat16),
            ],
        ),
        compiler_params=pltpu.CompilerParams(
            dimension_semantics=("parallel", "parallel"),     # batch & row-tiles across TCs
            vmem_limit_bytes=vmem_limit),
    )(xt, w1k, prep["b1"], w2k, prep["b2"])

    out = out[..., :cout]                                     # drop lane-padding channels
    return jnp.transpose(out, (0, 3, 1, 2))                   # -> NCHW


# ----------------------------- pure-JAX reference -----------------------------
def reference_forward(x_nchw, prep):
    # Mirrors the kernel's numerics: bf16 operands, f32 accumulation, BN scale folded in.
    x = jnp.transpose(x_nchw, (0, 2, 3, 1)).astype(jnp.bfloat16)
    n, h, w, cin = x.shape
    cin_p = prep["w1"].shape[2]
    x = jnp.pad(x, ((0, 0), (0, 0), (0, 0), (0, cin_p - cin)))
    p = jnp.max(x.reshape(n, h // 2, 2, w // 2, 2, cin_p), axis=(2, 4))

    def conv(z, wt, shift):
        y = jax.lax.conv_general_dilated(
            z, wt, window_strides=(1, 1), padding="SAME",
            dimension_numbers=("NHWC", "HWIO", "NHWC"),
            preferred_element_type=jnp.float32)
        return jnp.maximum(y + shift, 0.0)

    y = conv(p, prep["w1"], prep["b1"][0]).astype(jnp.bfloat16)
    y = conv(y, prep["w2"], prep["b2"][0])
    return jnp.transpose(y[..., :prep["cout"]], (0, 3, 1, 2))


if __name__ == "__main__":
    in_channels, out_channels = 4, 8
    mid_channels = out_channels
    N, H, W = 2, 16, 16

    key = jax.random.PRNGKey(0)
    kx, k1, k2, k3, k4, k5, k6 = jax.random.split(key, 7)

    x = jax.random.normal(kx, (N, in_channels, H, W), jnp.float32)

    # Conv weights (HWIO), no bias, deterministic init.
    w1 = jax.random.normal(k1, (3, 3, in_channels, mid_channels), jnp.float32) * 0.2
    w2 = jax.random.normal(k2, (3, 3, mid_channels, out_channels), jnp.float32) * 0.2

    # BatchNorm params (eval-mode semantics: running stats folded into the weights/shift).
    gamma1 = 1.0 + 0.1 * jax.random.normal(k3, (mid_channels,), jnp.float32)
    beta1 = 0.1 * jax.random.normal(k4, (mid_channels,), jnp.float32)
    gamma2 = 1.0 + 0.1 * jax.random.normal(k5, (out_channels,), jnp.float32)
    beta2 = 0.1 * jax.random.normal(k6, (out_channels,), jnp.float32)
    rm1 = jnp.zeros((mid_channels,), jnp.float32)
    rv1 = jnp.ones((mid_channels,), jnp.float32)
    rm2 = jnp.zeros((out_channels,), jnp.float32)
    rv2 = jnp.ones((out_channels,), jnp.float32)
    # TODO(synk): training-mode BatchNorm (per-batch statistics) not implemented; eval-mode only.

    prep = prepare_params(w1, gamma1, beta1, rm1, rv1, w2, gamma2, beta2, rm2, rv2)

    # tile_rows=4 -> 2 row tiles per image, so the halo/boundary-row logic is exercised.
    out = jax.block_until_ready(down_forward(x, prep, tile_rows=4))
    ref = jax.block_until_ready(reference_forward(x, prep))

    assert out.shape == (N, out_channels, H // 2, W // 2), out.shape
    err = float(jnp.max(jnp.abs(out - ref)))
    # bf16 MXU operands -> compare against the bf16-precision reference with a loose-ish tol.
    assert jnp.allclose(out, ref, rtol=2e-2, atol=2e-2), err

    print("KERNEL_OK")
</pallas_src>

<mosaic_0001>
module attributes {stable_mosaic.version = 11 : i64} {
  func.func @_down_fused_kernel(%arg0: i32, %arg1: i32, %arg2: memref<1x8x2x8x256xbf16, #tpu.memory_space<vmem>>, %arg3: memref<9x128x128xbf16, #tpu.memory_space<vmem>>, %arg4: memref<1x128xf32, #tpu.memory_space<vmem>>, %arg5: memref<9x128x128xbf16, #tpu.memory_space<vmem>>, %arg6: memref<1x128xf32, #tpu.memory_space<vmem>>, %arg7: memref<1x4x8x128xf32, #tpu.memory_space<vmem>>, %arg8: memref<8x10x128xbf16, #tpu.memory_space<vmem>>, %arg9: memref<6x10x128xbf16, #tpu.memory_space<vmem>>) attributes {dimension_semantics = [#tpu.dimension_semantics<parallel>, #tpu.dimension_semantics<parallel>], iteration_bounds = array<i64: 2, 2>, scalar_prefetch = 0 : i64, scratch_operands = 2 : i64, tpu.core_type = #tpu.core_type<tc>, window_params = [{transform_indices = @transform_0, window_bounds = array<i64: 1, 8, 2, 8, 256>}, {pipeline_mode = #tpu.pipeline_mode<synchronous>, transform_indices = @transform_1, window_bounds = array<i64: 9, 128, 128>}, {pipeline_mode = #tpu.pipeline_mode<synchronous>, transform_indices = @transform_2, window_bounds = array<i64: 1, 128>}, {pipeline_mode = #tpu.pipeline_mode<synchronous>, transform_indices = @transform_3, window_bounds = array<i64: 9, 128, 128>}, {pipeline_mode = #tpu.pipeline_mode<synchronous>, transform_indices = @transform_4, window_bounds = array<i64: 1, 128>}, {transform_indices = @transform_5, window_bounds = array<i64: 1, 4, 8, 128>}]} {
    %c0 = arith.constant 0 : index
    %c0_0 = arith.constant 0 : index
    %c0_1 = arith.constant 0 : index
    %c0_2 = arith.constant 0 : index
    %c0_3 = arith.constant 0 : index
    %0 = vector.load %arg2[%c0, %c0_0, %c0_1, %c0_2, %c0_3] : memref<1x8x2x8x256xbf16, #tpu.memory_space<vmem>>, vector<1x8x2x8x256xbf16>
    %1 = vector.shape_cast %0 : vector<1x8x2x8x256xbf16> to vector<8x2x8x256xbf16>
    %2 = vector.extract_strided_slice %1 {offsets = [0, 0, 0, 0], sizes = [8, 1, 8, 256], strides = [1, 1, 1, 1]} : vector<8x2x8x256xbf16> to vector<8x1x8x256xbf16>
    %3 = vector.shape_cast %2 : vector<8x1x8x256xbf16> to vector<8x8x256xbf16>
    %4 = vector.extract_strided_slice %1 {offsets = [0, 1, 0, 0], sizes = [8, 1, 8, 256], strides = [1, 1, 1, 1]} : vector<8x2x8x256xbf16> to vector<8x1x8x256xbf16>
    %5 = vector.shape_cast %4 : vector<8x1x8x256xbf16> to vector<8x8x256xbf16>
    %6 = arith.maximumf %3, %5 : vector<8x8x256xbf16>
    %7 = vector.extract_strided_slice %6 {offsets = [0, 0, 0], sizes = [8, 8, 128], strides = [1, 1, 1]} : vector<8x8x256xbf16> to vector<8x8x128xbf16>
    %8 = vector.extract_strided_slice %6 {offsets = [0, 0, 128], sizes = [8, 8, 128], strides = [1, 1, 1]} : vector<8x8x256xbf16> to vector<8x8x128xbf16>
    %9 = arith.maximumf %7, %8 : vector<8x8x128xbf16>
    %cst = arith.constant 0.000000e+00 : bf16
    %10 = vector.broadcast %cst : bf16 to vector<8x1x128xbf16>
    %c0_4 = arith.constant 0 : index
    %c0_5 = arith.constant 0 : index
    %c0_6 = arith.constant 0 : index
    %11 = vector.load %arg8[%c0_4, %c0_5, %c0_6] : memref<8x10x128xbf16, #tpu.memory_space<vmem>>, vector<8x1x128xbf16>
    tpu.vector_store %arg8[%c0_4, %c0_5, %c0_6], %10 {strides = array<i32>} : memref<8x10x128xbf16, #tpu.memory_space<vmem>>, vector<8x1x128xbf16>,
    %cst_7 = arith.constant 0.000000e+00 : bf16
    %12 = vector.broadcast %cst_7 : bf16 to vector<8x1x128xbf16>
    %c0_8 = arith.constant 0 : index
    %c9 = arith.constant 9 : index
    %c0_9 = arith.constant 0 : index
    %13 = vector.load %arg8[%c0_8, %c9, %c0_9] : memref<8x10x128xbf16, #tpu.memory_space<vmem>>, vector<8x1x128xbf16>
    tpu.vector_store %arg8[%c0_8, %c9, %c0_9], %12 {strides = array<i32>} : memref<8x10x128xbf16, #tpu.memory_space<vmem>>, vector<8x1x128xbf16>,
    %c0_10 = arith.constant 0 : index
    %c1 = arith.constant 1 : index
    %c0_11 = arith.constant 0 : index
    %14 = vector.load %arg8[%c0_10, %c1, %c0_11] : memref<8x10x128xbf16, #tpu.memory_space<vmem>>, vector<8x8x128xbf16>
    tpu.vector_store %arg8[%c0_10, %c1, %c0_11], %9 {strides = array<i32>} : memref<8x10x128xbf16, #tpu.memory_space<vmem>>, vector<8x8x128xbf16>,
    %c0_12 = arith.constant 0 : index
    %c0_13 = arith.constant 0 : index
    %c0_14 = arith.constant 0 : index
    %15 = vector.load %arg8[%c0_12, %c0_13, %c0_14] : memref<8x10x128xbf16, #tpu.memory_space<vmem>>, vector<6x8x128xbf16>
    %16 = vector.shape_cast %15 : vector<6x8x128xbf16> to vector<48x128xbf16>
    %c0_15 = arith.constant 0 : index
    %c0_16 = arith.constant 0 : index
    %c0_17 = arith.constant 0 : index
    %17 = vector.load %arg3[%c0_15, %c0_16, %c0_17] : memref<9x128x128xbf16, #tpu.memory_space<vmem>>, vector<1x128x128xbf16>
    %18 = vector.shape_cast %17 : vector<1x128x128xbf16> to vector<128x128xbf16>
    %cst_18 = arith.constant dense<0.000000e+00> : vector<48x128xf32>
    %19 = tpu.matmul %16, %18, %cst_18 {dimension_numbers = #tpu.dot_dimension_numbers<[1], [0], [0], [1], [0, 0, 1, 1], [], []>} : vector<48x128xbf16>, vector<128x128xbf16>, vector<48x128xf32> -> vector<48x128xf32>
    %c0_19 = arith.constant 0 : index
    %c1_20 = arith.constant 1 : index
    %c0_21 = arith.constant 0 : index
    %20 = vector.load %arg8[%c0_19, %c1_20, %c0_21] : memref<8x10x128xbf16, #tpu.memory_space<vmem>>, vector<6x8x128xbf16>
    %21 = vector.shape_cast %20 : vector<6x8x128xbf16> to vector<48x128xbf16>
    %c1_22 = arith.constant 1 : index
    %c0_23 = arith.constant 0 : index
    %c0_24 = arith.constant 0 : index
    %22 = vector.load %arg3[%c1_22, %c0_23, %c0_24] : memref<9x128x128xbf16, #tpu.memory_space<vmem>>, vector<1x128x128xbf16>
    %23 = vector.shape_cast %22 : vector<1x128x128xbf16> to vector<128x128xbf16>
    %cst_25 = arith.constant dense<0.000000e+00> : vector<48x128xf32>
    %24 = tpu.matmul %21, %23, %cst_25 {dimension_numbers = #tpu.dot_dimension_numbers<[1], [0], [0], [1], [0, 0, 1, 1], [], []>} : vector<48x128xbf16>, vector<128x128xbf16>, vector<48x128xf32> -> vector<48x128xf32>
    %25 = arith.addf %19, %24 : vector<48x128xf32>
    %c0_26 = arith.constant 0 : index
    %c2 = arith.constant 2 : index
    %c0_27 = arith.constant 0 : index
    %26 = vector.load %arg8[%c0_26, %c2, %c0_27] : memref<8x10x128xbf16, #tpu.memory_space<vmem>>, vector<6x8x128xbf16>
    %27 = vector.shape_cast %26 : vector<6x8x128xbf16> to vector<48x128xbf16>
    %c2_28 = arith.constant 2 : index
    %c0_29 = arith.constant 0 : index
    %c0_30 = arith.constant 0 : index
    %28 = vector.load %arg3[%c2_28, %c0_29, %c0_30] : memref<9x128x128xbf16, #tpu.memory_space<vmem>>, vector<1x128x128xbf16>
    %29 = vector.shape_cast %28 : vector<1x128x128xbf16> to vector<128x128xbf16>
    %cst_31 = arith.constant dense<0.000000e+00> : vector<48x128xf32>
    %30 = tpu.matmul %27, %29, %cst_31 {dimension_numbers = #tpu.dot_dimension_numbers<[1], [0], [0], [1], [0, 0, 1, 1], [], []>} : vector<48x128xbf16>, vector<128x128xbf16>, vector<48x128xf32> -> vector<48x128xf32>
    %31 = arith.addf %25, %30 : vector<48x128xf32>
    %c1_32 = arith.constant 1 : index
    %c0_33 = arith.constant 0 : index
    %c0_34 = arith.constant 0 : index
    %32 = vector.load %arg8[%c1_32, %c0_33, %c0_34] : memref<8x10x128xbf16, #tpu.memory_space<vmem>>, vector<6x8x128xbf16>
    %33 = vector.shape_cast %32 : vector<6x8x128xbf16> to vector<48x128xbf16>
    %c3 = arith.constant 3 : index
    %c0_35 = arith.constant 0 : index
    %c0_36 = arith.constant 0 : index
    %34 = vector.load %arg3[%c3, %c0_35, %c0_36] : memref<9x128x128xbf16, #tpu.memory_space<vmem>>, vector<1x128x128xbf16>
    %35 = vector.shape_cast %34 : vector<1x128x128xbf16> to vector<128x128xbf16>
    %cst_37 = arith.constant dense<0.000000e+00> : vector<48x128xf32>
    %36 = tpu.matmul %33, %35, %cst_37 {dimension_numbers = #tpu.dot_dimension_numbers<[1], [0], [0], [1], [0, 0, 1, 1], [], []>} : vector<48x128xbf16>, vector<128x128xbf16>, vector<48x128xf32> -> vector<48x128xf32>
    %37 = arith.addf %31, %36 : vector<48x128xf32>
    %c1_38 = arith.constant 1 : index
    %c1_39 = arith.constant 1 : index
    %c0_40 = arith.constant 0 : index
    %38 = vector.load %arg8[%c1_38, %c1_39, %c0_40] : memref<8x10x128xbf16, #tpu.memory_space<vmem>>, vector<6x8x128xbf16>
    %39 = vector.shape_cast %38 : vector<6x8x128xbf16> to vector<48x128xbf16>
    %c4 = arith.constant 4 : index
    %c0_41 = arith.constant 0 : index
    %c0_42 = arith.constant 0 : index
    %40 = vector.load %arg3[%c4, %c0_41, %c0_42] : memref<9x128x128xbf16, #tpu.memory_space<vmem>>, vector<1x128x128xbf16>
    %41 = vector.shape_cast %40 : vector<1x128x128xbf16> to vector<128x128xbf16>
    %cst_43 = arith.constant dense<0.000000e+00> : vector<48x128xf32>
    %42 = tpu.matmul %39, %41, %cst_43 {dimension_numbers = #tpu.dot_dimension_numbers<[1], [0], [0], [1], [0, 0, 1, 1], [], []>} : vector<48x128xbf16>, vector<128x128xbf16>, vector<48x128xf32> -> vector<48x128xf32>
    %43 = arith.addf %37, %42 : vector<48x128xf32>
    %c1_44 = arith.constant 1 : index
    %c2_45 = arith.constant 2 : index
    %c0_46 = arith.constant 0 : index
    %44 = vector.load %arg8[%c1_44, %c2_45, %c0_46] : memref<8x10x128xbf16, #tpu.memory_space<vmem>>, vector<6x8x128xbf16>
    %45 = vector.shape_cast %44 : vector<6x8x128xbf16> to vector<48x128xbf16>
    %c5 = arith.constant 5 : index
    %c0_47 = arith.constant 0 : index
    %c0_48 = arith.constant 0 : index
    %46 = vector.load %arg3[%c5, %c0_47, %c0_48] : memref<9x128x128xbf16, #tpu.memory_space<vmem>>, vector<1x128x128xbf16>
    %47 = vector.shape_cast %46 : vector<1x128x128xbf16> to vector<128x128xbf16>
    %cst_49 = arith.constant dense<0.000000e+00> : vector<48x128xf32>
    %48 = tpu.matmul %45, %47, %cst_49 {dimension_numbers = #tpu.dot_dimension_numbers<[1], [0], [0], [1], [0, 0, 1, 1], [], []>} : vector<48x128xbf16>, vector<128x128xbf16>, vector<48x128xf32> -> vector<48x128xf32>
    %49 = arith.addf %43, %48 : vector<48x128xf32>
    %c2_50 = arith.constant 2 : index
    %c0_51 = arith.constant 0 : index
    %c0_52 = arith.constant 0 : index
    %50 = vector.load %arg8[%c2_50, %c0_51, %c0_52] : memref<8x10x128xbf16, #tpu.memory_space<vmem>>, vector<6x8x128xbf16>
    %51 = vector.shape_cast %50 : vector<6x8x128xbf16> to vector<48x128xbf16>
    %c6 = arith.constant 6 : index
    %c0_53 = arith.constant 0 : index
    %c0_54 = arith.constant 0 : index
    %52 = vector.load %arg3[%c6, %c0_53, %c0_54] : memref<9x128x128xbf16, #tpu.memory_space<vmem>>, vector<1x128x128xbf16>
    %53 = vector.shape_cast %52 : vector<1x128x128xbf16> to vector<128x128xbf16>
    %cst_55 = arith.constant dense<0.000000e+00> : vector<48x128xf32>
    %54 = tpu.matmul %51, %53, %cst_55 {dimension_numbers = #tpu.dot_dimension_numbers<[1], [0], [0], [1], [0, 0, 1, 1], [], []>} : vector<48x128xbf16>, vector<128x128xbf16>, vector<48x128xf32> -> vector<48x128xf32>
    %55 = arith.addf %49, %54 : vector<48x128xf32>
    %c2_56 = arith.constant 2 : index
    %c1_57 = arith.constant 1 : index
    %c0_58 = arith.constant 0 : index
    %56 = vector.load %arg8[%c2_56, %c1_57, %c0_58] : memref<8x10x128xbf16, #tpu.memory_space<vmem>>, vector<6x8x128xbf16>
    %57 = vector.shape_cast %56 : vector<6x8x128xbf16> to vector<48x128xbf16>
    %c7 = arith.constant 7 : index
    %c0_59 = arith.constant 0 : index
    %c0_60 = arith.constant 0 : index
    %58 = vector.load %arg3[%c7, %c0_59, %c0_60] : memref<9x128x128xbf16, #tpu.memory_space<vmem>>, vector<1x128x128xbf16>
    %59 = vector.shape_cast %58 : vector<1x128x128xbf16> to vector<128x128xbf16>
    %cst_61 = arith.constant dense<0.000000e+00> : vector<48x128xf32>
    %60 = tpu.matmul %57, %59, %cst_61 {dimension_numbers = #tpu.dot_dimension_numbers<[1], [0], [0], [1], [0, 0, 1, 1], [], []>} : vector<48x128xbf16>, vector<128x128xbf16>, vector<48x128xf32> -> vector<48x128xf32>
    %61 = arith.addf %55, %60 : vector<48x128xf32>
    %c2_62 = arith.constant 2 : index
    %c2_63 = arith.constant 2 : index
    %c0_64 = arith.constant 0 : index
    %62 = vector.load %arg8[%c2_62, %c2_63, %c0_64] : memref<8x10x128xbf16, #tpu.memory_space<vmem>>, vector<6x8x128xbf16>
    %63 = vector.shape_cast %62 : vector<6x8x128xbf16> to vector<48x128xbf16>
    %c8 = arith.constant 8 : index
    %c0_65 = arith.constant 0 : index
    %c0_66 = arith.constant 0 : index
    %64 = vector.load %arg3[%c8, %c0_65, %c0_66] : memref<9x128x128xbf16, #tpu.memory_space<vmem>>, vector<1x128x128xbf16>
    %65 = vector.shape_cast %64 : vector<1x128x128xbf16> to vector<128x128xbf16>
    %cst_67 = arith.constant dense<0.000000e+00> : vector<48x128xf32>
    %66 = tpu.matmul %63, %65, %cst_67 {dimension_numbers = #tpu.dot_dimension_numbers<[1], [0], [0], [1], [0, 0, 1, 1], [], []>} : vector<48x128xbf16>, vector<128x128xbf16>, vector<48x128xf32> -> vector<48x128xf32>
    %67 = arith.addf %61, %66 : vector<48x128xf32>
    %c0_68 = arith.constant 0 : index
    %c0_69 = arith.constant 0 : index
    %68 = vector.load %arg4[%c0_68, %c0_69] : memref<1x128xf32, #tpu.memory_space<vmem>>, vector<1x128xf32>
    %69 = vector.broadcast %68 : vector<1x128xf32> to vector<48x128xf32>
    %70 = arith.addf %67, %69 : vector<48x128xf32>
    %cst_70 = arith.constant 0.000000e+00 : f32
    %71 = vector.broadcast %cst_70 : f32 to vector<48x128xf32>
    %72 = arith.maximumf %70, %71 : vector<48x128xf32>
    %73 = vector.shape_cast %72 : vector<48x128xf32> to vector<6x8x128xf32>
    %cst_71 = arith.constant 0.000000e+00 : bf16
    %74 = vector.broadcast %cst_71 : bf16 to vector<6x1x128xbf16>
    %c0_72 = arith.constant 0 : index
    %c0_73 = arith.constant 0 : index
    %c0_74 = arith.constant 0 : index
    %75 = vector.load %arg9[%c0_72, %c0_73, %c0_74] : memref<6x10x128xbf16, #tpu.memory_space<vmem>>, vector<6x1x128xbf16>
    tpu.vector_store %arg9[%c0_72, %c0_73, %c0_74], %74 {strides = array<i32>} : memref<6x10x128xbf16, #tpu.memory_space<vmem>>, vector<6x1x128xbf16>,
    %cst_75 = arith.constant 0.000000e+00 : bf16
    %76 = vector.broadcast %cst_75 : bf16 to vector<6x1x128xbf16>
    %c0_76 = arith.constant 0 : index
    %c9_77 = arith.constant 9 : index
    %c0_78 = arith.constant 0 : index
    %77 = vector.load %arg9[%c0_76, %c9_77, %c0_78] : memref<6x10x128xbf16, #tpu.memory_space<vmem>>, vector<6x1x128xbf16>
    tpu.vector_store %arg9[%c0_76, %c9_77, %c0_78], %76 {strides = array<i32>} : memref<6x10x128xbf16, #tpu.memory_space<vmem>>, vector<6x1x128xbf16>,
    %78 = arith.truncf %73 : vector<6x8x128xf32> to vector<6x8x128xbf16>
    %c0_79 = arith.constant 0 : index
    %c1_80 = arith.constant 1 : index
    %c0_81 = arith.constant 0 : index
    %79 = vector.load %arg9[%c0_79, %c1_80, %c0_81] : memref<6x10x128xbf16, #tpu.memory_space<vmem>>, vector<6x8x128xbf16>
    tpu.vector_store %arg9[%c0_79, %c1_80, %c0_81], %78 {strides = array<i32>} : memref<6x10x128xbf16, #tpu.memory_space<vmem>>, vector<6x8x128xbf16>,
    %c0_i32 = arith.constant 0 : i32
    %80 = arith.cmpi eq, %arg1, %c0_i32 : i32
    %81 = arith.extui %80 : i1 to i32
    %c0_i32_82 = arith.constant 0 : i32
    %82 = arith.cmpi ne, %81, %c0_i32_82 : i32
    scf.if %82 {
      %cst_154 = arith.constant 0.000000e+00 : bf16
      %148 = vector.broadcast %cst_154 : bf16 to vector<1x10x128xbf16>
      %c0_155 = arith.constant 0 : index
      %c0_156 = arith.constant 0 : index
      %c0_157 = arith.constant 0 : index
      %149 = vector.load %arg9[%c0_155, %c0_156, %c0_157] : memref<6x10x128xbf16, #tpu.memory_space<vmem>>, vector<1x10x128xbf16>
      tpu.vector_store %arg9[%c0_155, %c0_156, %c0_157], %148 {strides = array<i32>} : memref<6x10x128xbf16, #tpu.memory_space<vmem>>, vector<1x10x128xbf16>,
    } else {
    }
    %c1_i32 = arith.constant 1 : i32
    %83 = arith.cmpi eq, %arg1, %c1_i32 : i32
    %84 = arith.extui %83 : i1 to i32
    %c0_i32_83 = arith.constant 0 : i32
    %85 = arith.cmpi ne, %84, %c0_i32_83 : i32
    scf.if %85 {
      %cst_154 = arith.constant 0.000000e+00 : bf16
      %148 = vector.broadcast %cst_154 : bf16 to vector<1x10x128xbf16>
      %c5_155 = arith.constant 5 : index
      %c0_156 = arith.constant 0 : index
      %c0_157 = arith.constant 0 : index
      %149 = vector.load %arg9[%c5_155, %c0_156, %c0_157] : memref<6x10x128xbf16, #tpu.memory_space<vmem>>, vector<1x10x128xbf16>
      tpu.vector_store %arg9[%c5_155, %c0_156, %c0_157], %148 {strides = array<i32>} : memref<6x10x128xbf16, #tpu.memory_space<vmem>>, vector<1x10x128xbf16>,
    } else {
    }
    %c0_84 = arith.constant 0 : index
    %c0_85 = arith.constant 0 : index
    %c0_86 = arith.constant 0 : index
    %86 = vector.load %arg9[%c0_84, %c0_85, %c0_86] : memref<6x10x128xbf16, #tpu.memory_space<vmem>>, vector<4x8x128xbf16>
    %87 = vector.shape_cast %86 : vector<4x8x128xbf16> to vector<32x128xbf16>
    %c0_87 = arith.constant 0 : index
    %c0_88 = arith.constant 0 : index
    %c0_89 = arith.constant 0 : index
    %88 = vector.load %arg5[%c0_87, %c0_88, %c0_89] : memref<9x128x128xbf16, #tpu.memory_space<vmem>>, vector<1x128x128xbf16>
    %89 = vector.shape_cast %88 : vector<1x128x128xbf16> to vector<128x128xbf16>
    %cst_90 = arith.constant dense<0.000000e+00> : vector<32x128xf32>
    %90 = tpu.matmul %87, %89, %cst_90 {dimension_numbers = #tpu.dot_dimension_numbers<[1], [0], [0], [1], [0, 0, 1, 1], [], []>} : vector<32x128xbf16>, vector<128x128xbf16>, vector<32x128xf32> -> vector<32x128xf32>
    %c0_91 = arith.constant 0 : index
    %c1_92 = arith.constant 1 : index
    %c0_93 = arith.constant 0 : index
    %91 = vector.load %arg9[%c0_91, %c1_92, %c0_93] : memref<6x10x128xbf16, #tpu.memory_space<vmem>>, vector<4x8x128xbf16>
    %92 = vector.shape_cast %91 : vector<4x8x128xbf16> to vector<32x128xbf16>
    %c1_94 = arith.constant 1 : index
    %c0_95 = arith.constant 0 : index
    %c0_96 = arith.constant 0 : index
    %93 = vector.load %arg5[%c1_94, %c0_95, %c0_96] : memref<9x128x128xbf16, #tpu.memory_space<vmem>>, vector<1x128x128xbf16>
    %94 = vector.shape_cast %93 : vector<1x128x128xbf16> to vector<128x128xbf16>
    %cst_97 = arith.constant dense<0.000000e+00> : vector<32x128xf32>
    %95 = tpu.matmul %92, %94, %cst_97 {dimension_numbers = #tpu.dot_dimension_numbers<[1], [0], [0], [1], [0, 0, 1, 1], [], []>} : vector<32x128xbf16>, vector<128x128xbf16>, vector<32x128xf32> -> vector<32x128xf32>
    %96 = arith.addf %90, %95 : vector<32x128xf32>
    %c0_98 = arith.constant 0 : index
    %c2_99 = arith.constant 2 : index
    %c0_100 = arith.constant 0 : index
    %97 = vector.load %arg9[%c0_98, %c2_99, %c0_100] : memref<6x10x128xbf16, #tpu.memory_space<vmem>>, vector<4x8x128xbf16>
    %98 = vector.shape_cast %97 : vector<4x8x128xbf16> to vector<32x128xbf16>
    %c2_101 = arith.constant 2 : index
    %c0_102 = arith.constant 0 : index
    %c0_103 = arith.constant 0 : index
    %99 = vector.load %arg5[%c2_101, %c0_102, %c0_103] : memref<9x128x128xbf16, #tpu.memory_space<vmem>>, vector<1x128x128xbf16>
    %100 = vector.shape_cast %99 : vector<1x128x128xbf16> to vector<128x128xbf16>
    %cst_104 = arith.constant dense<0.000000e+00> : vector<32x128xf32>
    %101 = tpu.matmul %98, %100, %cst_104 {dimension_numbers = #tpu.dot_dimension_numbers<[1], [0], [0], [1], [0, 0, 1, 1], [], []>} : vector<32x128xbf16>, vector<128x128xbf16>, vector<32x128xf32> -> vector<32x128xf32>
    %102 = arith.addf %96, %101 : vector<32x128xf32>
    %c1_105 = arith.constant 1 : index
    %c0_106 = arith.constant 0 : index
    %c0_107 = arith.constant 0 : index
    %103 = vector.load %arg9[%c1_105, %c0_106, %c0_107] : memref<6x10x128xbf16, #tpu.memory_space<vmem>>, vector<4x8x128xbf16>
    %104 = vector.shape_cast %103 : vector<4x8x128xbf16> to vector<32x128xbf16>
    %c3_108 = arith.constant 3 : index
    %c0_109 = arith.constant 0 : index
    %c0_110 = arith.constant 0 : index
    %105 = vector.load %arg5[%c3_108, %c0_109, %c0_110] : memref<9x128x128xbf16, #tpu.memory_space<vmem>>, vector<1x128x128xbf16>
    %106 = vector.shape_cast %105 : vector<1x128x128xbf16> to vector<128x128xbf16>
    %cst_111 = arith.constant dense<0.000000e+00> : vector<32x128xf32>
    %107 = tpu.matmul %104, %106, %cst_111 {dimension_numbers = #tpu.dot_dimension_numbers<[1], [0], [0], [1], [0, 0, 1, 1], [], []>} : vector<32x128xbf16>, vector<128x128xbf16>, vector<32x128xf32> -> vector<32x128xf32>
    %108 = arith.addf %102, %107 : vector<32x128xf32>
    %c1_112 = arith.constant 1 : index
    %c1_113 = arith.constant 1 : index
    %c0_114 = arith.constant 0 : index
    %109 = vector.load %arg9[%c1_112, %c1_113, %c0_114] : memref<6x10x128xbf16, #tpu.memory_space<vmem>>, vector<4x8x128xbf16>
    %110 = vector.shape_cast %109 : vector<4x8x128xbf16> to vector<32x128xbf16>
    %c4_115 = arith.constant 4 : index
    %c0_116 = arith.constant 0 : index
    %c0_117 = arith.constant 0 : index
    %111 = vector.load %arg5[%c4_115, %c0_116, %c0_117] : memref<9x128x128xbf16, #tpu.memory_space<vmem>>, vector<1x128x128xbf16>
    %112 = vector.shape_cast %111 : vector<1x128x128xbf16> to vector<128x128xbf16>
    %cst_118 = arith.constant dense<0.000000e+00> : vector<32x128xf32>
    %113 = tpu.matmul %110, %112, %cst_118 {dimension_numbers = #tpu.dot_dimension_numbers<[1], [0], [0], [1], [0, 0, 1, 1], [], []>} : vector<32x128xbf16>, vector<128x128xbf16>, vector<32x128xf32> -> vector<32x128xf32>
    %114 = arith.addf %108, %113 : vector<32x128xf32>
    %c1_119 = arith.constant 1 : index
    %c2_120 = arith.constant 2 : index
    %c0_121 = arith.constant 0 : index
    %115 = vector.load %arg9[%c1_119, %c2_120, %c0_121] : memref<6x10x128xbf16, #tpu.memory_space<vmem>>, vector<4x8x128xbf16>
    %116 = vector.shape_cast %115 : vector<4x8x128xbf16> to vector<32x128xbf16>
    %c5_122 = arith.constant 5 : index
    %c0_123 = arith.constant 0 : index
    %c0_124 = arith.constant 0 : index
    %117 = vector.load %arg5[%c5_122, %c0_123, %c0_124] : memref<9x128x128xbf16, #tpu.memory_space<vmem>>, vector<1x128x128xbf16>
    %118 = vector.shape_cast %117 : vector<1x128x128xbf16> to vector<128x128xbf16>
    %cst_125 = arith.constant dense<0.000000e+00> : vector<32x128xf32>
    %119 = tpu.matmul %116, %118, %cst_125 {dimension_numbers = #tpu.dot_dimension_numbers<[1], [0], [0], [1], [0, 0, 1, 1], [], []>} : vector<32x128xbf16>, vector<128x128xbf16>, vector<32x128xf32> -> vector<32x128xf32>
    %120 = arith.addf %114, %119 : vector<32x128xf32>
    %c2_126 = arith.constant 2 : index
    %c0_127 = arith.constant 0 : index
    %c0_128 = arith.constant 0 : index
    %121 = vector.load %arg9[%c2_126, %c0_127, %c0_128] : memref<6x10x128xbf16, #tpu.memory_space<vmem>>, vector<4x8x128xbf16>
    %122 = vector.shape_cast %121 : vector<4x8x128xbf16> to vector<32x128xbf16>
    %c6_129 = arith.constant 6 : index
    %c0_130 = arith.constant 0 : index
    %c0_131 = arith.constant 0 : index
    %123 = vector.load %arg5[%c6_129, %c0_130, %c0_131] : memref<9x128x128xbf16, #tpu.memory_space<vmem>>, vector<1x128x128xbf16>
    %124 = vector.shape_cast %123 : vector<1x128x128xbf16> to vector<128x128xbf16>
    %cst_132 = arith.constant dense<0.000000e+00> : vector<32x128xf32>
    %125 = tpu.matmul %122, %124, %cst_132 {dimension_numbers = #tpu.dot_dimension_numbers<[1], [0], [0], [1], [0, 0, 1, 1], [], []>} : vector<32x128xbf16>, vector<128x128xbf16>, vector<32x128xf32> -> vector<32x128xf32>
    %126 = arith.addf %120, %125 : vector<32x128xf32>
    %c2_133 = arith.constant 2 : index
    %c1_134 = arith.constant 1 : index
    %c0_135 = arith.constant 0 : index
    %127 = vector.load %arg9[%c2_133, %c1_134, %c0_135] : memref<6x10x128xbf16, #tpu.memory_space<vmem>>, vector<4x8x128xbf16>
    %128 = vector.shape_cast %127 : vector<4x8x128xbf16> to vector<32x128xbf16>
    %c7_136 = arith.constant 7 : index
    %c0_137 = arith.constant 0 : index
    %c0_138 = arith.constant 0 : index
    %129 = vector.load %arg5[%c7_136, %c0_137, %c0_138] : memref<9x128x128xbf16, #tpu.memory_space<vmem>>, vector<1x128x128xbf16>
    %130 = vector.shape_cast %129 : vector<1x128x128xbf16> to vector<128x128xbf16>
    %cst_139 = arith.constant dense<0.000000e+00> : vector<32x128xf32>
    %131 = tpu.matmul %128, %130, %cst_139 {dimension_numbers = #tpu.dot_dimension_numbers<[1], [0], [0], [1], [0, 0, 1, 1], [], []>} : vector<32x128xbf16>, vector<128x128xbf16>, vector<32x128xf32> -> vector<32x128xf32>
    %132 = arith.addf %126, %131 : vector<32x128xf32>
    %c2_140 = arith.constant 2 : index
    %c2_141 = arith.constant 2 : index
    %c0_142 = arith.constant 0 : index
    %133 = vector.load %arg9[%c2_140, %c2_141, %c0_142] : memref<6x10x128xbf16, #tpu.memory_space<vmem>>, vector<4x8x128xbf16>
    %134 = vector.shape_cast %133 : vector<4x8x128xbf16> to vector<32x128xbf16>
    %c8_143 = arith.constant 8 : index
    %c0_144 = arith.constant 0 : index
    %c0_145 = arith.constant 0 : index
    %135 = vector.load %arg5[%c8_143, %c0_144, %c0_145] : memref<9x128x128xbf16, #tpu.memory_space<vmem>>, vector<1x128x128xbf16>
    %136 = vector.shape_cast %135 : vector<1x128x128xbf16> to vector<128x128xbf16>
    %cst_146 = arith.constant dense<0.000000e+00> : vector<32x128xf32>
    %137 = tpu.matmul %134, %136, %cst_146 {dimension_numbers = #tpu.dot_dimension_numbers<[1], [0], [0], [1], [0, 0, 1, 1], [], []>} : vector<32x128xbf16>, vector<128x128xbf16>, vector<32x128xf32> -> vector<32x128xf32>
    %138 = arith.addf %132, %137 : vector<32x128xf32>
    %c0_147 = arith.constant 0 : index
    %c0_148 = arith.constant 0 : index
    %139 = vector.load %arg6[%c0_147, %c0_148] : memref<1x128xf32, #tpu.memory_space<vmem>>, vector<1x128xf32>
    %140 = vector.broadcast %139 : vector<1x128xf32> to vector<32x128xf32>
    %141 = arith.addf %138, %140 : vector<32x128xf32>
    %cst_149 = arith.constant 0.000000e+00 : f32
    %142 = vector.broadcast %cst_149 : f32 to vector<32x128xf32>
    %143 = arith.maximumf %141, %142 : vector<32x128xf32>
    %144 = vector.shape_cast %143 : vector<32x128xf32> to vector<4x8x128xf32>
    %c0_150 = arith.constant 0 : index
    %c0_151 = arith.constant 0 : index
    %c0_152 = arith.constant 0 : index
    %c0_153 = arith.constant 0 : index
    %145 = vector.load %arg7[%c0_150, %c0_151, %c0_152, %c0_153] : memref<1x4x8x128xf32, #tpu.memory_space<vmem>>, vector<1x4x8x128xf32>
    %146 = vector.shape_cast %145 : vector<1x4x8x128xf32> to vector<4x8x128xf32>
    %147 = vector.shape_cast %144 : vector<4x8x128xf32> to vector<1x4x8x128xf32>
    tpu.vector_store %arg7[%c0_150, %c0_151, %c0_152, %c0_153], %147 {strides = array<i32>} : memref<1x4x8x128xf32, #tpu.memory_space<vmem>>, vector<1x4x8x128xf32>,
    return
  }
  func.func @transform_0(%arg0: i32, %arg1: i32) -> (i32, i32, i32, i32, i32) {
    %c0_i32 = arith.constant 0 : i32
    %c0_i32_0 = arith.constant 0 : i32
    %c0_i32_1 = arith.constant 0 : i32
    %c0_i32_2 = arith.constant 0 : i32
    return %arg0, %arg1, %c0_i32, %c0_i32_0, %c0_i32_1 : i32, i32, i32, i32, i32
  }
  func.func @transform_1(%arg0: i32, %arg1: i32) -> (i32, i32, i32) {
    %c0_i32 = arith.constant 0 : i32
    %c0_i32_0 = arith.constant 0 : i32
    %c0_i32_1 = arith.constant 0 : i32
    %c0_i32_2 = arith.constant 0 : i32
    return %c0_i32, %c0_i32_0, %c0_i32_1 : i32, i32, i32
  }
  func.func @transform_2(%arg0: i32, %arg1: i32) -> (i32, i32) {
    %c0_i32 = arith.constant 0 : i32
    %c0_i32_0 = arith.constant 0 : i32
    %c0_i32_1 = arith.constant 0 : i32
    return %c0_i32, %c0_i32_0 : i32, i32
  }
  func.func @transform_3(%arg0: i32, %arg1: i32) -> (i32, i32, i32) {
    %c0_i32 = arith.constant 0 : i32
    %c0_i32_0 = arith.constant 0 : i32
    %c0_i32_1 = arith.constant 0 : i32
    %c0_i32_2 = arith.constant 0 : i32
    return %c0_i32, %c0_i32_0, %c0_i32_1 : i32, i32, i32
  }
  func.func @transform_4(%arg0: i32, %arg1: i32) -> (i32, i32) {
    %c0_i32 = arith.constant 0 : i32
    %c0_i32_0 = arith.constant 0 : i32
    %c0_i32_1 = arith.constant 0 : i32
    return %c0_i32, %c0_i32_0 : i32, i32
  }
  func.func @transform_5(%arg0: i32, %arg1: i32) -> (i32, i32, i32, i32) {
    %c0_i32 = arith.constant 0 : i32
    %c0_i32_0 = arith.constant 0 : i32
    %c0_i32_1 = arith.constant 0 : i32
    return %arg0, %arg1, %c0_i32, %c0_i32_0 : i32, i32, i32, i32
  }
}

</mosaic_0001>

<bundles_post_ra>
// kernel: tpu_custom_call.1
= control target key start
LH: loop header
LB: loop body
LE: loop exit
PB: predicated region body
PF: predicated region fallthrough
CT: control target
= control target key end

     0   :  { %s6134_s0 = inlined_call_operand.hbm [shape: bf16[2,16,2,8,256], index: 0, kind: input, shape index: {}]   ;;  %s6135_s1 = inlined_call_operand.hbm [shape: bf16[9,128,128], index: 1, kind: input, shape index: {}]   ;;  %s6136_s2 = inlined_call_operand.vmem [shape: f32[1,128], index: 2, kind: input, shape index: {}]   ;;  %s6137_s3 = inlined_call_operand.hbm [shape: bf16[9,128,128], index: 3, kind: input, shape index: {}]   ;;  %s6138_s4 = inlined_call_operand.vmem [shape: f32[1,128], index: 4, kind: input, shape index: {}]   ;;  %s6139_s5 = inlined_call_operand.hbm [shape: f32[2,8,8,128], index: 5, kind: output, shape index: {}]  }
   0x1   :  { %6149 = sst [smem:[#allocation18_spill]] %s6135_s1 }
   0x2   :  { %6150 = sst [smem:[#allocation19_spill]] %s6137_s3 }
   0x3   :  { %6151 = sst [smem:[#allocation20_spill]] %s6138_s4 }
   0x4   :  { %6152 = sst [smem:[#allocation21_spill]] %s6139_s5 }
   0x5   :  { %10 = vsyncpa [#allocation5], 0 }
   0x6   :  { %12 = vsyncpa [#allocation5 + $0x1], 0 }
   0x7   :  { %13 = vsyncpa [#allocation8], 0 }
   0x8   :  { %14 = vsyncpa [#allocation6], 0 }
   0x9   :  { %16 = vsyncpa [#allocation6 + $0x1], 0  ;;  %s5360_s18 = smov 0   ;;  %s5362_s19 = smov 0  }
   0xa   :  { %s5364_s20 = smov 0   ;;  %s5366_s21 = smov 0  }
   0xb   :  { %s5368_s22 = smov 0   ;;  %s5370_s23 = smov 0  }
   0xc   :  { %s5372_s24 = smov 0   ;;  %s5374_s25 = smov 0  }
   0xd LB: > { %6153 = sst [smem:[#allocation14_spill]] %s5286_s18  ;;  %s3987_s26 = sadd.s32 4294967295, %s5314_s25   ;;  %s5314_s25 = sphi %s5374_s25, %s22_s25   ;;  %s5310_s24 = sphi %s5372_s24, %s6193_s24   ;;  %s5306_s23 = sphi %s5370_s23, %s6192_s23   ;;  %s5302_s22 = sphi %s5368_s22, %s6191_s22   ;;  %s5298_s21 = sphi %s5366_s21, %s6190_s21   ;;  %s5294_s20 = sphi %s5364_s20, %s6189_s20   ;;  %s5290_s19 = sphi %s5362_s19, %s6188_s19   ;;  %s5286_s18 = sphi %s5360_s18, %s6187_s18  }
   0xe   : > { %s3988_s27 = sadd.s32 4294967294, %s5314_s25   ;;  %p56_p0 = scmp.ne.s32.totalorder %s5290_s19, %s5286_s18 }
   0xf   : > { %p5404_p1 = scmp.eq.s32.totalorder %s3987_s26, 0  ;;  %p5408_p2 = scmp.eq.s32.totalorder %s3987_s26, 3 }
  0x10   : > { %p172_p3 = scmp.eq.s32.totalorder %s3988_s27, 3  ;;  %p3989_p5 = scmp.ge.s32.totalorder %s5314_s25, 1 }
  0x11   : > { %s6154_s28 = scalar_select %p5404_p1, 1, 0 }
  0x12   : > { %p5414_p4 = por %p5404_p1, %p56_p0  ;;  %p5419_p6 = por %p172_p3, %p56_p0 }
  0x13   : > { %p179_p7 = scmp.lt.s32.totalorder %s5314_s25, 5  ;;  %s5316_s8 = smov [#allocation7]  }
  0x14   : > { %s6156_s30 = scalar_select %p5414_p4, 1, 0 }
  0x15   : > { %s6157_s6 = scalar_select %p5419_p6, 1, 0 }
  0x16   : > { %p5424_p8 = pnand %p3989_p5, %p179_p7  ;;  %s191_s9 = sshll.u32 %s5316_s8, 4  ;;  %s192_s9 = int_to_ptr.vmem [resolvable:$true] %s191_s9 }
  0x17   : > { %6158 = sst [smem:[#allocation15_spill]] %s6157_s6  ;;  %s5317_s11 = smov [#allocation9]  }
  0x18   : > { %p4878_p9 = pneg %p5424_p8  ;;  %s207_s12 = sshll.u32 %s5317_s11, 4  ;;  %s208_s12 = int_to_ptr.vmem [resolvable:$true] %s207_s12 }
  0x19   : > { %s5145_s13 = scalar_lea.vmem %s192_s9, 9216  ;;  %p5153_p3 = scmp.lt.s32.totalorder %s192_s9, %s192_s9 }
  0x1a   : > { %p5432_p10 = pnand %p4878_p9, %p5404_p1  ;;  %p5146_p12 = scmp.ne.s32.totalorder %s192_s9, %s5145_s13 }
  0x1b   : > { %p5154_p5 = scmp.lt.s32.totalorder %s5145_s13, %s5145_s13 }
  0x1c   : > { %p5136_p11 = pneg %p5432_p10 }
  0x1d   : > { %p5155_p7 = por %p5154_p5, %p5153_p3 }
  0x1e   : > { %p5148_p13 = pnand %p5146_p12, %p5136_p11 }
  0x20   : > { %p5149_p0 = pneg %p5148_p13 }
  0x22   : > { %p5156_p9 = pnand %p5155_p7, %p5149_p0 }
  0x24   : > { %5159 = shalt.err (!%p5156_p9)
}
  0x25   : > { %s5318_s14 = smov 64   ;;  %s5319_s15 = smov 4  }
  0x26   : > { %s6161_s1 = sld [smem:[#allocation18_spill]]  ;;  %s5171_s26 = scalar_lea.vmem %s208_s12, 9216 }
  0x27   : > { %p5172_p6 = scmp.ne.s32.totalorder %s208_s12, %s5171_s26  ;;  %p5179_p1 = scmp.lt.s32.totalorder %s208_s12, %s208_s12 }
  0x28   : > { %p5180_p4 = scmp.lt.s32.totalorder %s5171_s26, %s5171_s26 }
  0x29   : > { %p5174_p12 = pnand %p5172_p6, %p5136_p11 }
  0x2a   : > { %p5181_p3 = por %p5180_p4, %p5179_p1 }
  0x2b   : > { %p5175_p13 = pneg %p5174_p12 }
  0x2c   : > { %4881 = dma.hbm_to_vmem [thread:$0]  (!%p5432_p10), %s6161_s1, 9216, %s192_s9, [#allocation8], %s5318_s14, %s5318_s14, %s5319_s15  }
  0x2d   : > { %p5182_p0 = pnand %p5181_p3, %p5175_p13 }
  0x2f   : > { %5185 = shalt.err (!%p5182_p0)
}
  0x30   : > { %s6162_s3 = sld [smem:[#allocation19_spill]]  ;;  %s31_s9 = sadd.s32 1, %s5306_s23 }
  0x31   : > { %s34_s11 = sadd.s32 1, %s5310_s24  ;;  %p32_p1 = scmp.ge.s32.totalorder %s31_s9, 2 }
  0x32   : > { %s43_s10 = sadd.s32 1, %s5294_s20  ;;  %p50_p4 = scmp.ne.s32.totalorder %s5294_s20, %s5290_s19 }
  0x33   : > { %p51_p6 = scmp.eq.s32.totalorder %s5314_s25, 0  ;;  %s6195_s9 = smov (%p32_p1, %s31_s9), 0 }
  0x34   : > { %6163 = sst [smem:[#allocation16_spill]] %s6195_s9  ;;  %s6197_s11 = smov (!%p32_p1, %s34_s11), %s5310_s24 }
  0x35   : > { %s39_s13 = ssub.s32 %s5306_s23, %s6195_s9  ;;  %p5465_p11 = por %p51_p6, %p50_p4 }
  0x36   : > { %4884 = dma.hbm_to_vmem [thread:$0]  (!%p5432_p10), %s6162_s3, 9216, %s208_s12, [#allocation8], %s5318_s14, %s5318_s14, %s5319_s15  }
  0x37   : > { %p36_p10 = scmp.ge.s32.totalorder %s6197_s11, 2  ;;  %p5471_p5 = por %p5408_p2, %p50_p4 }
  0x38   : > { %p4895_p7 = scmp.lt.s32.totalorder %s5314_s25, 4  ;;  %s224_s14 = sand.u32 1, %s5294_s20  }
  0x39   : > { %s6165_s12 = scalar_select %p5471_p5, 1, 0 }
  0x3a   : > { %s6199_s11 = smov (%p36_p10, %s6197_s11), 0  ;;  %s3993_s15 = sshll.u32 %s224_s14, 7 }
  0x3b   : > { %6166 = sst [smem:[#allocation17_spill]] %s6165_s12  ;;  %s38_s17 = ssub.s32 %s5310_s24, %s6199_s11 }
  0x3c   : > { %s40_s26 = sor.u32 %s39_s13, %s38_s17  ;;  %s4238_s27 = sshll.u32 %s5306_s23, 5 }
  0x3d   : > { %p41_p9 = scmp.eq.s32.totalorder %s40_s26, 0  ;;  %s3996_s8 = sshll.u32 %s5310_s24, 6 }
  0x3e   : > { %s235_s1 = sadd.s32 %s4238_s27, %s3996_s8  ;;  %s228_s3 = scalar_lea.vmem [#allocation4], %s3993_s15 }
  0x3f   : > { %s238_s29 = sshll.u32 %s228_s3, 4  ;;  %s3997_s6 = sshll.u32 %s235_s1, 6  ;;  %s239_s29 = int_to_ptr.vmem [resolvable:$true] %s238_s29 }
  0x40   : > { %s5484_s9 = scalar_select %p41_p9, %s5294_s20, %s43_s10  }
  0x41   : > { %s237_s12 = scalar_lea.hbm %s6134_s0, %s3997_s6  ;;  %p5493_p2 = pnand %p4895_p7, %p5465_p11 }
  0x42   : > { %s225_s13 = scalar_lea.sflag [#allocation5], %s224_s14  ;;  %s5199_s15 = scalar_lea.vmem %s239_s29, 2048 }
  0x43   : > { %p5188_p12 = pneg %p5493_p2  ;;  %p5200_p13 = scmp.ne.s32.totalorder %s239_s29, %s5199_s15 }
  0x44   : > { %s5320_s1 = smov [#allocation4]  }
  0x45   : > { %p5202_p3 = pnand %p5200_p13, %p5188_p12  ;;  %s5204_s3 = sshll.u32 %s5320_s1, 4  ;;  %s5205_s3 = int_to_ptr.vmem [resolvable:$false] %s5204_s3 }
  0x46   : > { %s5206_s10 = scalar_lea.vmem %s5205_s3, 4096  ;;  %p5207_p1 = scmp.lt.s32.totalorder %s239_s29, %s5205_s3 }
  0x47   : > { %p5203_p0 = pneg %p5202_p3  ;;  %p5208_p4 = scmp.lt.s32.totalorder %s5206_s10, %s5199_s15 }
  0x49   : > { %p5209_p6 = por %p5208_p4, %p5207_p1 }
  0x4b   : > { %p5210_p10 = pnand %p5209_p6, %p5203_p0 }
  0x4d   : > { %5213 = shalt.err (!%p5210_p10)
}
  0x4e   : > { %s5321_s5 = smov 128   ;;  %s5322_s18 = smov 8  }
  0x4f   : > { %4888 = dma.hbm_to_vmem [thread:$0]  (!%p5493_p2), %s237_s12, 2048, %s239_s29, %s225_s13, %s5321_s5, %s5321_s5, %s5322_s18  }
  0x50   : > { %250 = sbr.rel (%p5424_p8) target bundleno = 879 (0x36f), region = 40  ;;  %s5504_s6 = sand.u32 (!%p5424_p8), 1, %s5290_s19  }
  0x51   : > { %s3999_s16 = sshll.u32 (!%p5424_p8), %s5504_s6, 7  ;;  %s253_s14 = scalar_lea.sflag (!%p5424_p8), [#allocation5], %s5504_s6 }
  0x52   : > { %s5508_s17 = scalar_lea.vmem (!%p5424_p8), [#allocation4], %s3999_s16  ;;  %p6168_p11 = scmp.ne.s32.totalorder (!%p5424_p8), %s6156_s30, 0 }
  0x55   : > { %5273 = dma.done.wait (%p6168_p11), %s253_s14, 2048  }
  0x56   : > { %5275 = vsyncadd (%p6168_p11), %s253_s14, 4294965248  ;;  %p6169_p7 = scmp.ne.s32.totalorder %s6154_s28, 0 }
  0x58   : > { %5277 = dma.done.wait (%p6169_p7), [#allocation8], 18432  }
  0x59   : > { %5279 = vsyncadd (%p6169_p7), [#allocation8], 4294948864  ;;  %s4002_s4 = sshll.u32 %s5504_s6, 5  ;;  %v5323_v0 = vmov 0.0   ;;  %vm5324_vm0 = vmmov 0   ;;  %v4975_v1 = vld [vmem:[#allocation7 + $0x78] sm:$0xff]  }
  0x5a   : > { %4434 = vmatprep.subr.bf16.mxu0 %v5323_v0  ;;  %4462 = vmatprep.subr.bf16.mxu1 %v5323_v0  ;;  %v4976_v2 = vld [vmem:[#allocation7 + $0x38] sm:$0xff]   ;;  %v4977_v3 = vld [vmem:[#allocation7 + $0x70] sm:$0xff]   ;;  %v4979_v5 = vld [vmem:[#allocation7 + $0x68] sm:$0xff]   ;;  %vm350_vm1 = vcmask 1040384   ;;  %vm351_vm2 = vsmask.f32 256 }
  0x5b   : > { %4450 = vmatprep.mubr.msk.bf16.mxu0 %vm5324_vm0, %v5323_v0  ;;  %4478 = vmatprep.mubr.msk.bf16.mxu1 %vm5324_vm0, %v5323_v0  ;;  %v4978_v4 = vld [vmem:[#allocation7 + $0x30] sm:$0xff]   ;;  %v4980_v6 = vld [vmem:[#allocation7 + $0x28] sm:$0xff]   ;;  %vm377_vm3 = vsmask.f32 7938  ;;  %v4981_v7 = vld [vmem:[#allocation7 + $0x60] sm:$0xff]   ;;  %vm483_vm6 = vcmask 1043456  }
  0x5c   : > { %4435 = vmatpush3.bf16.msra.mxu0 %v4975_v1  ;;  %4463 = vmatpush3.bf16.msra.mxu1 %v4976_v2  ;;  %v4982_v8 = vld [vmem:[#allocation7 + $0x20] sm:$0xff]   ;;  %vm5531_vm4 = vmand %vm350_vm1, %vm351_vm2  ;;  %v4983_v11 = vld [vmem:[#allocation7 + $0x58] sm:$0xff]   ;;  %vm561_vm8 = vsmask.f32 3328  ;;  %vm562_vm9 = vsmask.f32 7440 }
  0x5d   : > { %4436 = vmatprep.subr.bf16.mxu0 %v5323_v0  ;;  %4464 = vmatprep.subr.bf16.mxu1 %v5323_v0  ;;  %vm5536_vm5 = vmand %vm350_vm1, %vm377_vm3  ;;  %v4984_v12 = vld [vmem:[#allocation7 + $0x18] sm:$0xff]   ;;  %v4985_v13 = vld [vmem:[#allocation7 + $0x50] sm:$0xff]   ;;  %vm923_vm11 = vcmask 1042432   ;;  %vm924_vm12 = vcmask 1046532   ;;  %s5977_s7 = scalar_lea.vmem [#allocation10], %s4002_s4  ;;  %p4127_p8 = scmp.ne.s32.totalorder %s5298_s21, 0 }
  0x5e   : > { %v294_v14 = vld [vmem:[%s5508_s17] sm:$0xff]  ;;  %v295_v15 = vld [vmem:[%s5508_s17 + $0x8] sm:$0xff]  ;;  %v296_v16 = vld [vmem:[%s5508_s17 + $0x10] sm:$0xff] }
  0x5f   : > { %v297_v17 = vld [vmem:[%s5508_s17 + $0x18] sm:$0xff]  ;;  %v310_v18 = vmax.bf16 %v295_v15, %v294_v14  ;;  %v353_v19 = vld [vmem:[#allocation2] sm:$0x1]  ;;  %v379_v24 = vld [vmem:[#allocation2 + $0x4] sm:$0x1] }
  0x60   : > { %4437 = vmatpush3.bf16.msra.mxu0 %v4977_v3  ;;  %4465 = vmatpush3.bf16.msra.mxu1 %v4978_v4  ;;  %v356_v20 = vld [vmem:[#allocation2 + $0x8] sm:$0x1]  ;;  %v311_v21 = vmax.bf16 %v297_v17, %v296_v16  ;;  %v354_v22 = vsel %vm5531_vm4, 0, %v353_v19  ;;  %v382_v25 = vld [vmem:[#allocation2 + $0xc] sm:$0x1]  ;;  %v4986_v26 = vld [vmem:[#allocation7 + $0x10] sm:$0xff]  }
  0x61   : > { %4438 = vmatprep.subr.bf16.mxu0 %v5323_v0  ;;  %4466 = vmatprep.subr.bf16.mxu1 %v5323_v0  ;;  %v357_v23 = vsel %vm5531_vm4, 0, %v356_v20  ;;  %v326_v27 = vrot.slane %v310_v18, 4  ;;  %355 = vst [vmem:[#allocation2] sm:$0x1] %v354_v22  ;;  %v380_v28 = vsel %vm5536_vm5, 0, %v379_v24  ;;  %v383_v29 = vsel %vm5536_vm5, 0, %v382_v25  ;;  %vm5564_vm7 = vmand %vm483_vm6, %vm377_vm3 }
  0x62   : > { %358 = vst [vmem:[#allocation2 + $0x8] sm:$0x1] %v357_v23  ;;  %v327_v30 = vrot.slane %v311_v21, 4  ;;  %381 = vst [vmem:[#allocation2 + $0x4] sm:$0x1] %v380_v28  ;;  %v4987_v32 = vld [vmem:[#allocation7 + $0x48] sm:$0xff]  }
  0x63   : > { %384 = vst [vmem:[#allocation2 + $0xc] sm:$0x1] %v383_v29  ;;  %v342_v31 = vmax.bf16 %v326_v27, %v310_v18  ;;  %v4988_v34 = vld [vmem:[#allocation7 + $0x8] sm:$0xff]   ;;  %v4989_v37 = vld [vmem:[#allocation7 + $0x40] sm:$0xff]   ;;  %v300_v44 = vld [vmem:[%s5508_s17 + $0x30] sm:$0xff] }
  0x64   : > { %4439 = vmatpush3.bf16.msra.mxu0 %v4979_v5  ;;  %4467 = vmatpush3.bf16.msra.mxu1 %v4980_v6  ;;  %v343_v33 = vmax.bf16 %v327_v30, %v311_v21  ;;  %v298_v40 = vld [vmem:[%s5508_s17 + $0x20] sm:$0xff]  ;;  %v299_v41 = vld [vmem:[%s5508_s17 + $0x28] sm:$0xff]  ;;  %v301_v45 = vld [vmem:[%s5508_s17 + $0x38] sm:$0xff] }
  0x65   : > { %4440 = vmatprep.subr.bf16.mxu0 %v5323_v0  ;;  %4468 = vmatprep.subr.bf16.mxu1 %v5323_v0  ;;  %v404_v35 = vshrl.u32 %v342_v31, 16  ;;  %v407_v36 = vshll.u32 %v342_v31, 16  ;;  %v4990_v42 = vld [vmem:[#allocation7] sm:$0xff]   ;;  %v312_v46 = vmax.bf16 %v299_v41, %v298_v40  ;;  %v313_v52 = vmax.bf16 %v301_v45, %v300_v44  ;;  %v362_v62 = vld [vmem:[#allocation2 + $0x18] sm:$0x1]  ;;  %v304_v23 = vld [vmem:[%s5508_s17 + $0x50] sm:$0xff] }
  0x66   : > { %v412_v38 = vshrl.u32 %v343_v33, 16  ;;  %v415_v39 = vshll.u32 %v343_v33, 16  ;;  %v359_v47 = vld [vmem:[#allocation2 + $0x10] sm:$0x1]  ;;  %v385_v63 = vld [vmem:[#allocation2 + $0x14] sm:$0x1]  ;;  %vm5610_vm10 = vmor %vm561_vm8, %vm562_vm9 }
  0x67   : > { %v406_v43 = vrot.slane %v404_v35, 7  ;;  %v360_v53 = vsel %vm5531_vm4, 0, %v359_v47  ;;  %v328_v58 = vrot.slane %v312_v46, 4  ;;  %v329_v61 = vrot.slane %v313_v52, 4  ;;  %v388_v5 = vld [vmem:[#allocation2 + $0x1c] sm:$0x1]  ;;  %vm5676_vm13 = vmor %vm923_vm11, %vm924_vm12 }
  0x68   : > { %4441 = vmatpush3.bf16.msra.mxu0 %v4981_v7  ;;  %4469 = vmatpush3.bf16.msra.mxu1 %v4982_v8  ;;  %v414_v48 = vrot.slane %v412_v38, 7  ;;  %v485_v50 = vld [vmem:[#allocation2] sm:$0xf]  ;;  %361 = vst [vmem:[#allocation2 + $0x10] sm:$0x1] %v360_v53  ;;  %v363_v4 = vsel %vm5531_vm4, 0, %v362_v62 }
  0x69   : > { %4442 = vmatprep.subr.bf16.mxu0 %v5323_v0  ;;  %4470 = vmatprep.subr.bf16.mxu1 %v5323_v0  ;;  %v491_v51 = vld [vmem:[#allocation2 + $0x8] sm:$0xf]  ;;  %v409_v54 = vor.u32 %v407_v36, %v406_v43  ;;  %v410_v55 = vrot.slane %v406_v43, 4  ;;  %v488_v56 = vld [vmem:[#allocation2 + $0x4] sm:$0x1]  ;;  %v344_v3 = vmax.bf16 %v328_v58, %v312_v46  ;;  %v345_v8 = vmax.bf16 %v329_v61, %v313_v52  ;;  %v302_v20 = vld [vmem:[%s5508_s17 + $0x40] sm:$0xff] }
  0x6a   : > { %v494_v57 = vld [vmem:[#allocation2 + $0xc] sm:$0x1]  ;;  %v417_v59 = vor.u32 %v415_v39, %v414_v48  ;;  %v418_v60 = vrot.slane %v414_v48, 4  ;;  %364 = vst [vmem:[#allocation2 + $0x18] sm:$0x1] %v363_v4  ;;  %v303_v21 = vld [vmem:[%s5508_s17 + $0x48] sm:$0xff] }
  0x6b   : > { %v486_v1 = vsel %vm5564_vm7, %v409_v54, %v485_v50  ;;  %v489_v2 = vsel %vm5531_vm4, %v410_v55, %v488_v56  ;;  %v423_v14 = vshll.u32 %v344_v3, 16  ;;  %v428_v15 = vshrl.u32 %v345_v8, 16  ;;  %v305_v24 = vld [vmem:[%s5508_s17 + $0x58] sm:$0xff]  ;;  %v365_v25 = vld [vmem:[#allocation2 + $0x20] sm:$0x1] }
  0x6c   : > { %4443 = vmatpush3.bf16.msra.mxu0 %v4983_v11  ;;  %4471 = vmatpush3.bf16.msra.mxu1 %v4984_v12  ;;  %487 = vst [vmem:[#allocation2] sm:$0xf] %v486_v1  ;;  %490 = vst [vmem:[#allocation2 + $0x4] sm:$0x1] %v489_v2  ;;  %v492_v6 = vsel %vm5564_vm7, %v417_v59, %v491_v51  ;;  %v495_v7 = vsel %vm5531_vm4, %v418_v60, %v494_v57  ;;  %v386_v11 = vsel %vm5536_vm5, 0, %v385_v63  ;;  %v4993_v46 = vld [vmem:[#allocation7 + $0xf8] sm:$0xff]  }
  0x6d   : > { %4444 = vmatprep.subr.bf16.mxu0 %v5323_v0  ;;  %4472 = vmatprep.subr.bf16.mxu1 %v5323_v0  ;;  %493 = vst [vmem:[#allocation2 + $0x8] sm:$0xf] %v492_v6  ;;  %496 = vst [vmem:[#allocation2 + $0xc] sm:$0x1] %v495_v7  ;;  %v389_v12 = vsel %vm5536_vm5, 0, %v388_v5  ;;  %v431_v16 = vshll.u32 %v345_v8, 16  ;;  %v315_v40 = vmax.bf16 %v305_v24, %v304_v23 }
  0x6e   : > { %387 = vst [vmem:[#allocation2 + $0x14] sm:$0x1] %v386_v11  ;;  %390 = vst [vmem:[#allocation2 + $0x1c] sm:$0x1] %v389_v12  ;;  %v430_v18 = vrot.slane %v428_v15, 7  ;;  %v366_v29 = vsel %vm5531_vm4, 0, %v365_v25 }
  0x6f   : > { %v497_v19 = vld [vmem:[#allocation2 + $0x10] sm:$0xf]  ;;  %367 = vst [vmem:[#allocation2 + $0x20] sm:$0x1] %v366_v29  ;;  %v368_v41 = vld [vmem:[#allocation2 + $0x28] sm:$0x1] }
  0x70   : > { %4445 = vmatpush3.bf16.msra.mxu0 %v4985_v13  ;;  %4473 = vmatpush3.bf16.msra.mxu1 %v4986_v26  ;;  %v420_v13 = vshrl.u32 %v344_v3, 16  ;;  %v433_v27 = vor.u32 %v431_v16, %v430_v18  ;;  %v434_v28 = vrot.slane %v430_v18, 4  ;;  %v391_v52 = vld [vmem:[#allocation2 + $0x24] sm:$0x1]  ;;  %v394_v57 = vld [vmem:[#allocation2 + $0x2c] sm:$0x1] }
  0x71   : > { %4446 = vmatprep.subr.bf16.mxu0 %v5323_v0  ;;  %4474 = vmatprep.subr.bf16.mxu1 %v5323_v0  ;;  %v503_v33 = vld [vmem:[#allocation2 + $0x18] sm:$0xf]  ;;  %v331_v2 = vrot.slane %v315_v40, 4  ;;  %v369_v3 = vsel %vm5531_vm4, 0, %v368_v41  ;;  %v392_v5 = vsel %vm5536_vm5, 0, %v391_v52  ;;  %v395_v6 = vsel %vm5536_vm5, 0, %v394_v57 }
  0x72   : > { %v422_v17 = vrot.slane %v420_v13, 7  ;;  %v504_v39 = vsel %vm5564_vm7, %v433_v27, %v503_v33  ;;  %370 = vst [vmem:[#allocation2 + $0x28] sm:$0x1] %v369_v3  ;;  %v4992_v8 = vld [vmem:[#allocation7 + $0xb8] sm:$0xff]   ;;  %v4995_v11 = vld [vmem:[#allocation7 + $0xf0] sm:$0xff]  }
  0x73   : > { %v533_v30 = vld [vmem:[#allocation2] sm:$0xf]  ;;  %v5594_v31 = vld [vmem:[#allocation2 + $0x4] sm:$0x1]  ;;  %505 = vst [vmem:[#allocation2 + $0x18] sm:$0xf] %v504_v39 }
  0x74   : > { %4447 = vmatpush3.bf16.msra.mxu0 %v4987_v32  ;;  %4475 = vmatpush3.bf16.msra.mxu1 %v4988_v34  ;;  %v425_v22 = vor.u32 %v423_v14, %v422_v17  ;;  %v426_v26 = vrot.slane %v422_v17, 4  ;;  %v314_v34 = vmax.bf16 %v303_v21, %v302_v20  ;;  %v534_v35 = vld [vmem:[#allocation2 + $0x8] sm:$0xf]  ;;  %v5598_v36 = vld [vmem:[#allocation2 + $0xc] sm:$0x1]  ;;  %v568_v38 = vshll.u32 %v533_v30, 16 }
  0x75   : > { %4448 = vmatprep.subr.bf16.mxu0 %v5323_v0  ;;  %4476 = vmatprep.subr.bf16.mxu1 %v5323_v0  ;;  %v579_v43 = vshrl.u32 %v534_v35, 16  ;;  %v582_v44 = vshll.u32 %v534_v35, 16  ;;  %v588_v45 = vshll.u32 %v5598_v36, 16  ;;  %v500_v47 = vld [vmem:[#allocation2 + $0x14] sm:$0x1]  ;;  %v4014_v59 = vcombine.low %v533_v30, %v534_v35 }
  0x76   : > { %v498_v32 = vsel %vm5564_vm7, %v425_v22, %v497_v19  ;;  %v570_v50 = vrot.slane %v568_v38, 5  ;;  %v506_v51 = vld [vmem:[#allocation2 + $0x1c] sm:$0x1]  ;;  %v501_v60 = vsel %vm5531_vm4, %v426_v26, %v500_v47  ;;  %v330_v1 = vrot.slane %v314_v34, 4  ;;  %393 = vst [vmem:[#allocation2 + $0x24] sm:$0x1] %v392_v5 }
  0x77   : > { %499 = vst [vmem:[#allocation2 + $0x10] sm:$0xf] %v498_v32  ;;  %v581_v54 = vrot.slane %v579_v43, 4  ;;  %v584_v55 = vrot.slane %v582_v44, 5  ;;  %v590_v56 = vrot.slane %v588_v45, 5  ;;  %v507_v61 = vsel %vm5531_vm4, %v434_v28, %v506_v51  ;;  %v4997_v26 = vld [vmem:[#allocation7 + $0xe8] sm:$0xff]  }
  0x78   : > { %4449 = vmatpush3.bf16.msra.mxu0 %v4989_v37  ;;  %4477 = vmatpush3.bf16.msra.mxu1 %v4990_v42  ;;  %v565_v37 = vshrl.u32 %v533_v30, 16  ;;  %v574_v42 = vshll.u32 %v5594_v31, 16  ;;  %502 = vst [vmem:[#allocation2 + $0x14] sm:$0x1] %v501_v60  ;;  %508 = vst [vmem:[#allocation2 + $0x1c] sm:$0x1] %v507_v61  ;;  %v346_v13 = vmax.bf16 %v330_v1, %v314_v34 }
  0x79   : > { %4490 = vmatprep.subr.bf16.mxu0 %v5323_v0  ;;  %4518 = vmatprep.subr.bf16.mxu1 %v5323_v0  ;;  %v585_v63 = vor.u32 %v584_v55, %v581_v54  ;;  %v347_v14 = vmax.bf16 %v331_v2, %v315_v40  ;;  %396 = vst [vmem:[#allocation2 + $0x2c] sm:$0x1] %v395_v6  ;;  %v509_v33 = vld [vmem:[#allocation2 + $0x20] sm:$0xf]  ;;  %v515_v45 = vld [vmem:[#allocation2 + $0x28] sm:$0xf] }
  0x7a   : > { %v567_v48 = vrot.slane %v565_v37, 4  ;;  %v576_v53 = vrot.slane %v574_v42, 5  ;;  %v536_v16 = vld [vmem:[#allocation2 + $0x18] sm:$0xf]  ;;  %v436_v27 = vshrl.u32 %v346_v13, 16  ;;  %v439_v30 = vshll.u32 %v346_v13, 16 }
  0x7b   : > { %4479 = vmatmul.mubr.bf16.vlgmr.msra.gmra.mxu1 %v4014_v59  ;;  %v586_v7 = vrot.slane %v585_v63, 4  ;;  %v607_v20 = vshrl.u32 %v536_v16, 16  ;;  %v610_v21 = vshll.u32 %v536_v16, 16  ;;  %v444_v32 = vshrl.u32 %v347_v14, 16  ;;  %v4994_v40 = vld [vmem:[#allocation7 + $0xb0] sm:$0xff]   ;;  %v5000_v55 = vld [vmem:[#allocation7 + $0xe0] sm:$0xff]  }
  0x7c   : > { %v571_v58 = vor.u32 %v570_v50, %v567_v48  ;;  %4519 = vmatpush3.bf16.msra.mxu1 %v4993_v46  ;;  %4482 = vmatprep.mubr.msk.bf16.mxu1 %vm5324_vm0, %v5323_v0  ;;  %v438_v38 = vrot.slane %v436_v27, 7  ;;  %v447_v39 = vshll.u32 %v347_v14, 16  ;;  %v4996_v60 = vld [vmem:[#allocation7 + $0xa8] sm:$0xff]   ;;  %v4999_v5 = vld [vmem:[#allocation7 + $0xa0] sm:$0xff]   ;;  %v5005_v6 = vld [vmem:[#allocation7 + $0xd0] sm:$0xff]  }
  0x7d   : > { %4520 = vmatprep.subr.bf16.mxu1 %v5323_v0  ;;  %v591_v19 = vsel %vm5610_vm10, %v586_v7, %v590_v56  ;;  %v609_v28 = vrot.slane %v607_v20, 4  ;;  %v612_v29 = vrot.slane %v610_v21, 5  ;;  %v446_v44 = vrot.slane %v444_v32, 7  ;;  %v512_v50 = vld [vmem:[#allocation2 + $0x24] sm:$0x1] }
  0x7e   : > { %v572_v4 = vrot.slane %v571_v58, 4  ;;  %v535_v12 = vld [vmem:[#allocation2 + $0x10] sm:$0xf]  ;;  %v441_v47 = vor.u32 %v439_v30, %v438_v38  ;;  %v442_v48 = vrot.slane %v438_v38, 4  ;;  %v905_v27 = vld [vmem:[#allocation2] sm:$0xe] }
  0x7f   : > { %v593_v17 = vshrl.u32 %v535_v12, 16  ;;  %v596_v18 = vshll.u32 %v535_v12, 16  ;;  %v4015_v22 = vcombine.low %v535_v12, %v536_v16  ;;  %v5628_v34 = vld [vmem:[#allocation2 + $0x14] sm:$0x1]  ;;  %v5630_v35 = vld [vmem:[#allocation2 + $0x1c] sm:$0x1]  ;;  %v613_v42 = vor.u32 %v612_v29, %v609_v28 }
  0x80   : > { %v577_v15 = vsel %vm5610_vm10, %v572_v4, %v576_v53  ;;  %4521 = vmatpush3.bf16.msra.mxu1 %v4995_v11  ;;  %v602_v41 = vshll.u32 %v5628_v34, 16  ;;  %v616_v43 = vshll.u32 %v5630_v35, 16  ;;  %v518_v51 = vld [vmem:[#allocation2 + $0x2c] sm:$0x1]  ;;  %v449_v56 = vor.u32 %v447_v39, %v446_v44  ;;  %v906_v32 = vld [vmem:[#allocation2 + $0x8] sm:$0xe] }
  0x81   : > { %v4003_v23 = vcombine.low %v577_v15, %v591_v19  ;;  %v595_v24 = vrot.slane %v593_v17, 4  ;;  %v598_v25 = vrot.slane %v596_v18, 5  ;;  %4522 = vmatprep.subr.bf16.mxu1 %v5323_v0  ;;  %v614_v53 = vrot.slane %v613_v42, 4  ;;  %v5002_v4 = vld [vmem:[#allocation7 + $0xd8] sm:$0xff]   ;;  %v5009_v38 = vld [vmem:[#allocation7 + $0xc0] sm:$0xff]   ;;  %v5006_v42 = vld [vmem:[#allocation7 + $0x88] sm:$0xff]  }
  0x82   : > { %v604_v52 = vrot.slane %v602_v41, 5  ;;  %v618_v54 = vrot.slane %v616_v43, 5  ;;  %v450_v57 = vrot.slane %v446_v44, 4  ;;  %v510_v58 = vsel %vm5564_vm7, %v441_v47, %v509_v33  ;;  %v5001_v11 = vld [vmem:[#allocation7 + $0x98] sm:$0xff]  }
  0x83   : > { %4451 = vmatmul.mubr.bf16.vlgmr.msra.gmra.mxu0 %v4003_v23  ;;  %v599_v37 = vor.u32 %v598_v25, %v595_v24  ;;  %4483 = vmatmul.mubr.bf16.gmra.mxu1 %v4015_v22  ;;  %v513_v59 = vsel %vm5531_vm4, %v442_v48, %v512_v50  ;;  %511 = vst [vmem:[#allocation2 + $0x20] sm:$0xf] %v510_v58  ;;  %v5004_v23 = vld [vmem:[#allocation7 + $0x90] sm:$0xff]   ;;  %v5007_v24 = vld [vmem:[#allocation7 + $0xc8] sm:$0xff]   ;;  %v928_v39 = vrot.slane %v5594_v31, 5 }
  0x84   : > { %4491 = vmatpush3.bf16.msra.mxu0 %v4992_v8  ;;  %4454 = vmatprep.mubr.msk.bf16.mxu0 %vm5324_vm0, %v5323_v0  ;;  %v619_v63 = vsel %vm5610_vm10, %v614_v53, %v618_v54  ;;  %514 = vst [vmem:[#allocation2 + $0x24] sm:$0x1] %v513_v59  ;;  %v516_v1 = vsel %vm5564_vm7, %v449_v56, %v515_v45  ;;  %v4025_v45 = vrot.slane %v905_v27, 9  ;;  %v5011_v47 = vld [vmem:[#allocation2 + $0x8] ss:$8 sps:$4 sm:$0xff]   ;;  %v307_v48 = vld [vmem:[%s5508_s17 + $0x68] sm:$0xff] }
  0x85   : > { %4492 = vmatprep.subr.bf16.mxu0 %v5323_v0  ;;  %v600_v46 = vrot.slane %v599_v37, 4  ;;  %4523 = vmatpush3.bf16.msra.mxu1 %v4997_v26  ;;  %517 = vst [vmem:[#allocation2 + $0x28] sm:$0xf] %v516_v1  ;;  %v519_v3 = vsel %vm5531_vm4, %v450_v57, %v518_v51  ;;  %v5012_v53 = vld [vmem:[#allocation7 + $0x178] sm:$0xff]   ;;  %v907_v59 = vld [vmem:[#allocation2 + $0x10] sm:$0xe] }
  0x86   : > { %4486 = vmatprep.mubr.msk.bf16.mxu1 %vm5324_vm0, %v5323_v0  ;;  %4524 = vmatprep.subr.bf16.mxu1 %v5323_v0  ;;  %520 = vst [vmem:[#allocation2 + $0x2c] sm:$0x1] %v519_v3  ;;  %v929_v56 = vsel %vm5676_vm13, %v4025_v45, %v928_v39  ;;  %v5010_v1 = vld [vmem:[#allocation7 + $0x138] sm:$0xff]   ;;  %v936_v3 = vrot.slane %v5628_v34, 5  ;;  %v5015_v27 = vld [vmem:[#allocation7 + $0x128] sm:$0xff]   ;;  %v5018_v39 = vld [vmem:[#allocation7 + $0x120] sm:$0xff]  }
  0x87   : > { %v605_v61 = vsel %vm5610_vm10, %v600_v46, %v604_v52  ;;  %v4026_v46 = vrot.slane %v906_v32, 9  ;;  %v371_v52 = vld [vmem:[#allocation2 + $0x30] sm:$0x1] }
  0x88   : > { %4493 = vmatpush3.bf16.msra.mxu0 %v4994_v40  ;;  %v4004_v2 = vcombine.low %v605_v61, %v619_v63  ;;  %v932_v40 = vrot.slane %v5598_v36, 5  ;;  %v306_v36 = vld [vmem:[%s5508_s17 + $0x60] sm:$0xff]  ;;  %v372_v54 = vsel %vm5531_vm4, 0, %v371_v52  ;;  %v1247_v52 = vld [vmem:[#allocation2 + $0x18] sm:$0xf] }
  0x89   : > { %4494 = vmatprep.subr.bf16.mxu0 %v5323_v0  ;;  %4525 = vmatpush3.bf16.msra.mxu1 %v5000_v55  ;;  %v316_v51 = vmax.bf16 %v307_v48, %v306_v36  ;;  %v5008_v55 = vld [vmem:[#allocation7 + $0x80] sm:$0xff]   ;;  %373 = vst [vmem:[#allocation2 + $0x30] sm:$0x1] %v372_v54  ;;  %v5024_v36 = vld [vmem:[#allocation7 + $0x150] sm:$0xff]  }
  0x8a   : > { %4526 = vmatprep.subr.bf16.mxu1 %v5323_v0  ;;  %v537_v7 = vld [vmem:[#allocation2 + $0x20] sm:$0xf]  ;;  %v933_v57 = vsel %vm5676_vm13, %v4026_v46, %v932_v40  ;;  %v5022_v40 = vld [vmem:[#allocation7 + $0x158] sm:$0xff]  }
  0x8b   : > { %4455 = vmatmul.mubr.bf16.gmra.mxu0 %v4004_v2  ;;  %v5657_v8 = vld [vmem:[#allocation2 + $0x24] sm:$0x1]  ;;  %v621_v13 = vshrl.u32 %v537_v7, 16  ;;  %v624_v14 = vshll.u32 %v537_v7, 16  ;;  %v332_v58 = vrot.slane %v316_v51, 4  ;;  %v4031_v63 = vcombine.low %v929_v56, %v933_v57 }
  0x8c   : > { %4495 = vmatpush3.bf16.msra.mxu0 %v4996_v60  ;;  %4458 = vmatprep.mubr.msk.bf16.mxu0 %vm5324_vm0, %v5323_v0  ;;  %v538_v12 = vld [vmem:[#allocation2 + $0x28] sm:$0xf]  ;;  %v630_v15 = vshll.u32 %v5657_v8, 16  ;;  %v908_v60 = vld [vmem:[#allocation2 + $0x18] sm:$0xe]  ;;  %v5014_v2 = vld [vmem:[#allocation7 + $0x170] sm:$0xff]  }
  0x8d   : > { %4496 = vmatprep.subr.bf16.mxu0 %v5323_v0  ;;  %4527 = vmatpush3.bf16.msra.mxu1 %v5002_v4  ;;  %v5662_v16 = vld [vmem:[#allocation2 + $0x2c] sm:$0x1]  ;;  %v635_v17 = vshrl.u32 %v538_v12, 16  ;;  %v638_v18 = vshll.u32 %v538_v12, 16  ;;  %v4016_v19 = vcombine.low %v537_v7, %v538_v12  ;;  %v623_v20 = vrot.slane %v621_v13, 4 }
  0x8e   : > { %4528 = vmatprep.subr.bf16.mxu1 %v5323_v0  ;;  %v626_v21 = vrot.slane %v624_v14, 5  ;;  %v644_v22 = vshll.u32 %v5662_v16, 16  ;;  %v632_v29 = vrot.slane %v630_v15, 5  ;;  %v348_v61 = vmax.bf16 %v332_v58, %v316_v51  ;;  %v5016_v12 = vld [vmem:[#allocation2 + $0x18] ss:$8 sps:$4 sm:$0xff]   ;;  %v5020_v58 = vld [vmem:[#allocation7 + $0x118] sm:$0xff]  }
  0x8f   : > { %v637_v25 = vrot.slane %v635_v17, 4  ;;  %v640_v26 = vrot.slane %v638_v18, 5  ;;  %4487 = vmatmul.mubr.bf16.gmra.mxu1 %v4016_v19  ;;  %v940_v4 = vrot.slane %v5630_v35, 5  ;;  %v4027_v7 = vrot.slane %v907_v59, 9  ;;  %v5017_v14 = vld [vmem:[#allocation7 + $0x168] sm:$0xff]   ;;  %v5013_v18 = vld [vmem:[#allocation7 + $0x130] sm:$0xff]  }
  0x90   : > { %4497 = vmatpush3.bf16.msra.mxu0 %v4999_v5  ;;  %v627_v28 = vor.u32 %v626_v21, %v623_v20  ;;  %v646_v30 = vrot.slane %v644_v22, 5  ;;  %4534 = vmatprep.mubr.msk.bf16.mxu1 %vm5324_vm0, %v5323_v0  ;;  %v452_v5 = vshrl.u32 %v348_v61, 16  ;;  %v909_v15 = vld [vmem:[#allocation2 + $0x20] sm:$0xe]  ;;  %v521_v17 = vld [vmem:[#allocation2 + $0x30] sm:$0xf] }
  0x91   : > { %4498 = vmatprep.subr.bf16.mxu0 %v5323_v0  ;;  %4529 = vmatpush3.bf16.msra.mxu1 %v5005_v6  ;;  %v641_v33 = vor.u32 %v640_v26, %v637_v25  ;;  %v455_v6 = vshll.u32 %v348_v61, 16  ;;  %v910_v34 = vld [vmem:[#allocation2 + $0x28] sm:$0xe]  ;;  %v937_v19 = vsel %vm5676_vm13, %v4027_v7, %v936_v3  ;;  %v5019_v22 = vld [vmem:[#allocation7 + $0x160] sm:$0xff]   ;;  %v5735_v56 = vld [vmem:[#allocation2 + $0x1c] sm:$0x1] }
  0x92   : > { %4530 = vmatprep.subr.bf16.mxu1 %v5323_v0  ;;  %v628_v37 = vrot.slane %v627_v28, 4  ;;  %v5701_v13 = vrot.slane %v452_v5, 7  ;;  %v1243_v21 = vld [vmem:[#allocation2 + $0x8] sm:$0xf]  ;;  %v1245_v26 = vld [vmem:[#allocation2 + $0x10] sm:$0xf] }
  0x93   : > { %v642_v41 = vrot.slane %v641_v33, 4  ;;  %v4030_v28 = vrot.slane %v910_v34, 9  ;;  %v1256_v33 = vshrl.u32 %v1243_v21, 16  ;;  %v1249_v57 = vld [vmem:[#allocation2 + $0x20] sm:$0xf]  ;;  %v1287_v5 = vshll.u32 %v1247_v52, 16 }
  0x94   : > { %4499 = vmatpush3.bf16.msra.mxu0 %v5001_v11  ;;  %v633_v43 = vsel %vm5610_vm10, %v628_v37, %v632_v29  ;;  %v4028_v11 = vrot.slane %v908_v60, 9  ;;  %v457_v35 = vor.u32 %v455_v6, %v5701_v13  ;;  %v948_v29 = vrot.slane %v5662_v16, 5  ;;  %v5722_v16 = vld [vmem:[#allocation2 + $0x14] sm:$0x1] }
  0x95   : > { %4500 = vmatprep.subr.bf16.mxu0 %v5323_v0  ;;  %4531 = vmatpush3.bf16.msra.mxu1 %v5007_v24  ;;  %v647_v31 = vsel %vm5610_vm10, %v642_v41, %v646_v30  ;;  %v944_v24 = vrot.slane %v5657_v8, 5  ;;  %v5718_v30 = vld [vmem:[#allocation2 + $0xc] sm:$0x1]  ;;  %v1259_v8 = vshll.u32 %v1243_v21, 16  ;;  %v1270_v37 = vshrl.u32 %v1245_v26, 16 }
  0x96   : > { %4532 = vmatprep.subr.bf16.mxu1 %v5323_v0  ;;  %v4005_v50 = vcombine.low %v633_v43, %v647_v31  ;;  %v941_v20 = vsel %vm5676_vm13, %v4028_v11, %v940_v4  ;;  %v522_v25 = vsel %vm5564_vm7, %v457_v35, %v521_v17  ;;  %v1265_v41 = vshll.u32 %v5718_v30, 16  ;;  %v1480_v31 = vld [vmem:[#allocation2 + $0x10] sm:$0xe]  ;;  %v5023_v11 = vld [vmem:[#allocation7 + $0x110] sm:$0xff]   ;;  %v1481_v21 = vld [vmem:[#allocation2 + $0x18] sm:$0xe] }
  0x97   : > { %523 = vst [vmem:[#allocation2 + $0x30] sm:$0xf] %v522_v25  ;;  %v4032_v32 = vcombine.low %v937_v19, %v941_v20  ;;  %v949_v43 = vsel %vm5676_vm13, %v4030_v28, %v948_v29  ;;  %v1258_v45 = vrot.slane %v1256_v33, 4  ;;  %v1261_v46 = vrot.slane %v1259_v8, 5  ;;  %v5028_v19 = vld [vmem:[#allocation7 + $0x140] sm:$0xff]   ;;  %v5025_v28 = vld [vmem:[#allocation7 + $0x108] sm:$0xff]  }
  0x98   : > { %4501 = vmatpush3.bf16.msra.mxu0 %v5004_v23  ;;  %v4029_v23 = vrot.slane %v909_v15, 9  ;;  %v1272_v48 = vrot.slane %v1270_v37, 4  ;;  %v1279_v54 = vshll.u32 %v5722_v16, 16  ;;  %v4065_v61 = vrot.slane %v1480_v31, 9  ;;  %v1482_v8 = vld [vmem:[#allocation2 + $0x20] sm:$0xe] }
  0x99   : > { %4502 = vmatprep.subr.bf16.mxu0 %v5323_v0  ;;  %4533 = vmatpush3.bf16.msra.mxu1 %v5009_v38  ;;  %v1273_v38 = vshll.u32 %v1245_v26, 16  ;;  %v1262_v59 = vor.u32 %v1261_v46, %v1258_v45  ;;  %v1284_v4 = vshrl.u32 %v1247_v52, 16  ;;  %v1293_v6 = vshll.u32 %v5735_v56, 16  ;;  %v5027_v45 = vld [vmem:[#allocation7 + $0x100] sm:$0xff]   ;;  %v5032_v52 = vld [vmem:[#allocation7 + $0x1f0] sm:$0xff]  }
  0x9a   : > { %4574 = vmatprep.subr.bf16.mxu1 %v5323_v0  ;;  %4459 = vmatmul.mubr.bf16.gmra.mxu0 %v4005_v50  ;;  %v1298_v7 = vshrl.u32 %v1249_v57, 16  ;;  %v458_v15 = vrot.slane %v5701_v13, 4  ;;  %v5750_v34 = vrot.slane %v1265_v41, 5  ;;  %v1281_v35 = vrot.slane %v1279_v54, 5 }
  0x9b   : > { %4506 = vmatprep.mubr.msk.bf16.mxu0 %vm5324_vm0, %v5323_v0  ;;  %v1275_v50 = vrot.slane %v1273_v38, 5  ;;  %v5748_v17 = vrot.slane %v1262_v59, 4  ;;  %v1286_v25 = vrot.slane %v1284_v4, 4  ;;  %v1289_v26 = vrot.slane %v1287_v5, 5 }
  0x9c   : > { %4503 = vmatpush3.bf16.msra.mxu0 %v5006_v42  ;;  %4535 = vmatmul.mubr.bf16.vlgmr.msra.gmra.mxu1 %v5011_v47  ;;  %v945_v42 = vsel %vm5676_vm13, %v4029_v23, %v944_v24  ;;  %v1479_v47 = vld [vmem:[#allocation2 + $0x8] sm:$0xe]  ;;  %v5761_v29 = vrot.slane %v1293_v6, 5  ;;  %v4066_v37 = vrot.slane %v1481_v21, 9  ;;  %v1507_v38 = vrot.slane %v5735_v56, 5  ;;  %v5031_v21 = vld [vmem:[#allocation7 + $0x1b0] sm:$0xff]  }
  0x9d   : > { %4504 = vmatprep.subr.bf16.mxu0 %v5323_v0  ;;  %4575 = vmatpush3.bf16.msra.mxu1 %v5012_v53  ;;  %v4033_v53 = vcombine.low %v945_v42, %v949_v43  ;;  %v4064_v60 = vrot.slane %v1479_v47, 9  ;;  %v1276_v3 = vor.u32 %v1275_v50, %v1272_v48  ;;  %v1251_v23 = vld [vmem:[#allocation2 + $0x28] sm:$0xf]  ;;  %v1290_v46 = vor.u32 %v1289_v26, %v1286_v25  ;;  %v1252_v48 = vld [vmem:[#allocation2 + $0x2c] sm:$0x1] }
  0x9e   : > { %4538 = vmatprep.mubr.msk.bf16.mxu1 %vm5324_vm0, %v5323_v0  ;;  %4576 = vmatprep.subr.bf16.mxu1 %v5323_v0  ;;  %v5021_v51 = vld [vmem:[#allocation2 + $0x28] ss:$8 sps:$4 sm:$0xff]   ;;  %v4067_v31 = vrot.slane %v1482_v8, 9  ;;  %v1268_v50 = vsel %vm5610_vm10, %v5748_v17, %v5750_v34  ;;  %v1321_v4 = vshll.u32 %v1252_v48, 16  ;;  %v1515_v34 = vrot.slane %v1252_v48, 5 }
  0x9f   : > { %v1277_v20 = vrot.slane %v1276_v3, 4  ;;  %v1291_v59 = vrot.slane %v1290_v46, 4  ;;  %v5029_v3 = vld [vmem:[#allocation7 + $0x1b8] sm:$0xff]  }
  0xa0   : > { %4505 = vmatpush3.bf16.msra.mxu0 %v5008_v55  ;;  %v1499_v55 = vrot.slane %v5718_v30, 5  ;;  %v1300_v30 = vrot.slane %v1298_v7, 4  ;;  %v5038_v46 = vld [vmem:[#allocation7 + $0x1d8] sm:$0xff]  }
  0xa1   : > { %4546 = vmatprep.subr.bf16.mxu0 %v5323_v0  ;;  %4577 = vmatpush3.bf16.msra.mxu1 %v5014_v2  ;;  %v5026_v2 = vld [vmem:[#allocation7 + $0x148] sm:$0xff]  }
  0xa2   : > { %4578 = vmatprep.subr.bf16.mxu1 %v5323_v0  ;;  %v1500_v13 = vsel %vm5676_vm13, %v4064_v60, %v1499_v55 }
  0xa3   : > { %4507 = vmatmul.mubr.bf16.vlgmr.msra.gmra.mxu0 %v4031_v63  ;;  %v1503_v63 = vrot.slane %v5722_v16, 5  ;;  %v5030_v16 = vld [vmem:[#allocation7 + $0x1f8] sm:$0xff]  }
  0xa4   : > { %4547 = vmatpush3.bf16.msra.mxu0 %v5010_v1  ;;  %4510 = vmatprep.mubr.msk.bf16.mxu0 %vm5324_vm0, %v5323_v0  ;;  %v5739_v1 = vld [vmem:[#allocation2 + $0x24] sm:$0x1] }
  0xa5   : > { %4548 = vmatprep.subr.bf16.mxu0 %v5323_v0  ;;  %4539 = vmatmul.mubr.bf16.gmra.mxu1 %v5016_v12  ;;  %v1301_v12 = vshll.u32 %v1249_v57, 16  ;;  %v1504_v24 = vsel %vm5676_vm13, %v4065_v61, %v1503_v63  ;;  %v1508_v61 = vsel %vm5676_vm13, %v4066_v37, %v1507_v38 }
  0xa6   : > { %4579 = vmatpush3.bf16.msra.mxu1 %v5017_v14  ;;  %4542 = vmatprep.mubr.msk.bf16.mxu1 %vm5324_vm0, %v5323_v0  ;;  %v1307_v14 = vshll.u32 %v5739_v1, 16  ;;  %v4070_v43 = vcombine.low %v1500_v13, %v1504_v24 }
  0xa7   : > { %4580 = vmatprep.subr.bf16.mxu1 %v5323_v0 }
  0xa8   : > { %4549 = vmatpush3.bf16.msra.mxu0 %v5013_v18  ;;  %v397_v18 = vld [vmem:[#allocation2 + $0x34] sm:$0x1]  ;;  %v5763_v33 = vrot.slane %v1307_v14, 5  ;;  %v1816_v14 = vld [vmem:[#allocation2 + $0x18] sm:$0xf] }
  0xa9   : > { %4550 = vmatprep.subr.bf16.mxu0 %v5323_v0  ;;  %v1841_v24 = vshrl.u32 %v1816_v14, 16  ;;  %v1844_v25 = vshll.u32 %v1816_v14, 16  ;;  %v5042_v14 = vld [vmem:[#allocation7 + $0x1c8] sm:$0xff]  }
  0xaa   : > { %4581 = vmatpush3.bf16.msra.mxu1 %v5019_v22  ;;  %v398_v22 = vsel %vm5536_vm5, 0, %v397_v18 }
  0xab   : > { %4511 = vmatmul.mubr.bf16.gmra.mxu0 %v4032_v32  ;;  %4582 = vmatprep.subr.bf16.mxu1 %v5323_v0  ;;  %399 = vst [vmem:[#allocation2 + $0x34] sm:$0x1] %v398_v22  ;;  %v1303_v32 = vrot.slane %v1301_v12, 5  ;;  %v1814_v12 = vld [vmem:[#allocation2 + $0x10] sm:$0xf] }
  0xac   : > { %4551 = vmatpush3.bf16.msra.mxu0 %v5015_v27  ;;  %4514 = vmatprep.mubr.msk.bf16.mxu0 %vm5324_vm0, %v5323_v0  ;;  %v1253_v27 = vld [vmem:[#allocation2 + $0x30] sm:$0xf] }
  0xad   : > { %4552 = vmatprep.subr.bf16.mxu0 %v5323_v0  ;;  %4543 = vmatmul.mubr.bf16.gmra.mxu1 %v5021_v51  ;;  %v1326_v41 = vshrl.u32 %v1253_v27, 16  ;;  %v1329_v42 = vshll.u32 %v1253_v27, 16  ;;  %v1304_v47 = vor.u32 %v1303_v32, %v1300_v30  ;;  %v1282_v51 = vsel %vm5610_vm10, %v1277_v20, %v1281_v35  ;;  %v5036_v22 = vld [vmem:[#allocation7 + $0x1e0] sm:$0xff]  }
  0xae   : > { %4583 = vmatpush3.bf16.msra.mxu1 %v5022_v40  ;;  %4590 = vmatprep.mubr.msk.bf16.mxu1 %vm5324_vm0, %v5323_v0  ;;  %v1315_v40 = vshll.u32 %v1251_v23, 16  ;;  %v1296_v35 = vsel %vm5610_vm10, %v1291_v59, %v5761_v29  ;;  %v1830_v20 = vshll.u32 %v1814_v12, 16 }
  0xaf   : > { %4584 = vmatprep.subr.bf16.mxu1 %v5323_v0  ;;  %v1328_v57 = vrot.slane %v1326_v41, 4  ;;  %v1305_v60 = vrot.slane %v1304_v47, 4  ;;  %v5806_v41 = vld [vmem:[#allocation2 + $0x1c] sm:$0x1] }
  0xb0   : > { %4553 = vmatpush3.bf16.msra.mxu0 %v5018_v39  ;;  %v1312_v39 = vshrl.u32 %v1251_v23, 16  ;;  %v1317_v55 = vrot.slane %v1315_v40, 5  ;;  %v1323_v23 = vrot.slane %v1321_v4, 5  ;;  %v1832_v38 = vrot.slane %v1830_v20, 5  ;;  %v400_v4 = vld [vmem:[#allocation2 + $0x3c] sm:$0x1] }
  0xb1   : > { %4554 = vmatprep.subr.bf16.mxu0 %v5323_v0  ;;  %v1310_v18 = vsel %vm5610_vm10, %v1305_v60, %v5763_v33  ;;  %v5801_v33 = vld [vmem:[#allocation2 + $0x14] sm:$0x1] }
  0xb2   : > { %4585 = vmatpush3.bf16.msra.mxu1 %v5024_v36  ;;  %v1511_v36 = vrot.slane %v5739_v1, 5  ;;  %v1314_v54 = vrot.slane %v1312_v39, 4  ;;  %v4053_v1 = vcombine.low %v1268_v50, %v1282_v51  ;;  %v4054_v8 = vcombine.low %v1296_v35, %v1310_v18  ;;  %v5033_v39 = vld [vmem:[#allocation7 + $0x1a8] sm:$0xff]   ;;  %v308_v51 = vld [vmem:[%s5508_s17 + $0x70] sm:$0xff] }
  0xb3   : > { %4515 = vmatmul.mubr.bf16.gmra.mxu0 %v4033_v53  ;;  %4586 = vmatprep.subr.bf16.mxu1 %v5323_v0  ;;  %v524_v53 = vld [vmem:[#allocation2 + $0x34] sm:$0x1]  ;;  %v1836_v47 = vshll.u32 %v5801_v33, 16  ;;  %v1850_v50 = vshll.u32 %v5806_v41, 16 }
  0xb4   : > { %4555 = vmatpush3.bf16.msra.mxu0 %v5020_v58  ;;  %4562 = vmatprep.mubr.msk.bf16.mxu0 %vm5324_vm0, %v5323_v0  ;;  %v525_v56 = vsel %vm5531_vm4, %v458_v15, %v524_v53  ;;  %v1331_v58 = vrot.slane %v1329_v42, 5  ;;  %v1512_v63 = vsel %vm5676_vm13, %v4067_v31, %v1511_v36  ;;  %v1318_v6 = vor.u32 %v1317_v55, %v1314_v54  ;;  %v5034_v15 = vld [vmem:[#allocation7 + $0x1e8] sm:$0xff]   ;;  %v1818_v31 = vld [vmem:[#allocation2 + $0x20] sm:$0xf]  ;;  %v1820_v36 = vld [vmem:[#allocation2 + $0x28] sm:$0xf] }
  0xb5   : > { %4556 = vmatprep.subr.bf16.mxu0 %v5323_v0  ;;  %526 = vst [vmem:[#allocation2 + $0x34] sm:$0x1] %v525_v56  ;;  %v4071_v5 = vcombine.low %v1508_v61, %v1512_v63  ;;  %v1843_v42 = vrot.slane %v1841_v24, 4  ;;  %v374_v53 = vld [vmem:[#allocation2 + $0x38] sm:$0x1]  ;;  %v5035_v54 = vld [vmem:[#allocation7 + $0x1a0] sm:$0xff]  }
  0xb6   : > { %4587 = vmatpush3.bf16.msra.mxu1 %v5026_v2  ;;  %v1483_v2 = vld [vmem:[#allocation2 + $0x28] sm:$0xe]  ;;  %v1332_v7 = vor.u32 %v1331_v58, %v1328_v57  ;;  %v1319_v27 = vrot.slane %v1318_v6, 4  ;;  %v5040_v56 = vld [vmem:[#allocation7 + $0x1d0] sm:$0xff]   ;;  %v1838_v59 = vrot.slane %v1836_v47, 5  ;;  %v375_v61 = vsel %vm5531_vm4, 0, %v374_v53 }
  0xb7   : > { %4588 = vmatprep.subr.bf16.mxu1 %v5323_v0  ;;  %v4068_v17 = vrot.slane %v1483_v2, 9  ;;  %v1855_v63 = vshrl.u32 %v1818_v31, 16  ;;  %v1869_v2 = vshrl.u32 %v1820_v36, 16  ;;  %376 = vst [vmem:[#allocation2 + $0x38] sm:$0x1] %v375_v61  ;;  %v5037_v6 = vld [vmem:[#allocation7 + $0x198] sm:$0xff]  }
  0xb8   : > { %4557 = vmatpush3.bf16.msra.mxu0 %v5023_v11  ;;  %v1484_v11 = vld [vmem:[#allocation2 + $0x30] sm:$0xe]  ;;  %v1324_v48 = vsel %vm5610_vm10, %v1319_v27, %v1323_v23  ;;  %v5039_v24 = vld [vmem:[#allocation7 + $0x190] sm:$0xff]  }
  0xb9   : > { %4558 = vmatprep.subr.bf16.mxu0 %v5323_v0  ;;  %v4069_v13 = vrot.slane %v1484_v11, 9  ;;  %v1516_v30 = vsel %vm5676_vm13, %v4068_v17, %v1515_v34  ;;  %v5828_v34 = vld [vmem:[#allocation2 + $0x24] sm:$0x1]  ;;  %v1857_v18 = vrot.slane %v1855_v63, 4  ;;  %v1871_v20 = vrot.slane %v1869_v2, 4 }
  0xba   : > { %4589 = vmatpush3.bf16.msra.mxu1 %v5028_v19  ;;  %v1827_v19 = vshrl.u32 %v1814_v12, 16  ;;  %v401_v12 = vsel %vm5536_vm5, 0, %v400_v4 }
  0xbb   : > { %4630 = vmatprep.subr.bf16.mxu1 %v5323_v0  ;;  %402 = vst [vmem:[#allocation2 + $0x3c] sm:$0x1] %v401_v12 }
  0xbc   : > { %4559 = vmatpush3.bf16.msra.mxu0 %v5025_v28  ;;  %v1254_v26 = vld [vmem:[#allocation2 + $0x34] sm:$0x1]  ;;  %v1333_v28 = vrot.slane %v1332_v7, 4  ;;  %v1829_v37 = vrot.slane %v1827_v19, 4  ;;  %v1852_v7 = vrot.slane %v1850_v50, 5 }
  0xbd   : > { %4560 = vmatprep.subr.bf16.mxu0 %v5323_v0  ;;  %4591 = vmatmul.mubr.bf16.vlgmr.msra.gmra.mxu1 %v4070_v43  ;;  %v1335_v29 = vshll.u32 %v1254_v26, 16  ;;  %v1519_v32 = vrot.slane %v1254_v26, 5  ;;  %v1846_v43 = vrot.slane %v1844_v25, 5  ;;  %v1864_v26 = vshll.u32 %v5828_v34, 16 }
  0xbe   : > { %4631 = vmatpush3.bf16.msra.mxu1 %v5030_v16  ;;  %4594 = vmatprep.mubr.msk.bf16.mxu1 %vm5324_vm0, %v5323_v0  ;;  %v1833_v57 = vor.u32 %v1832_v38, %v1829_v37  ;;  %v527_v38 = vld [vmem:[#allocation2 + $0x38] sm:$0xf] }
  0xbf   : > { %4632 = vmatprep.subr.bf16.mxu1 %v5323_v0  ;;  %v1337_v40 = vrot.slane %v1335_v29, 5  ;;  %v1520_v16 = vsel %vm5676_vm13, %v4069_v13, %v1519_v32  ;;  %v1847_v58 = vor.u32 %v1846_v43, %v1843_v42  ;;  %v5044_v29 = vld [vmem:[#allocation7 + $0x1c0] sm:$0xff]   ;;  %v5041_v42 = vld [vmem:[#allocation7 + $0x188] sm:$0xff]  }
  0xc0   : > { %4561 = vmatpush3.bf16.msra.mxu0 %v5027_v45  ;;  %v4072_v45 = vcombine.low %v1516_v30, %v1520_v16 }
  0xc1   : > { %4602 = vmatprep.subr.bf16.mxu0 %v5323_v0  ;;  %v1338_v55 = vsel %vm5610_vm10, %v1333_v28, %v1337_v40  ;;  %v1848_v17 = vrot.slane %v1847_v58, 4  ;;  %v1822_v28 = vld [vmem:[#allocation2 + $0x30] sm:$0xf] }
  0xc2   : > { %4633 = vmatpush3.bf16.msra.mxu1 %v5032_v52  ;;  %v309_v52 = vld [vmem:[%s5508_s17 + $0x78] sm:$0xff]  ;;  %v530_v16 = vld [vmem:[#allocation2 + $0x3c] sm:$0x1]  ;;  %v1883_v43 = vshrl.u32 %v1822_v28, 16  ;;  %v5045_v58 = vld [vmem:[#allocation2 + $0x10] ss:$8 sps:$4 sm:$0xff]  }
  0xc3   : > { %4563 = vmatmul.mubr.bf16.vlgmr.msra.gmra.mxu0 %v4053_v1  ;;  %4634 = vmatprep.subr.bf16.mxu1 %v5323_v0  ;;  %v317_v60 = vmax.bf16 %v309_v52, %v308_v51  ;;  %v1858_v1 = vshll.u32 %v1818_v31, 16  ;;  %v1853_v30 = vsel %vm5610_vm10, %v1848_v17, %v1852_v7  ;;  %v5043_v52 = vld [vmem:[#allocation7 + $0x180] sm:$0xff]  }
  0xc4   : > { %4603 = vmatpush3.bf16.msra.mxu0 %v5029_v3  ;;  %4566 = vmatprep.mubr.msk.bf16.mxu0 %vm5324_vm0, %v5323_v0  ;;  %v1872_v3 = vshll.u32 %v1820_v36, 16  ;;  %v1885_v53 = vrot.slane %v1883_v43, 4 }
  0xc5   : > { %4604 = vmatprep.subr.bf16.mxu0 %v5323_v0  ;;  %4595 = vmatmul.mubr.bf16.gmra.mxu1 %v4071_v5  ;;  %v4055_v5 = vcombine.low %v1324_v48, %v1338_v55  ;;  %v333_v11 = vrot.slane %v317_v60, 4  ;;  %v1860_v19 = vrot.slane %v1858_v1, 5  ;;  %v1866_v48 = vrot.slane %v1864_v26, 5  ;;  %v5850_v55 = vld [vmem:[#allocation2 + $0x34] sm:$0x1]  ;;  %v5053_v26 = vld [vmem:[#allocation7 + $0x210] sm:$0xff]  }
  0xc6   : > { %4635 = vmatpush3.bf16.msra.mxu1 %v5034_v15  ;;  %4598 = vmatprep.mubr.msk.bf16.mxu1 %vm5324_vm0, %v5323_v0  ;;  %v1834_v15 = vrot.slane %v1833_v57, 4  ;;  %v1892_v61 = vshll.u32 %v5850_v55, 16 }
  0xc7   : > { %4636 = vmatprep.subr.bf16.mxu1 %v5323_v0  ;;  %v349_v35 = vmax.bf16 %v333_v11, %v317_v60  ;;  %v1861_v32 = vor.u32 %v1860_v19, %v1857_v18  ;;  %v5049_v18 = vld [vmem:[#allocation7 + $0x228] sm:$0xff]  }
  0xc8   : > { %4605 = vmatpush3.bf16.msra.mxu0 %v5031_v21  ;;  %v1874_v21 = vrot.slane %v1872_v3, 5  ;;  %v1839_v25 = vsel %vm5610_vm10, %v1834_v15, %v1838_v59  ;;  %v5046_v59 = vld [vmem:[#allocation7 + $0x238] sm:$0xff]   ;;  %v1894_v11 = vrot.slane %v1892_v61, 5 }
  0xc9   : > { %4606 = vmatprep.subr.bf16.mxu0 %v5323_v0  ;;  %v460_v23 = vshrl.u32 %v349_v35, 16  ;;  %v463_v13 = vshll.u32 %v349_v35, 16  ;;  %v1862_v36 = vrot.slane %v1861_v32, 4  ;;  %v5048_v35 = vld [vmem:[#allocation2 + $0x20] ss:$8 sps:$4 sm:$0xff]   ;;  %v2070_v32 = vrot.slane %v5801_v33, 5 }
  0xca   : > { %4637 = vmatpush3.bf16.msra.mxu1 %v5036_v22  ;;  %v5832_v22 = vld [vmem:[#allocation2 + $0x2c] sm:$0x1] }
  0xcb   : > { %4567 = vmatmul.mubr.bf16.gmra.mxu0 %v4054_v8  ;;  %4638 = vmatprep.subr.bf16.mxu1 %v5323_v0  ;;  %v462_v27 = vrot.slane %v460_v23, 7  ;;  %v1875_v8 = vor.u32 %v1874_v21, %v1871_v20  ;;  %v1878_v37 = vshll.u32 %v5832_v22, 16 }
  0xcc   : > { %4607 = vmatpush3.bf16.msra.mxu0 %v5033_v39  ;;  %4570 = vmatprep.mubr.msk.bf16.mxu0 %vm5324_vm0, %v5323_v0 }
  0xcd   : > { %4608 = vmatprep.subr.bf16.mxu0 %v5323_v0  ;;  %4599 = vmatmul.mubr.bf16.gmra.mxu1 %v4072_v45  ;;  %v465_v39 = vor.u32 %v463_v13, %v462_v27  ;;  %v466_v40 = vrot.slane %v462_v27, 4  ;;  %v1886_v45 = vshll.u32 %v1822_v28, 16  ;;  %v1876_v50 = vrot.slane %v1875_v8, 4  ;;  %v5050_v13 = vld [vmem:[#allocation7 + $0x220] sm:$0xff]   ;;  %v2051_v28 = vld [vmem:[#allocation2 + $0x18] sm:$0xe] }
  0xce   : > { %4639 = vmatpush3.bf16.msra.mxu1 %v5038_v46  ;;  %4646 = vmatprep.mubr.msk.bf16.mxu1 %vm5324_vm0, %v5323_v0  ;;  %v4092_v46 = vcombine.low %v1839_v25, %v1853_v30  ;;  %v1880_v51 = vrot.slane %v1878_v37, 5  ;;  %v5052_v25 = vld [vmem:[#allocation7 + $0x218] sm:$0xff]   ;;  %v2050_v27 = vld [vmem:[#allocation2 + $0x10] sm:$0xe]  ;;  %v4104_v8 = vrot.slane %v2051_v28, 9  ;;  %v2074_v37 = vrot.slane %v5806_v41, 5 }
  0xcf   : > { %4640 = vmatprep.subr.bf16.mxu1 %v5323_v0  ;;  %v528_v47 = vsel %vm5564_vm7, %v465_v39, %v527_v38  ;;  %v531_v31 = vsel %vm5531_vm4, %v466_v40, %v530_v16  ;;  %v4103_v30 = vrot.slane %v2050_v27, 9  ;;  %v5055_v38 = vld [vmem:[#allocation7 + $0x200] sm:$0xff]   ;;  %v2052_v16 = vld [vmem:[#allocation2 + $0x20] sm:$0xe] }
  0xd0   : > { %4609 = vmatpush3.bf16.msra.mxu0 %v5035_v54  ;;  %529 = vst [vmem:[#allocation2 + $0x38] sm:$0xf] %v528_v47  ;;  %532 = vst [vmem:[#allocation2 + $0x3c] sm:$0x1] %v531_v31  ;;  %v1888_v54 = vrot.slane %v1886_v45, 5  ;;  %v1881_v57 = vsel %vm5610_vm10, %v1876_v50, %v1880_v51  ;;  %v2075_v40 = vsel %vm5676_vm13, %v4104_v8, %v2074_v37  ;;  %v4105_v33 = vrot.slane %v2052_v16, 9 }
  0xd1   : > { %4610 = vmatprep.subr.bf16.mxu0 %v5323_v0  ;;  %v2071_v39 = vsel %vm5676_vm13, %v4103_v30, %v2070_v32  ;;  %v2078_v45 = vrot.slane %v5828_v34, 5  ;;  %v2257_v27 = vld [vmem:[#allocation3 + $0x10] sm:$0x1]  ;;  %v2275_v28 = vld [vmem:[#allocation3 + $0x14] sm:$0x1] }
  0xd2   : > { %4641 = vmatpush3.bf16.msra.mxu1 %v5040_v56  ;;  %v1867_v56 = vsel %vm5610_vm10, %v1862_v36, %v1866_v48  ;;  %v1889_v60 = vor.u32 %v1888_v54, %v1885_v53  ;;  %v4109_v43 = vcombine.low %v2071_v39, %v2075_v40  ;;  %v2054_v36 = vld [vmem:[#allocation2 + $0x30] sm:$0xe]  ;;  %v2258_v30 = vsel %vm5531_vm4, 0, %v2257_v27  ;;  %v2260_v37 = vld [vmem:[#allocation3 + $0x18] sm:$0x1] }
  0xd3   : > { %4571 = vmatmul.mubr.bf16.gmra.mxu0 %v4055_v5  ;;  %4642 = vmatprep.subr.bf16.mxu1 %v5323_v0  ;;  %v4093_v63 = vcombine.low %v1867_v56, %v1881_v57  ;;  %v2079_v47 = vsel %vm5676_vm13, %v4105_v33, %v2078_v45  ;;  %v4107_v51 = vrot.slane %v2054_v36, 9  ;;  %v2276_v32 = vsel %vm5536_vm5, 0, %v2275_v28  ;;  %2259 = vst [vmem:[#allocation3 + $0x10] sm:$0x1] %v2258_v30  ;;  %v2263_v45 = vld [vmem:[#allocation3 + $0x20] sm:$0x1] }
  0xd4   : > { %4611 = vmatpush3.bf16.msra.mxu0 %v5037_v6  ;;  %4618 = vmatprep.mubr.msk.bf16.mxu0 %vm5324_vm0, %v5323_v0  ;;  %v5047_v6 = vld [vmem:[#allocation7 + $0x230] sm:$0xff]   ;;  %v1890_v7 = vrot.slane %v1889_v60, 4  ;;  %2277 = vst [vmem:[#allocation3 + $0x14] sm:$0x1] %v2276_v32  ;;  %v2261_v39 = vsel %vm5531_vm4, 0, %v2260_v37 }
  0xd5   : > { %4612 = vmatprep.subr.bf16.mxu0 %v5323_v0  ;;  %2262 = vst [vmem:[#allocation3 + $0x18] sm:$0x1] %v2261_v39 }
  0xd6   : > { %4643 = vmatpush3.bf16.msra.mxu1 %v5042_v14  ;;  %v1895_v19 = vsel %vm5610_vm10, %v1890_v7, %v1894_v11  ;;  %v2269_v7 = vld [vmem:[#allocation3 + $0x4] sm:$0x1] }
  0xd7   : > { %4644 = vmatprep.subr.bf16.mxu1 %v5323_v0  ;;  %v1824_v1 = vld [vmem:[#allocation2 + $0x38] sm:$0xf]  ;;  %v5860_v2 = vld [vmem:[#allocation2 + $0x3c] sm:$0x1] }
  0xd8   : > { %4613 = vmatpush3.bf16.msra.mxu0 %v5039_v24  ;;  %v1897_v3 = vshrl.u32 %v1824_v1, 16  ;;  %v1900_v4 = vshll.u32 %v1824_v1, 16  ;;  %v1906_v5 = vshll.u32 %v5860_v2, 16  ;;  %v5051_v24 = vld [vmem:[#allocation2 + $0x30] ss:$8 sps:$4 sm:$0xff]   ;;  %v2090_v53 = vrot.slane %v5860_v2, 5 }
  0xd9   : > { %4614 = vmatprep.subr.bf16.mxu0 %v5323_v0  ;;  %v2055_v48 = vld [vmem:[#allocation2 + $0x38] sm:$0xe] }
  0xda   : > { %4645 = vmatpush3.bf16.msra.mxu1 %v5044_v29  ;;  %v1899_v12 = vrot.slane %v1897_v3, 4  ;;  %v1902_v14 = vrot.slane %v1900_v4, 5  ;;  %v1908_v17 = vrot.slane %v1906_v5, 5  ;;  %v5054_v29 = vld [vmem:[#allocation7 + $0x208] sm:$0xff]   ;;  %v4108_v34 = vrot.slane %v2055_v48, 9 }
  0xdc   : > { %4615 = vmatpush3.bf16.msra.mxu0 %v5041_v42  ;;  %v1903_v15 = vor.u32 %v1902_v14, %v1899_v12  ;;  %v2053_v42 = vld [vmem:[#allocation2 + $0x28] sm:$0xe]  ;;  %v2091_v54 = vsel %vm5676_vm13, %v4108_v34, %v2090_v53  ;;  %v2270_v12 = vsel %vm5536_vm5, 0, %v2269_v7  ;;  %v2284_v34 = vld [vmem:[#allocation3 + $0x2c] sm:$0x1] }
  0xdd   : > { %4616 = vmatprep.subr.bf16.mxu0 %v5323_v0  ;;  %4647 = vmatmul.mubr.bf16.vlgmr.msra.gmra.mxu1 %v4092_v46  ;;  %v4106_v41 = vrot.slane %v2053_v42, 9  ;;  %v2082_v46 = vrot.slane %v5832_v22, 5  ;;  %2271 = vst [vmem:[#allocation3 + $0x4] sm:$0x1] %v2270_v12 }
  0xde   : > { %4650 = vmatprep.mubr.msk.bf16.mxu1 %vm5324_vm0, %v5323_v0  ;;  %v1904_v20 = vrot.slane %v1903_v15, 4 }
  0xdf   : > { %v2083_v31 = vsel %vm5676_vm13, %v4106_v41, %v2082_v46  ;;  %v2281_v41 = vld [vmem:[#allocation3 + $0x24] sm:$0x1]  ;;  %v2264_v46 = vsel %vm5531_vm4, 0, %v2263_v45 }
  0xe0   : > { %4617 = vmatpush3.bf16.msra.mxu0 %v5043_v52  ;;  %v1909_v21 = vsel %vm5610_vm10, %v1904_v20, %v1908_v17  ;;  %v4110_v50 = vcombine.low %v2079_v47, %v2083_v31  ;;  %v2086_v52 = vrot.slane %v5850_v55, 5  ;;  %v2282_v47 = vsel %vm5536_vm5, 0, %v2281_v41  ;;  %2265 = vst [vmem:[#allocation3 + $0x20] sm:$0x1] %v2264_v46 }
  0xe1   : > { %4658 = vmatprep.subr.bf16.mxu0 %v5323_v0  ;;  %v4094_v23 = vcombine.low %v1895_v19, %v1909_v21  ;;  %v2254_v21 = vld [vmem:[#allocation3 + $0x8] sm:$0x1]  ;;  %2283 = vst [vmem:[#allocation3 + $0x24] sm:$0x1] %v2282_v47 }
  0xe2   : > { %v2087_v22 = vsel %vm5676_vm13, %v4107_v51, %v2086_v52  ;;  %v2266_v52 = vld [vmem:[#allocation3 + $0x28] sm:$0x1] }
  0xe3   : > { %4619 = vmatmul.mubr.bf16.vlgmr.msra.gmra.mxu0 %v5045_v58  ;;  %v4111_v56 = vcombine.low %v2087_v22, %v2091_v54  ;;  %v2267_v53 = vsel %vm5531_vm4, 0, %v2266_v52  ;;  %v2285_v22 = vsel %vm5536_vm5, 0, %v2284_v34 }
  0xe4   : > { %4659 = vmatpush3.bf16.msra.mxu0 %v5046_v59  ;;  %4622 = vmatprep.mubr.msk.bf16.mxu0 %vm5324_vm0, %v5323_v0  ;;  %2268 = vst [vmem:[#allocation3 + $0x28] sm:$0x1] %v2267_v53  ;;  %2286 = vst [vmem:[#allocation3 + $0x2c] sm:$0x1] %v2285_v22 }
  0xe5   : > { %4660 = vmatprep.subr.bf16.mxu0 %v5323_v0  ;;  %4651 = vmatmul.mubr.bf16.gmra.mxu1 %v4093_v63 }
  0xe6   : > { %4654 = vmatprep.mubr.msk.bf16.mxu1 %vm5324_vm0, %v5323_v0 }
  0xe8   : > { %4661 = vmatpush3.bf16.msra.mxu0 %v5047_v6  ;;  %v2251_v6 = vld [vmem:[#allocation3] sm:$0x1] }
  0xe9   : > { %4662 = vmatprep.subr.bf16.mxu0 %v5323_v0  ;;  %v2252_v11 = vsel %vm5531_vm4, 0, %v2251_v6 }
  0xea   : > { %2253 = vst [vmem:[#allocation3] sm:$0x1] %v2252_v11 }
  0xeb   : > { %4623 = vmatmul.mubr.bf16.gmra.mxu0 %v5048_v35 }
  0xec   : > { %4663 = vmatpush3.bf16.msra.mxu0 %v5049_v18  ;;  %4626 = vmatprep.mubr.msk.bf16.mxu0 %vm5324_vm0, %v5323_v0 }
  0xed   : > { %4664 = vmatprep.subr.bf16.mxu0 %v5323_v0  ;;  %4655 = vmatmul.mubr.bf16.gmra.mxu1 %v4094_v23  ;;  %v2272_v23 = vld [vmem:[#allocation3 + $0xc] sm:$0x1] }
  0xf0   : > { %4665 = vmatpush3.bf16.msra.mxu0 %v5050_v13 }
  0xf1   : > { %4666 = vmatprep.subr.bf16.mxu0 %v5323_v0 }
  0xf3   : > { %4627 = vmatmul.mubr.bf16.gmra.mxu0 %v5051_v24  ;;  %v2255_v24 = vsel %vm5531_vm4, 0, %v2254_v21 }
  0xf4   : > { %4667 = vmatpush3.bf16.msra.mxu0 %v5052_v25  ;;  %4674 = vmatprep.mubr.msk.bf16.mxu0 %vm5324_vm0, %v5323_v0  ;;  %v2273_v25 = vsel %vm5536_vm5, 0, %v2272_v23  ;;  %2256 = vst [vmem:[#allocation3 + $0x8] sm:$0x1] %v2255_v24 }
  0xf5   : > { %4668 = vmatprep.subr.bf16.mxu0 %v5323_v0  ;;  %2274 = vst [vmem:[#allocation3 + $0xc] sm:$0x1] %v2273_v25 }
  0xf8   : > { %4669 = vmatpush3.bf16.msra.mxu0 %v5053_v26 }
  0xf9   : > { %4670 = vmatprep.subr.bf16.mxu0 %v5323_v0 }
  0xfc   : > { %4671 = vmatpush3.bf16.msra.mxu0 %v5054_v29 }
  0xfd   : > { %4672 = vmatprep.subr.bf16.mxu0 %v5323_v0 }
 0x100   : > { %4673 = vmatpush3.bf16.msra.mxu0 %v5055_v38  ;;  %v2278_v38 = vld [vmem:[#allocation3 + $0x1c] sm:$0x1] }
 0x101   : > { %v2279_v40 = vsel %vm5536_vm5, 0, %v2278_v38 }
 0x102   : > { %2280 = vst [vmem:[#allocation3 + $0x1c] sm:$0x1] %v2279_v40 }
 0x103   : > { %4675 = vmatmul.mubr.bf16.vlgmr.msra.gmra.mxu0 %v4109_v43 }
 0x104   : > { %4678 = vmatprep.mubr.msk.bf16.mxu0 %vm5324_vm0, %v5323_v0 }
 0x10b   : > { %4679 = vmatmul.mubr.bf16.gmra.mxu0 %v4110_v50 }
 0x10c   : > { %4682 = vmatprep.mubr.msk.bf16.mxu0 %vm5324_vm0, %v5323_v0 }
 0x113   : > { %4683 = vmatmul.mubr.bf16.gmra.mxu0 %v4111_v56 }
 0x13b   : > { %v882_v57 = vpop.f32.mrf.mxu1 }
 0x13d   : > { %v4480_v58 = vpop.f32.mrf.mxu1 }
 0x13f   : > { %v885_v59 = vpop.f32.mrf.mxu1 }
 0x141   : > { %v4481_v55 = vpop.f32.mrf.mxu1 }
 0x143   : > { %v759_v60 = vpop.f32.mrf.mxu0  ;;  %v890_v1 = vpop.f32.mrf.mxu1 }
 0x144   : > { %v5904_v61 = vadd.f32 %v882_v57, %v759_v60 }
 0x145   : > { %v4452_v63 = vpop.f32.mrf.mxu0  ;;  %v4484_v3 = vpop.f32.mrf.mxu1 }
 0x147   : > { %v762_v2 = vpop.f32.mrf.mxu0  ;;  %v893_v5 = vpop.f32.mrf.mxu1 }
 0x148   : > { %v5906_v0 = vadd.f32 %v885_v59, %v762_v2 }
 0x149   : > { %v4453_v4 = vpop.f32.mrf.mxu0  ;;  %v4485_v15 = vpop.f32.mrf.mxu1 }
 0x14b   : > { %v767_v14 = vpop.f32.mrf.mxu0 }
 0x14c   : > { %v891_v17 = vadd.f32 %v890_v1, %v767_v14 }
 0x14d   : > { %v4456_v35 = vpop.f32.mrf.mxu0 }
 0x14f   : > { %v770_v18 = vpop.f32.mrf.mxu0  ;;  %v898_v13 = vpop.f32.mrf.mxu1 }
 0x150   : > { %v5912_v19 = vadd.f32 %v893_v5, %v770_v18 }
 0x151   : > { %v4457_v20 = vpop.f32.mrf.mxu0  ;;  %v4488_v26 = vpop.f32.mrf.mxu1 }
 0x153   : > { %v901_v29 = vpop.f32.mrf.mxu1 }
 0x155   : > { %v4489_v8 = vpop.f32.mrf.mxu1 }
 0x15a   : > { %v775_v16 = vpop.f32.mrf.mxu0 }
 0x15b   : > { %v899_v42 = vadd.f32 %v898_v13, %v775_v16 }
 0x15c   : > { %v4460_v43 = vpop.f32.mrf.mxu0  ;;  %v1214_v33 = vpop.f32.mrf.mxu1 }
 0x15e   : > { %v778_v31 = vpop.f32.mrf.mxu0  ;;  %v4536_v36 = vpop.f32.mrf.mxu1 }
 0x15f   : > { %v902_v48 = vadd.f32 %v901_v29, %v778_v31 }
 0x160   : > { %v4461_v50 = vpop.f32.mrf.mxu0  ;;  %v1217_v51 = vpop.f32.mrf.mxu1 }
 0x162   : > { %v4537_v56 = vpop.f32.mrf.mxu1 }
 0x163   : > { %v1061_v54 = vpop.f32.mrf.mxu0 }
 0x164   : > { %v1084_v57 = vadd.f32 %v1061_v54, %v5904_v61 }
 0x165   : > { %v4508_v58 = vpop.f32.mrf.mxu0  ;;  %v1222_v59 = vpop.f32.mrf.mxu1 }
 0x166   : > { %v1237_v60 = vadd.f32 %v1214_v33, %v1084_v57 }
 0x167   : > { %v1064_v55 = vpop.f32.mrf.mxu0  ;;  %v4540_v63 = vpop.f32.mrf.mxu1 }
 0x168   : > { %v1085_v1 = vadd.f32 %v1064_v55, %v5906_v0 }
 0x169   : > { %v4509_v2 = vpop.f32.mrf.mxu0  ;;  %v1225_v3 = vpop.f32.mrf.mxu1 }
 0x16a   : > { %v1238_v4 = vadd.f32 %v1217_v51, %v1085_v1 }
 0x16b   : > { %v1069_v5 = vpop.f32.mrf.mxu0  ;;  %v4541_v6 = vpop.f32.mrf.mxu1 }
 0x16c   : > { %v1086_v10 = vadd.f32 %v1069_v5, %v891_v17 }
 0x16d   : > { %v4512_v7 = vpop.f32.mrf.mxu0  ;;  %v1230_v14 = vpop.f32.mrf.mxu1 }
 0x16e   : > { %v1239_v11 = vadd.f32 %v1222_v59, %v1086_v10 }
 0x16f   : > { %v1072_v12 = vpop.f32.mrf.mxu0  ;;  %v4544_v35 = vpop.f32.mrf.mxu1 }
 0x170   : > { %v1087_v15 = vadd.f32 %v1072_v12, %v5912_v19 }
 0x171   : > { %v4513_v61 = vpop.f32.mrf.mxu0  ;;  %v1233_v21 = vpop.f32.mrf.mxu1 }
 0x172   : > { %v1240_v18 = vadd.f32 %v1225_v3, %v1087_v15 }
 0x173   : > { %v1077_v20 = vpop.f32.mrf.mxu0  ;;  %v4545_v0 = vpop.f32.mrf.mxu1 }
 0x174   : > { %v1088_v23 = vadd.f32 %v1077_v20, %v899_v42 }
 0x175   : > { %v4516_v13 = vpop.f32.mrf.mxu0 }
 0x176   : > { %v1241_v24 = vadd.f32 %v1230_v14, %v1088_v23 }
 0x177   : > { %v1080_v25 = vpop.f32.mrf.mxu0 }
 0x178   : > { %v1089_v26 = vadd.f32 %v1080_v25, %v902_v48 }
 0x179   : > { %v4517_v27 = vpop.f32.mrf.mxu0 }
 0x17a   : > { %v1242_v28 = vadd.f32 %v1233_v21, %v1089_v26 }
 0x17d   : > { %v1632_v17 = vpop.f32.mrf.mxu1 }
 0x17f   : > { %v4592_v29 = vpop.f32.mrf.mxu1 }
 0x181   : > { %v1635_v30 = vpop.f32.mrf.mxu1 }
 0x183   : > { %v1450_v32 = vpop.f32.mrf.mxu0  ;;  %v4593_v8 = vpop.f32.mrf.mxu1 }
 0x184   : > { %v1473_v37 = vadd.f32 %v1450_v32, %v1237_v60  ;;  %v5942_v8 = vld [vmem:[%s6136_s2] ss:$0 sm:$0xff] }
 0x185   : > { %v4564_v19 = vpop.f32.mrf.mxu0  ;;  %v1640_v38 = vpop.f32.mrf.mxu1 }
 0x186   : > { %v1655_v39 = vadd.f32 %v1632_v17, %v1473_v37 }
 0x187   : > { %v1453_v40 = vpop.f32.mrf.mxu0  ;;  %v4596_v16 = vpop.f32.mrf.mxu1 }
 0x188   : > { %v1474_v43 = vadd.f32 %v1453_v40, %v1238_v4 }
 0x189   : > { %v4565_v42 = vpop.f32.mrf.mxu0  ;;  %v1643_v33 = vpop.f32.mrf.mxu1 }
 0x18a   : > { %v1656_v45 = vadd.f32 %v1635_v30, %v1474_v43 }
 0x18b   : > { %v1458_v41 = vpop.f32.mrf.mxu0  ;;  %v4597_v46 = vpop.f32.mrf.mxu1 }
 0x18c   : > { %v1475_v47 = vadd.f32 %v1458_v41, %v1239_v11 }
 0x18d   : > { %v4568_v31 = vpop.f32.mrf.mxu0  ;;  %v1648_v36 = vpop.f32.mrf.mxu1 }
 0x18e   : > { %v1657_v48 = vadd.f32 %v1640_v38, %v1475_v47 }
 0x18f   : > { %v1461_v50 = vpop.f32.mrf.mxu0  ;;  %v4600_v51 = vpop.f32.mrf.mxu1 }
 0x190   : > { %v1476_v52 = vadd.f32 %v1461_v50, %v1240_v18 }
 0x191   : > { %v4569_v34 = vpop.f32.mrf.mxu0  ;;  %v1651_v53 = vpop.f32.mrf.mxu1 }
 0x192   : > { %v1658_v22 = vadd.f32 %v1643_v33, %v1476_v52 }
 0x193   : > { %v1466_v54 = vpop.f32.mrf.mxu0  ;;  %v4601_v56 = vpop.f32.mrf.mxu1 }
 0x194   : > { %v1477_v57 = vadd.f32 %v1466_v54, %v1241_v24 }
 0x195   : > { %v4572_v58 = vpop.f32.mrf.mxu0 }
 0x196   : > { %v1659_v59 = vadd.f32 %v1648_v36, %v1477_v57  ;;  %v2371_v58 = vld [vmem:[#allocation3] sm:$0xf] }
 0x197   : > { %v1469_v60 = vpop.f32.mrf.mxu0 }
 0x198   : > { %v1478_v55 = vadd.f32 %v1469_v60, %v1242_v28  ;;  %v2374_v60 = vld [vmem:[#allocation3 + $0x4] sm:$0x1] }
 0x199   : > { %v4573_v63 = vpop.f32.mrf.mxu0 }
 0x19a   : > { %v1660_v1 = vadd.f32 %v1651_v53, %v1478_v55 }
 0x19d   : > { %v2021_v2 = vpop.f32.mrf.mxu1 }
 0x19f   : > { %v4648_v3 = vpop.f32.mrf.mxu1 }
 0x1a1   : > { %v2024_v4 = vpop.f32.mrf.mxu1 }
 0x1a3   : > { %v1785_v5 = vpop.f32.mrf.mxu0  ;;  %v4649_v6 = vpop.f32.mrf.mxu1 }
 0x1a4   : > { %v1808_v17 = vadd.f32 %v1785_v5, %v1655_v39 }
 0x1a5   : > { %v4620_v10 = vpop.f32.mrf.mxu0  ;;  %v2029_v7 = vpop.f32.mrf.mxu1 }
 0x1a6   : > { %v2044_v29 = vadd.f32 %v2021_v2, %v1808_v17 }
 0x1a7   : > { %v1788_v11 = vpop.f32.mrf.mxu0  ;;  %v4652_v12 = vpop.f32.mrf.mxu1 }
 0x1a8   : > { %v1809_v30 = vadd.f32 %v1788_v11, %v1656_v45 }
 0x1a9   : > { %v4621_v14 = vpop.f32.mrf.mxu0  ;;  %v2032_v15 = vpop.f32.mrf.mxu1 }
 0x1aa   : > { %v2045_v38 = vadd.f32 %v2024_v4, %v1809_v30  ;;  %v2377_v14 = vld [vmem:[#allocation3 + $0x8] sm:$0xf] }
 0x1ab   : > { %v1793_v61 = vpop.f32.mrf.mxu0  ;;  %v4653_v35 = vpop.f32.mrf.mxu1 }
 0x1ac   : > { %v1810_v40 = vadd.f32 %v1793_v61, %v1657_v48 }
 0x1ad   : > { %v4624_v18 = vpop.f32.mrf.mxu0  ;;  %v2037_v20 = vpop.f32.mrf.mxu1 }
 0x1ae   : > { %v2046_v46 = vadd.f32 %v2029_v7, %v1810_v40 }
 0x1af   : > { %v1796_v21 = vpop.f32.mrf.mxu0  ;;  %v4656_v23 = vpop.f32.mrf.mxu1 }
 0x1b0   : > { %v1811_v47 = vadd.f32 %v1796_v21, %v1658_v22 }
 0x1b1   : > { %v4625_v13 = vpop.f32.mrf.mxu0  ;;  %v5937_v0 = vpop.f32.mrf.mxu1 }
 0x1b2   : > { %v2047_v57 = vadd.f32 %v2032_v15, %v1811_v47  ;;  %v2380_v15 = vld [vmem:[#allocation3 + $0xc] sm:$0x1] }
 0x1b3   : > { %v1801_v24 = vpop.f32.mrf.mxu0  ;;  %v4657_v25 = vpop.f32.mrf.mxu1 }
 0x1b4   : > { %v1812_v52 = vadd.f32 %v1801_v24, %v1659_v59 }
 0x1b5   : > { %v4628_v26 = vpop.f32.mrf.mxu0 }
 0x1b6   : > { %v2048_v4 = vadd.f32 %v2037_v20, %v1812_v52 }
 0x1b7   : > { %v1804_v27 = vpop.f32.mrf.mxu0 }
 0x1b8   : > { %v1813_v22 = vadd.f32 %v1804_v27, %v1660_v1 }
 0x1b9   : > { %v4629_v28 = vpop.f32.mrf.mxu0 }
 0x1ba   : > { %v2049_v25 = vadd.f32 %v5937_v0, %v1813_v22 }
 0x1c3   : > { %v2203_v32 = vpop.f32.mrf.mxu0 }
 0x1c4   : > { %v2226_v37 = vadd.f32 %v2203_v32, %v2044_v29 }
 0x1c5   : > { %v4676_v19 = vpop.f32.mrf.mxu0 }
 0x1c6   : > { %v2239_v16 = vadd.f32 %v5942_v8, %v2226_v37  ;;  %v2383_v37 = vld [vmem:[#allocation3 + $0x10] sm:$0xf]  ;;  %v2386_v19 = vld [vmem:[#allocation3 + $0x14] sm:$0x1] }
 0x1c7   : > { %v2206_v43 = vpop.f32.mrf.mxu0 }
 0x1c8   : > { %v2245_v42 = vmax.f32 %v2239_v16, 0.0  ;;  %v2227_v33 = vadd.f32 %v2206_v43, %v2045_v38 }
 0x1c9   : > { %v4677_v41 = vpop.f32.mrf.mxu0 }
 0x1ca   : > { %v4239_v39 = vpack.c.bf16 %v2245_v42, %v2245_v42  ;;  %v2240_v45 = vadd.f32 %v5942_v8, %v2227_v33 }
 0x1cb   : > { %v2211_v31 = vpop.f32.mrf.mxu0 }
 0x1cc   : > { %v2312_v36 = vshrl.u32 %v4239_v39, 16  ;;  %v2246_v50 = vmax.f32 %v2240_v45, 0.0  ;;  %v2228_v51 = vadd.f32 %v2211_v31, %v2046_v46  ;;  %v2315_v54 = vshll.u32 %v4239_v39, 16  ;;  %v2389_v31 = vld [vmem:[#allocation3 + $0x18] sm:$0xf] }
 0x1cd   : > { %v4680_v34 = vpop.f32.mrf.mxu0 }
 0x1ce   : > { %v2314_v53 = vrot.slane %v2312_v36, 7  ;;  %v4240_v48 = vpack.c.bf16 %v2246_v50, %v2246_v50  ;;  %v2241_v56 = vadd.f32 %v5942_v8, %v2228_v51  ;;  %v2392_v36 = vld [vmem:[#allocation3 + $0x1c] sm:$0x1] }
 0x1cf   : > { %v2214_v55 = vpop.f32.mrf.mxu0 }
 0x1d0   : > { %v2317_v63 = vor.u32 %v2315_v54, %v2314_v53  ;;  %v2318_v2 = vrot.slane %v2314_v53, 4  ;;  %v2320_v3 = vshrl.u32 %v4240_v48, 16  ;;  %v2247_v5 = vmax.f32 %v2241_v56, 0.0 }
 0x1d1   : > { %v2229_v6 = vadd.f32 %v2214_v55, %v2047_v57  ;;  %v4681_v10 = vpop.f32.mrf.mxu0  ;;  %v2323_v12 = vshll.u32 %v4240_v48, 16  ;;  %v2395_v57 = vld [vmem:[#allocation3 + $0x20] sm:$0xf] }
 0x1d2   : > { %v2372_v59 = vsel %vm5564_vm7, %v2317_v63, %v2371_v58  ;;  %v2375_v7 = vsel %vm5531_vm4, %v2318_v2, %v2374_v60  ;;  %v2322_v11 = vrot.slane %v2320_v3, 7  ;;  %v4241_v61 = vpack.c.bf16 %v2247_v5, %v2247_v5  ;;  %v2398_v58 = vld [vmem:[#allocation3 + $0x24] sm:$0x1]  ;;  %v2401_v5 = vld [vmem:[#allocation3 + $0x28] sm:$0xf] }
 0x1d3   : > { %2373 = vst [vmem:[#allocation3] sm:$0xf] %v2372_v59  ;;  %2376 = vst [vmem:[#allocation3 + $0x4] sm:$0x1] %v2375_v7  ;;  %v2242_v35 = vadd.f32 %v5942_v8, %v2229_v6  ;;  %v2219_v18 = vpop.f32.mrf.mxu0  ;;  %v2404_v6 = vld [vmem:[#allocation3 + $0x2c] sm:$0x1] }
 0x1d4   : > { %v2325_v1 = vor.u32 %v2323_v12, %v2322_v11  ;;  %v2326_v20 = vrot.slane %v2322_v11, 4  ;;  %v2230_v21 = vadd.f32 %v2219_v18, %v2048_v4  ;;  %v2328_v23 = vshrl.u32 %v4241_v61, 16 }
 0x1d5   : > { %v2248_v13 = vmax.f32 %v2242_v35, 0.0  ;;  %v4684_v24 = vpop.f32.mrf.mxu0  ;;  %v2331_v29 = vshll.u32 %v4241_v61, 16 }
 0x1d6   : > { %v2378_v26 = vsel %vm5564_vm7, %v2325_v1, %v2377_v14  ;;  %v2381_v27 = vsel %vm5531_vm4, %v2326_v20, %v2380_v15  ;;  %v2243_v28 = vadd.f32 %v5942_v8, %v2230_v21  ;;  %v2330_v17 = vrot.slane %v2328_v23, 7 }
 0x1d7   : > { %2379 = vst [vmem:[#allocation3 + $0x8] sm:$0xf] %v2378_v26  ;;  %2382 = vst [vmem:[#allocation3 + $0xc] sm:$0x1] %v2381_v27  ;;  %v4242_v30 = vpack.c.bf16 %v2248_v13, %v2248_v13  ;;  %v2222_v32 = vpop.f32.mrf.mxu0 }
 0x1d8   : > { %v2249_v38 = vmax.f32 %v2243_v28, 0.0  ;;  %v2231_v40 = vadd.f32 %v2222_v32, %v2049_v25  ;;  %v2333_v16 = vor.u32 %v2331_v29, %v2330_v17  ;;  %v2334_v0 = vrot.slane %v2330_v17, 4 }
 0x1d9   : > { %v2336_v43 = vshrl.u32 %v4242_v30, 16  ;;  %v4685_v42 = vpop.f32.mrf.mxu0  ;;  %v2339_v47 = vshll.u32 %v4242_v30, 16 }
 0x1da   : > { %v4243_v33 = vpack.c.bf16 %v2249_v38, %v2249_v38  ;;  %v2244_v41 = vadd.f32 %v5942_v8, %v2231_v40  ;;  %v2384_v46 = vsel %vm5564_vm7, %v2333_v16, %v2383_v37  ;;  %v2387_v39 = vsel %vm5531_vm4, %v2334_v0, %v2386_v19 }
 0x1db   : > { %v2338_v45 = vrot.slane %v2336_v43, 7  ;;  %2385 = vst [vmem:[#allocation3 + $0x10] sm:$0xf] %v2384_v46  ;;  %2388 = vst [vmem:[#allocation3 + $0x14] sm:$0x1] %v2387_v39 }
 0x1dc   : > { %v2344_v50 = vshrl.u32 %v4243_v33, 16  ;;  %v2250_v51 = vmax.f32 %v2244_v41, 0.0  ;;  %v2347_v54 = vshll.u32 %v4243_v33, 16 }
 0x1dd   : > { %v2341_v52 = vor.u32 %v2339_v47, %v2338_v45  ;;  %v2342_v34 = vrot.slane %v2338_v45, 4 }
 0x1de   : > { %v2346_v53 = vrot.slane %v2344_v50, 7  ;;  %v4244_v48 = vpack.c.bf16 %v2250_v51, %v2250_v51 }
 0x1df   : > { %v2390_v8 = vsel %vm5564_vm7, %v2341_v52, %v2389_v31  ;;  %v2393_v56 = vsel %vm5531_vm4, %v2342_v34, %v2392_v36 }
 0x1e0   : > { %2391 = vst [vmem:[#allocation3 + $0x18] sm:$0xf] %v2390_v8  ;;  %2394 = vst [vmem:[#allocation3 + $0x1c] sm:$0x1] %v2393_v56  ;;  %v2349_v60 = vor.u32 %v2347_v54, %v2346_v53  ;;  %v2350_v55 = vrot.slane %v2346_v53, 4  ;;  %v2352_v63 = vshrl.u32 %v4244_v48, 16 }
 0x1e1   : > { %v2355_v22 = vshll.u32 %v4244_v48, 16 }
 0x1e2   : > { %v2396_v2 = vsel %vm5564_vm7, %v2349_v60, %v2395_v57  ;;  %v2399_v3 = vsel %vm5531_vm4, %v2350_v55, %v2398_v58  ;;  %v2354_v4 = vrot.slane %v2352_v63, 7 }
 0x1e3   : > { %2397 = vst [vmem:[#allocation3 + $0x20] sm:$0xf] %v2396_v2  ;;  %2400 = vst [vmem:[#allocation3 + $0x24] sm:$0x1] %v2399_v3  ;;  %2410 = sbr.rel (%p4127_p8) target bundleno = 490 (0x1ea), region = 56 }
 0x1e4   : > { %v2357_v10 = vor.u32 %v2355_v22, %v2354_v4  ;;  %v2358_v59 = vrot.slane %v2354_v4, 4 }
 0x1e6   : > { %v2402_v7 = vsel %vm5564_vm7, %v2357_v10, %v2401_v5  ;;  %v2405_v11 = vsel %vm5531_vm4, %v2358_v59, %v2404_v6 }
 0x1e7   : > { %2403 = vst [vmem:[#allocation3 + $0x28] sm:$0xf] %v2402_v7  ;;  %2406 = vst [vmem:[#allocation3 + $0x2c] sm:$0x1] %v2405_v11 }
 0x1e8   : > { %v5325_v12 = vmov 0  }
 0x1e9   : > { %2411 = vst [vmem:[#allocation3] sm:$0xf] %v5325_v12  ;;  %2412 = vst [vmem:[#allocation3 + $0x4] sm:$0x1] %v5325_v12 }
 0x1ea PF: > { %p4128_p9 = scmp.ne.s32.totalorder %s5298_s21, 1 }
 0x1ec   : > { %2416 = sbr.rel (%p4128_p9) target bundleno = 499 (0x1f3), region = 60 }
 0x1f1   : > { %v5326_v49 = vmov 0  }
 0x1f2   : > { %2418 = vst [vmem:[#allocation3 + $0x28] sm:$0xf] %v5326_v49  ;;  %2419 = vst [vmem:[#allocation3 + $0x2c] sm:$0x1] %v5326_v49 }
 0x1f3 PF: > { %v5056_v9 = vld [vmem:[#allocation9 + $0x78] sm:$0xff]   ;;  %v5058_v15 = vld [vmem:[#allocation9 + $0x70] sm:$0xff]   ;;  %v5060_v35 = vld [vmem:[#allocation9 + $0x68] sm:$0xff]   ;;  %s6180_s27 = sld [smem:[#allocation20_spill]]  ;;  %s4233_s8 = sshll.u32 %s5298_s21, 2 }
 0x1f4   : > { %v5057_v14 = vld [vmem:[#allocation9 + $0x38] sm:$0xff]   ;;  %4686 = vmatprep.subr.bf16.mxu1 %v5056_v9  ;;  %v5059_v61 = vld [vmem:[#allocation9 + $0x30] sm:$0xff]   ;;  %v5061_v18 = vld [vmem:[#allocation9 + $0x28] sm:$0xff]   ;;  %s4234_s29 = sshll.u32 %s5302_s22, 3  ;;  %s3878_s15 = sshll.u32 %s5977_s7, 4  ;;  %s6079_s15 = int_to_ptr.vmem [resolvable:$true] %s3878_s15 }
 0x1f5   : > { %4706 = vmatprep.subr.bf16.mxu0 %v5057_v14  ;;  %4687 = vmatpush3.bf16.msra.mxu1 %v5056_v9  ;;  %v5062_v1 = vld [vmem:[#allocation9 + $0x60] sm:$0xff]   ;;  %v5064_v21 = vld [vmem:[#allocation9 + $0x58] sm:$0xff]   ;;  %v5066_v13 = vld [vmem:[#allocation9 + $0x50] sm:$0xff]   ;;  %s3875_s13 = sadd.s32 %s4234_s29, %s4233_s8  ;;  %s6182_s10 = sld [smem:[#allocation21_spill]] }
 0x1f6   : > { %4707 = vmatpush3.bf16.msra.mxu0 %v5057_v14  ;;  %4688 = vmatprep.subr.bf16.mxu1 %v5058_v15  ;;  %v5063_v20 = vld [vmem:[#allocation9 + $0x20] sm:$0xff]   ;;  %v5065_v23 = vld [vmem:[#allocation9 + $0x18] sm:$0xff]   ;;  %v5067_v24 = vld [vmem:[#allocation9 + $0x10] sm:$0xff]   ;;  %s4235_s22 = sshll.u32 %s3875_s13, 7  ;;  %s3863_s18 = scalar_lea.sflag [#allocation6], %s5504_s6 }
 0x1f7   : > { %4708 = vmatprep.subr.bf16.mxu0 %v5059_v61  ;;  %v2420_v25 = vld [vmem:[#allocation3] sm:$0xf]  ;;  %v2421_v26 = vld [vmem:[#allocation3 + $0x8] sm:$0xf]  ;;  %v5981_v27 = vld [vmem:[#allocation3 + $0x4] sm:$0x1] }
 0x1f8   : > { %v5983_v28 = vld [vmem:[#allocation3 + $0xc] sm:$0x1]  ;;  %v2445_v17 = vshrl.u32 %v2420_v25, 16  ;;  %v2448_v29 = vshll.u32 %v2420_v25, 16  ;;  %v2454_v30 = vshll.u32 %v5981_v27, 16  ;;  %v2459_v32 = vshrl.u32 %v2421_v26, 16 }
 0x1f9   : > { %4689 = vmatpush3.bf16.msra.mxu1 %v5058_v15  ;;  %v5068_v37 = vld [vmem:[#allocation9 + $0x48] sm:$0xff]   ;;  %v2462_v19 = vshll.u32 %v2421_v26, 16  ;;  %v2468_v38 = vshll.u32 %v5983_v28, 16  ;;  %v5987_v40 = vld [vmem:[#allocation3 + $0x10] sm:$0xf]  ;;  %v4139_v39 = vcombine.low %v2420_v25, %v2421_v26  ;;  %v5074_v12 = vld [vmem:[#allocation9 + $0xb8] sm:$0xff]  }
 0x1fa   : > { %4709 = vmatpush3.bf16.msra.mxu0 %v5059_v61  ;;  %4690 = vmatprep.subr.bf16.mxu1 %v5060_v35  ;;  %v2447_v16 = vrot.slane %v2445_v17, 4  ;;  %v2450_v0 = vrot.slane %v2448_v29, 5  ;;  %v2456_v43 = vrot.slane %v2454_v30, 5  ;;  %v2461_v42 = vrot.slane %v2459_v32, 4  ;;  %v2423_v33 = vld [vmem:[#allocation3 + $0x18] sm:$0xf] }
 0x1fb   : > { %4710 = vmatprep.subr.bf16.mxu0 %v5061_v18  ;;  %v2464_v41 = vrot.slane %v2462_v19, 5  ;;  %v2470_v46 = vrot.slane %v2468_v38, 5  ;;  %v5989_v45 = vld [vmem:[#allocation3 + $0x14] sm:$0x1]  ;;  %v5991_v47 = vld [vmem:[#allocation3 + $0x1c] sm:$0x1]  ;;  %4722 = vmatprep.mubr.bf16.mxu0 %v4139_v39  ;;  %v4140_v61 = vcombine.low %v5987_v40, %v2423_v33  ;;  %s6077_s5 = scalar_lea.hbm %s6182_s10, %s4235_s22 }
 0x1fc   : > { %v5069_v31 = vld [vmem:[#allocation9 + $0x8] sm:$0xff]   ;;  %v2451_v36 = vor.u32 %v2450_v0, %v2447_v16  ;;  %v2473_v50 = vshrl.u32 %v5987_v40, 16  ;;  %v2476_v51 = vshll.u32 %v5987_v40, 16  ;;  %v2482_v52 = vshll.u32 %v5989_v45, 16  ;;  %v5070_v58 = vld [vmem:[#allocation9 + $0x40] sm:$0xff]   ;;  %v5075_v9 = vld [vmem:[#allocation9 + $0xf8] sm:$0xff]  }
 0x1fd   : > { %4691 = vmatpush3.bf16.msra.mxu1 %v5060_v35  ;;  %v2465_v34 = vor.u32 %v2464_v41, %v2461_v42  ;;  %v2487_v53 = vshrl.u32 %v2423_v33, 16  ;;  %v2490_v54 = vshll.u32 %v2423_v33, 16  ;;  %v2496_v48 = vshll.u32 %v5991_v47, 16  ;;  %v5071_v2 = vld [vmem:[#allocation9] sm:$0xff]   ;;  %v5076_v35 = vld [vmem:[#allocation9 + $0xb0] sm:$0xff]   ;;  %v5083_v19 = vld [vmem:[#allocation9 + $0xd8] sm:$0xff]  }
 0x1fe   : > { %4711 = vmatpush3.bf16.msra.mxu0 %v5061_v18  ;;  %4692 = vmatprep.subr.bf16.mxu1 %v5062_v1  ;;  %v2452_v8 = vrot.slane %v2451_v36, 4  ;;  %v2475_v56 = vrot.slane %v2473_v50, 4  ;;  %v2478_v57 = vrot.slane %v2476_v51, 5  ;;  %v2484_v22 = vrot.slane %v2482_v52, 5  ;;  %v5077_v18 = vld [vmem:[#allocation9 + $0xf0] sm:$0xff]   ;;  %v5080_v25 = vld [vmem:[#allocation9 + $0xa0] sm:$0xff]  }
 0x1ff   : > { %4712 = vmatprep.subr.bf16.mxu0 %v5063_v20  ;;  %v2466_v60 = vrot.slane %v2465_v34, 4  ;;  %v2489_v55 = vrot.slane %v2487_v53, 4  ;;  %v2492_v63 = vrot.slane %v2490_v54, 5  ;;  %v2498_v10 = vrot.slane %v2496_v48, 5  ;;  %v5081_v29 = vld [vmem:[#allocation9 + $0xe0] sm:$0xff]   ;;  %v5084_v38 = vld [vmem:[#allocation9 + $0x90] sm:$0xff]  }
 0x200   : > { %v2457_v3 = vsel %vm5610_vm10, %v2452_v8, %v2456_v43  ;;  %v2479_v4 = vor.u32 %v2478_v57, %v2475_v56  ;;  %v5085_v40 = vld [vmem:[#allocation9 + $0xd0] sm:$0xff]   ;;  %v5086_v16 = vld [vmem:[#allocation9 + $0x88] sm:$0xff]   ;;  %v2733_v0 = vld [vmem:[#allocation3 + $0x10] sm:$0xe]  ;;  %v2753_v33 = vrot.slane %v5989_v45, 5  ;;  %v2757_v41 = vrot.slane %v5991_v47, 5 }
 0x201   : > { %4693 = vmatpush3.bf16.msra.mxu1 %v5062_v1  ;;  %v2471_v5 = vsel %vm5610_vm10, %v2466_v60, %v2470_v46  ;;  %v2493_v6 = vor.u32 %v2492_v63, %v2489_v55  ;;  %v5078_v1 = vld [vmem:[#allocation9 + $0xa8] sm:$0xff]   ;;  %v4151_v46 = vrot.slane %v2733_v0, 9  ;;  %v5089_v36 = vld [vmem:[#allocation9 + $0xc0] sm:$0xff]   ;;  %v5090_v52 = vld [vmem:[#allocation9 + $0x138] sm:$0xff]   ;;  %s5214_s16 = scalar_lea.vmem %s6079_s15, 512  ;;  %s5327_s14 = smov [#allocation10]  }
 0x202   : > { %4713 = vmatpush3.bf16.msra.mxu0 %v5063_v20  ;;  %4694 = vmatprep.subr.bf16.mxu1 %v5064_v21  ;;  %v4129_v59 = vcombine.low %v2457_v3, %v2471_v5  ;;  %v2480_v7 = vrot.slane %v2479_v4, 4  ;;  %v5079_v20 = vld [vmem:[#allocation9 + $0xe8] sm:$0xff]   ;;  %v3020_v34 = vld [vmem:[#allocation3 + $0x8] sm:$0xf]  ;;  %v3021_v45 = vld [vmem:[#allocation3 + $0xc] sm:$0x1]  ;;  %p5215_p2 = scmp.ne.s32.totalorder %s6079_s15, %s5214_s16 }
 0x203   : > { %4714 = vmatprep.subr.bf16.mxu0 %v5065_v23  ;;  %v2494_v11 = vrot.slane %v2493_v6, 4  ;;  %v2734_v43 = vld [vmem:[#allocation3 + $0x18] sm:$0xe]  ;;  %v2754_v50 = vsel %vm5676_vm13, %v4151_v46, %v2753_v33  ;;  %v3022_v47 = vld [vmem:[#allocation3 + $0x10] sm:$0xf]  ;;  %v3029_v54 = vshrl.u32 %v3020_v34, 16 }
 0x204   : > { %4702 = vmatprep.mubr.bf16.mxu1 %v4129_v59  ;;  %v2485_v49 = vsel %vm5610_vm10, %v2480_v7, %v2484_v22  ;;  %v5087_v42 = vld [vmem:[#allocation9 + $0xc8] sm:$0xff]   ;;  %v4152_v39 = vrot.slane %v2734_v43, 9  ;;  %v3023_v53 = vld [vmem:[#allocation3 + $0x14] sm:$0x1]  ;;  %v3032_v48 = vshll.u32 %v3020_v34, 16  ;;  %v5093_v8 = vld [vmem:[#allocation9 + $0x178] sm:$0xff]   ;;  %p5216_p12 = pnand %p5215_p2, %p5471_p5 }
 0x205   : > { %4695 = vmatpush3.bf16.msra.mxu1 %v5064_v21  ;;  %v2499_v14 = vsel %vm5610_vm10, %v2494_v11, %v2498_v10  ;;  %v2745_v21 = vrot.slane %v5981_v27, 5  ;;  %v3038_v56 = vshll.u32 %v3021_v45, 16  ;;  %v3043_v57 = vshrl.u32 %v3022_v47, 16  ;;  %v5092_v3 = vld [vmem:[#allocation3 + $0x18] ss:$8 sps:$4 sm:$0xff]   ;;  %s5218_s17 = sshll.u32 %s5327_s14, 4  ;;  %s5219_s17 = int_to_ptr.vmem [resolvable:$false] %s5218_s17 }
 0x206   : > { %4715 = vmatpush3.bf16.msra.mxu0 %v5065_v23  ;;  %4696 = vmatprep.subr.bf16.mxu1 %v5066_v13  ;;  %v4130_v15 = vcombine.low %v2485_v49, %v2499_v14  ;;  %v2749_v23 = vrot.slane %v5983_v28, 5  ;;  %v5082_v28 = vld [vmem:[#allocation9 + $0x98] sm:$0xff]   ;;  %v2758_v51 = vsel %vm5676_vm13, %v4152_v39, %v2757_v41  ;;  %v3052_v60 = vshll.u32 %v3023_v53, 16  ;;  %v5094_v5 = vld [vmem:[#allocation9 + $0x130] sm:$0xff]   ;;  %v3211_v14 = vld [vmem:[#allocation3 + $0x10] sm:$0xe]  ;;  %p5217_p13 = pneg %p5216_p12  ;;  %p5221_p3 = scmp.lt.s32.totalorder %s6079_s15, %s5219_s17 }
 0x207   : > { %4716 = vmatprep.subr.bf16.mxu0 %v5067_v24  ;;  %v4154_v55 = vcombine.low %v2754_v50, %v2758_v51  ;;  %v3031_v63 = vrot.slane %v3029_v54, 4  ;;  %v3045_v4 = vrot.slane %v3043_v57, 4  ;;  %v3040_v10 = vrot.slane %v3038_v56, 5  ;;  %v5095_v59 = vld [vmem:[#allocation9 + $0x170] sm:$0xff]   ;;  %v3210_v49 = vld [vmem:[#allocation3 + $0x8] sm:$0xe] }
 0x208   : > { %v3054_v11 = vrot.slane %v3052_v60, 5  ;;  %v3027_v0 = vld [vmem:[#allocation3 + $0x24] sm:$0x1]  ;;  %v5104_v51 = vld [vmem:[#allocation9 + $0x108] sm:$0xff]   ;;  %v3213_v54 = vld [vmem:[#allocation3 + $0x20] sm:$0xe] }
 0x209   : > { %4697 = vmatpush3.bf16.msra.mxu1 %v5066_v13  ;;  %v2731_v13 = vld [vmem:[#allocation3] sm:$0xe]  ;;  %v3080_v39 = vshll.u32 %v3027_v0, 16  ;;  %v3212_v34 = vld [vmem:[#allocation3 + $0x18] sm:$0xe]  ;;  %v5106_v56 = vld [vmem:[#allocation9 + $0x100] sm:$0xff]  }
 0x20a   : > { %4717 = vmatpush3.bf16.msra.mxu0 %v5067_v24  ;;  %4698 = vmatprep.subr.bf16.mxu1 %v5068_v37  ;;  %v2732_v24 = vld [vmem:[#allocation3 + $0x8] sm:$0xe]  ;;  %v4149_v26 = vrot.slane %v2731_v13, 9  ;;  %v4186_v60 = vrot.slane %v3213_v54, 9  ;;  %v6046_v54 = vld [vmem:[#allocation3 + $0x2c] sm:$0x1] }
 0x20b   : > { %4718 = vmatprep.subr.bf16.mxu0 %v5069_v31  ;;  %v4150_v17 = vrot.slane %v2732_v24, 9  ;;  %v3024_v24 = vld [vmem:[#allocation3 + $0x18] sm:$0xf]  ;;  %s5220_s4 = scalar_lea.vmem %s5219_s17, 1024 }
 0x20c   : > { %v2746_v30 = vsel %vm5676_vm13, %v4149_v26, %v2745_v21  ;;  %v4184_v21 = vrot.slane %v3211_v14, 9  ;;  %v5098_v26 = vld [vmem:[#allocation9 + $0x120] sm:$0xff]   ;;  %v5128_v62 = vld [vmem:[#allocation9 + $0x228] sm:$0xff]   ;;  %p5222_p0 = scmp.lt.s32.totalorder %s5220_s4, %s5214_s16 }
 0x20d   : > { %4699 = vmatpush3.bf16.msra.mxu1 %v5068_v37  ;;  %v2750_v32 = vsel %vm5676_vm13, %v4150_v17, %v2749_v23  ;;  %v5091_v37 = vld [vmem:[#allocation3 + $0x8] ss:$8 sps:$4 sm:$0xff]   ;;  %v3228_v23 = vrot.slane %v3023_v53, 5  ;;  %v3026_v17 = vld [vmem:[#allocation3 + $0x20] sm:$0xf]  ;;  %v3082_v53 = vrot.slane %v3080_v39, 5 }
 0x20e   : > { %4719 = vmatpush3.bf16.msra.mxu0 %v5069_v31  ;;  %4700 = vmatprep.subr.bf16.mxu1 %v5070_v58  ;;  %v4153_v27 = vcombine.low %v2746_v30, %v2750_v32  ;;  %v5088_v31 = vld [vmem:[#allocation9 + $0x80] sm:$0xff]   ;;  %p5223_p1 = por %p5222_p0, %p5221_p3 }
 0x20f   : > { %4720 = vmatprep.subr.bf16.mxu0 %v5071_v2  ;;  %v5099_v30 = vld [vmem:[#allocation9 + $0x160] sm:$0xff]  }
 0x210   : > { %p5224_p4 = pnand %p5223_p1, %p5217_p13 }
 0x211   : > { %4701 = vmatpush3.bf16.msra.mxu1 %v5070_v58  ;;  %v3046_v58 = vshll.u32 %v3022_v47, 16 }
 0x212   : > { %4721 = vmatpush3.bf16.msra.mxu0 %v5071_v2  ;;  %4726 = vmatprep.subr.bf16.mxu1 %v5074_v12  ;;  %v3034_v2 = vrot.slane %v3032_v48, 5 }
 0x213   : > { %4746 = vmatprep.subr.bf16.mxu0 %v5075_v9  ;;  %v3048_v22 = vrot.slane %v3046_v58, 5 }
 0x214   : > { %4703 = vmatmul.mubr.bf16.vlgmr.msra.gmra.mxu1 %v4130_v15  ;;  %v3035_v6 = vor.u32 %v3034_v2, %v3031_v63  ;;  %v5096_v15 = vld [vmem:[#allocation9 + $0x128] sm:$0xff]   ;;  %v3499_v63 = vld [vmem:[#allocation3 + $0x10] sm:$0xf]  ;;  %v6026_v2 = vld [vmem:[#allocation3 + $0x14] sm:$0x1] }
 0x215   : > { %4723 = vmatmul.mubr.bf16.vlgmr.msra.gmra.mxu0 %v4140_v61  ;;  %4727 = vmatpush3.bf16.msra.mxu1 %v5074_v12  ;;  %v3049_v7 = vor.u32 %v3048_v22, %v3045_v4  ;;  %v5097_v61 = vld [vmem:[#allocation9 + $0x168] sm:$0xff]   ;;  %v5107_v22 = vld [vmem:[#allocation9 + $0x140] sm:$0xff]  }
 0x216   : > { %4747 = vmatpush3.bf16.msra.mxu0 %v5075_v9  ;;  %4728 = vmatprep.subr.bf16.mxu1 %v5076_v35  ;;  %v3036_v12 = vrot.slane %v3035_v6, 4  ;;  %v6028_v4 = vld [vmem:[#allocation3 + $0x1c] sm:$0x1]  ;;  %v3511_v6 = vshll.u32 %v3499_v63, 16 }
 0x217   : > { %4748 = vmatprep.subr.bf16.mxu0 %v5077_v18  ;;  %4742 = vmatprep.mubr.bf16.mxu1 %v4153_v27  ;;  %v3050_v9 = vrot.slane %v3049_v7, 4  ;;  %v3057_v27 = vshrl.u32 %v3024_v24, 16 }
 0x218   : > { %4762 = vmatprep.mubr.bf16.mxu0 %v5091_v37  ;;  %v3060_v37 = vshll.u32 %v3024_v24, 16  ;;  %v3513_v14 = vrot.slane %v3511_v6, 5 }
 0x219   : > { %4729 = vmatpush3.bf16.msra.mxu1 %v5076_v35  ;;  %v3041_v35 = vsel %vm5610_vm10, %v3036_v12, %v3040_v10  ;;  %v3059_v43 = vrot.slane %v3057_v27, 4  ;;  %v3517_v10 = vshll.u32 %v6026_v2, 16  ;;  %v3531_v12 = vshll.u32 %v6028_v4, 16  ;;  %v5124_v27 = vld [vmem:[#allocation3 + $0x10] ss:$8 sps:$4 sm:$0xff]  }
 0x21a   : > { %4749 = vmatpush3.bf16.msra.mxu0 %v5077_v18  ;;  %4730 = vmatprep.subr.bf16.mxu1 %v5078_v1  ;;  %v4183_v18 = vrot.slane %v3210_v49, 9 }
 0x21b   : > { %4750 = vmatprep.subr.bf16.mxu0 %v5079_v20 }
 0x21d   : > { %4731 = vmatpush3.bf16.msra.mxu1 %v5078_v1  ;;  %v3224_v1 = vrot.slane %v3021_v45, 5  ;;  %v5105_v45 = vld [vmem:[#allocation9 + $0x148] sm:$0xff]  }
 0x21e   : > { %4751 = vmatpush3.bf16.msra.mxu0 %v5079_v20  ;;  %4732 = vmatprep.subr.bf16.mxu1 %v5080_v25  ;;  %v3055_v20 = vsel %vm5610_vm10, %v3050_v9, %v3054_v11 }
 0x21f   : > { %4752 = vmatprep.subr.bf16.mxu0 %v5081_v29  ;;  %v4173_v13 = vcombine.low %v3041_v35, %v3055_v20  ;;  %v5109_v20 = vld [vmem:[#allocation9 + $0x1f8] sm:$0xff]  }
 0x221   : > { %4733 = vmatpush3.bf16.msra.mxu1 %v5080_v25  ;;  %v3225_v25 = vsel %vm5676_vm13, %v4183_v18, %v3224_v1 }
 0x222   : > { %4753 = vmatpush3.bf16.msra.mxu0 %v5081_v29  ;;  %4734 = vmatprep.subr.bf16.mxu1 %v5082_v28  ;;  %v3229_v29 = vsel %vm5676_vm13, %v4184_v21, %v3228_v23  ;;  %v3519_v23 = vrot.slane %v3517_v10, 5 }
 0x223   : > { %4754 = vmatprep.subr.bf16.mxu0 %v5083_v19  ;;  %v4187_v32 = vcombine.low %v3225_v25, %v3229_v29  ;;  %v3533_v25 = vrot.slane %v3531_v12, 5 }
 0x225   : > { %4735 = vmatpush3.bf16.msra.mxu1 %v5082_v28  ;;  %v5100_v28 = vld [vmem:[#allocation9 + $0x118] sm:$0xff]  }
 0x226   : > { %4755 = vmatpush3.bf16.msra.mxu0 %v5083_v19  ;;  %4736 = vmatprep.subr.bf16.mxu1 %v5084_v38  ;;  %v3071_v19 = vshrl.u32 %v3026_v17, 16 }
 0x227   : > { %4756 = vmatprep.subr.bf16.mxu0 %v5085_v40 }
 0x228   : > { %v3073_v33 = vrot.slane %v3071_v19, 4 }
 0x229   : > { %4737 = vmatpush3.bf16.msra.mxu1 %v5084_v38  ;;  %v3074_v38 = vshll.u32 %v3026_v17, 16  ;;  %v5110_v17 = vld [vmem:[#allocation9 + $0x1b0] sm:$0xff]  }
 0x22a   : > { %4757 = vmatpush3.bf16.msra.mxu0 %v5085_v40  ;;  %4738 = vmatprep.subr.bf16.mxu1 %v5086_v16  ;;  %v5101_v40 = vld [vmem:[#allocation9 + $0x158] sm:$0xff]  }
 0x22b   : > { %4758 = vmatprep.subr.bf16.mxu0 %v5087_v42  ;;  %v3076_v41 = vrot.slane %v3074_v38, 5  ;;  %v5112_v38 = vld [vmem:[#allocation9 + $0x1a8] sm:$0xff]  }
 0x22d   : > { %4739 = vmatpush3.bf16.msra.mxu1 %v5086_v16  ;;  %v3025_v16 = vld [vmem:[#allocation3 + $0x1c] sm:$0x1] }
 0x22e   : > { %4759 = vmatpush3.bf16.msra.mxu0 %v5087_v42  ;;  %4740 = vmatprep.subr.bf16.mxu1 %v5088_v31  ;;  %v3062_v42 = vrot.slane %v3060_v37, 5  ;;  %v3066_v46 = vshll.u32 %v3025_v16, 16  ;;  %v3232_v58 = vrot.slane %v3025_v16, 5  ;;  %v5114_v16 = vld [vmem:[#allocation9 + $0x1a0] sm:$0xff]  }
 0x22f   : > { %4760 = vmatprep.subr.bf16.mxu0 %v5089_v36 }
 0x230   : > { %v3063_v50 = vor.u32 %v3062_v42, %v3059_v43  ;;  %v3068_v47 = vrot.slane %v3066_v46, 5  ;;  %v3503_v43 = vld [vmem:[#allocation3 + $0x20] sm:$0xf]  ;;  %v3505_v42 = vld [vmem:[#allocation3 + $0x28] sm:$0xf] }
 0x231   : > { %4741 = vmatpush3.bf16.msra.mxu1 %v5088_v31  ;;  %v5102_v31 = vld [vmem:[#allocation9 + $0x110] sm:$0xff]   ;;  %v3539_v46 = vshll.u32 %v3503_v43, 16  ;;  %v3550_v39 = vshrl.u32 %v3505_v42, 16 }
 0x232   : > { %4761 = vmatpush3.bf16.msra.mxu0 %v5089_v36  ;;  %4766 = vmatprep.subr.bf16.mxu1 %v5090_v52  ;;  %v5103_v36 = vld [vmem:[#allocation9 + $0x150] sm:$0xff]   ;;  %v3064_v48 = vrot.slane %v3063_v50, 4 }
 0x233   : > { %4786 = vmatprep.subr.bf16.mxu0 %v5093_v8  ;;  %v5118_v50 = vld [vmem:[#allocation9 + $0x190] sm:$0xff]  }
 0x234   : > { %4743 = vmatmul.mubr.bf16.vlgmr.msra.gmra.mxu1 %v4154_v55  ;;  %v3236_v55 = vrot.slane %v3027_v0, 5  ;;  %v3069_v7 = vsel %vm5610_vm10, %v3064_v48, %v3068_v47  ;;  %v5115_v0 = vld [vmem:[#allocation9 + $0x1e0] sm:$0xff]   ;;  %v5119_v47 = vld [vmem:[#allocation9 + $0x1d0] sm:$0xff]   ;;  %v5120_v48 = vld [vmem:[#allocation9 + $0x188] sm:$0xff]  }
 0x235   : > { %4767 = vmatpush3.bf16.msra.mxu1 %v5090_v52  ;;  %4763 = vmatmul.mubr.bf16.vlgmr.msra.gmra.mxu0 %v5092_v3  ;;  %v3077_v52 = vor.u32 %v3076_v41, %v3073_v33  ;;  %v3501_v3 = vld [vmem:[#allocation3 + $0x18] sm:$0xf]  ;;  %v5116_v33 = vld [vmem:[#allocation9 + $0x198] sm:$0xff]   ;;  %v3536_v41 = vshrl.u32 %v3503_v43, 16 }
 0x236   : > { %4787 = vmatpush3.bf16.msra.mxu0 %v5093_v8  ;;  %4768 = vmatprep.subr.bf16.mxu1 %v5094_v5  ;;  %v4185_v8 = vrot.slane %v3212_v34, 9  ;;  %v3525_v11 = vshll.u32 %v3501_v3, 16  ;;  %v3237_v18 = vsel %vm5676_vm13, %v4186_v60, %v3236_v55  ;;  %v3552_v34 = vrot.slane %v3550_v39, 4  ;;  %v5121_v60 = vld [vmem:[#allocation9 + $0x1c8] sm:$0xff]   ;;  %v3689_v55 = vld [vmem:[#allocation3 + $0x10] sm:$0xe] }
 0x237   : > { %4788 = vmatprep.subr.bf16.mxu0 %v5095_v59  ;;  %4782 = vmatprep.mubr.bf16.mxu1 %v4173_v13  ;;  %v3078_v57 = vrot.slane %v3077_v52, 4  ;;  %v3541_v52 = vrot.slane %v3539_v46, 5 }
 0x238   : > { %4802 = vmatprep.mubr.bf16.mxu0 %v4187_v32  ;;  %v3233_v35 = vsel %vm5676_vm13, %v4185_v8, %v3232_v58  ;;  %v3527_v1 = vrot.slane %v3525_v11, 5  ;;  %v3559_v58 = vshll.u32 %v6046_v54, 16  ;;  %v3703_v11 = vrot.slane %v6026_v2, 5 }
 0x239   : > { %4769 = vmatpush3.bf16.msra.mxu1 %v5094_v5  ;;  %v3508_v5 = vshrl.u32 %v3499_v63, 16  ;;  %v3083_v49 = vsel %vm5610_vm10, %v3078_v57, %v3082_v53  ;;  %v6044_v53 = vld [vmem:[#allocation3 + $0x24] sm:$0x1]  ;;  %v3690_v63 = vld [vmem:[#allocation3 + $0x18] sm:$0xe] }
 0x23a   : > { %4789 = vmatpush3.bf16.msra.mxu0 %v5095_v59  ;;  %4770 = vmatprep.subr.bf16.mxu1 %v5096_v15  ;;  %v3522_v59 = vshrl.u32 %v3501_v3, 16  ;;  %v4174_v13 = vcombine.low %v3069_v7, %v3083_v49  ;;  %v5122_v3 = vld [vmem:[#allocation9 + $0x180] sm:$0xff]   ;;  %v3561_v10 = vrot.slane %v3559_v58, 5  ;;  %v4217_v7 = vrot.slane %v3689_v55, 9 }
 0x23b   : > { %4790 = vmatprep.subr.bf16.mxu0 %v5097_v61  ;;  %v3510_v9 = vrot.slane %v3508_v5, 4  ;;  %v4218_v12 = vrot.slane %v3690_v63, 9  ;;  %v3707_v49 = vrot.slane %v6028_v4, 5 }
 0x23d   : > { %4771 = vmatpush3.bf16.msra.mxu1 %v5096_v15  ;;  %v3524_v15 = vrot.slane %v3522_v59, 4  ;;  %v3514_v21 = vor.u32 %v3513_v14, %v3510_v9  ;;  %v5123_v59 = vld [vmem:[#allocation9 + $0x1c0] sm:$0xff]   ;;  %v5126_v9 = vld [vmem:[#allocation9 + $0x238] sm:$0xff]   ;;  %v3708_v2 = vsel %vm5676_vm13, %v4218_v12, %v3707_v49 }
 0x23e   : > { %4791 = vmatpush3.bf16.msra.mxu0 %v5097_v61  ;;  %4772 = vmatprep.subr.bf16.mxu1 %v5098_v26  ;;  %v5108_v61 = vld [vmem:[#allocation9 + $0x1b8] sm:$0xff]  }
 0x23f   : > { %4792 = vmatprep.subr.bf16.mxu0 %v5099_v30  ;;  %v3528_v24 = vor.u32 %v3527_v1, %v3524_v15  ;;  %v3515_v29 = vrot.slane %v3514_v21, 4  ;;  %v5130_v21 = vld [vmem:[#allocation9 + $0x218] sm:$0xff]  }
 0x241   : > { %4773 = vmatpush3.bf16.msra.mxu1 %v5098_v26  ;;  %v4188_v26 = vcombine.low %v3233_v35, %v3237_v18  ;;  %v3529_v32 = vrot.slane %v3528_v24, 4  ;;  %v3520_v37 = vsel %vm5610_vm10, %v3515_v29, %v3519_v23  ;;  %v5125_v35 = vld [vmem:[#allocation3 + $0x20] ss:$8 sps:$4 sm:$0xff]  }
 0x242   : > { %4793 = vmatpush3.bf16.msra.mxu0 %v5099_v30  ;;  %4774 = vmatprep.subr.bf16.mxu1 %v5100_v28  ;;  %v5111_v30 = vld [vmem:[#allocation9 + $0x1f0] sm:$0xff]  }
 0x243   : > { %4794 = vmatprep.subr.bf16.mxu0 %v5101_v40  ;;  %v5127_v18 = vld [vmem:[#allocation9 + $0x230] sm:$0xff]  }
 0x244   : > { %v5131_v23 = vld [vmem:[#allocation9 + $0x210] sm:$0xff]  }
 0x245   : > { %4775 = vmatpush3.bf16.msra.mxu1 %v5100_v28  ;;  %v3534_v28 = vsel %vm5610_vm10, %v3529_v32, %v3533_v25  ;;  %v3691_v24 = vld [vmem:[#allocation3 + $0x20] sm:$0xe]  ;;  %v3692_v25 = vld [vmem:[#allocation3 + $0x28] sm:$0xe]  ;;  %v5133_v32 = vld [vmem:[#allocation9 + $0x200] sm:$0xff]  }
 0x246   : > { %4795 = vmatpush3.bf16.msra.mxu0 %v5101_v40  ;;  %4776 = vmatprep.subr.bf16.mxu1 %v5102_v31  ;;  %v4207_v19 = vcombine.low %v3520_v37, %v3534_v28  ;;  %v5113_v40 = vld [vmem:[#allocation9 + $0x1e8] sm:$0xff]   ;;  %v4220_v29 = vrot.slane %v3692_v25, 9 }
 0x247   : > { %4796 = vmatprep.subr.bf16.mxu0 %v5103_v36 }
 0x249   : > { %4777 = vmatpush3.bf16.msra.mxu1 %v5102_v31  ;;  %v3553_v31 = vshll.u32 %v3505_v42, 16 }
 0x24a   : > { %4797 = vmatpush3.bf16.msra.mxu0 %v5103_v36  ;;  %4778 = vmatprep.subr.bf16.mxu1 %v5104_v51  ;;  %v5117_v36 = vld [vmem:[#allocation9 + $0x1d8] sm:$0xff]  }
 0x24b   : > { %4798 = vmatprep.subr.bf16.mxu0 %v5105_v45 }
 0x24d   : > { %4779 = vmatpush3.bf16.msra.mxu1 %v5104_v51  ;;  %v3538_v51 = vrot.slane %v3536_v41, 4 }
 0x24e   : > { %4799 = vmatpush3.bf16.msra.mxu0 %v5105_v45  ;;  %4780 = vmatprep.subr.bf16.mxu1 %v5106_v56  ;;  %v3555_v45 = vrot.slane %v3553_v31, 5 }
 0x24f   : > { %4800 = vmatprep.subr.bf16.mxu0 %v5107_v22  ;;  %v3542_v8 = vor.u32 %v3541_v52, %v3538_v51 }
 0x250   : > { %v3556_v57 = vor.u32 %v3555_v45, %v3552_v34 }
 0x251   : > { %4781 = vmatpush3.bf16.msra.mxu1 %v5106_v56  ;;  %v3545_v56 = vshll.u32 %v6044_v53, 16 }
 0x252   : > { %4801 = vmatpush3.bf16.msra.mxu0 %v5107_v22  ;;  %4806 = vmatprep.subr.bf16.mxu1 %v5108_v61  ;;  %v3543_v22 = vrot.slane %v3542_v8, 4  ;;  %v3557_v6 = vrot.slane %v3556_v57, 4 }
 0x253   : > { %4826 = vmatprep.subr.bf16.mxu0 %v5109_v20  ;;  %v3547_v5 = vrot.slane %v3545_v56, 5 }
 0x254   : > { %4783 = vmatmul.mubr.bf16.vlgmr.msra.gmra.mxu1 %v4174_v13  ;;  %v3562_v15 = vsel %vm5610_vm10, %v3557_v6, %v3561_v10  ;;  %v5132_v13 = vld [vmem:[#allocation9 + $0x208] sm:$0xff]  }
 0x255   : > { %4807 = vmatpush3.bf16.msra.mxu1 %v5108_v61  ;;  %4803 = vmatmul.mubr.bf16.vlgmr.msra.gmra.mxu0 %v4188_v26  ;;  %v3548_v14 = vsel %vm5610_vm10, %v3543_v22, %v3547_v5  ;;  %v3704_v61 = vsel %vm5676_vm13, %v4217_v7, %v3703_v11  ;;  %v4219_v26 = vrot.slane %v3691_v24, 9 }
 0x256   : > { %4827 = vmatpush3.bf16.msra.mxu0 %v5109_v20  ;;  %4808 = vmatprep.subr.bf16.mxu1 %v5110_v17  ;;  %v4208_v4 = vcombine.low %v3548_v14, %v3562_v15  ;;  %v4221_v1 = vcombine.low %v3704_v61, %v3708_v2  ;;  %v5129_v20 = vld [vmem:[#allocation9 + $0x220] sm:$0xff]  }
 0x257   : > { %4828 = vmatprep.subr.bf16.mxu0 %v5111_v30  ;;  %4822 = vmatprep.mubr.bf16.mxu1 %v5124_v27 }
 0x258   : > { %4842 = vmatprep.mubr.bf16.mxu0 %v4207_v19 }
 0x259   : > { %4809 = vmatpush3.bf16.msra.mxu1 %v5110_v17  ;;  %v3711_v17 = vrot.slane %v6044_v53, 5 }
 0x25a   : > { %4829 = vmatpush3.bf16.msra.mxu0 %v5111_v30  ;;  %4810 = vmatprep.subr.bf16.mxu1 %v5112_v38  ;;  %v3715_v30 = vrot.slane %v6046_v54, 5 }
 0x25b   : > { %4830 = vmatprep.subr.bf16.mxu0 %v5113_v40  ;;  %v3712_v27 = vsel %vm5676_vm13, %v4219_v26, %v3711_v17  ;;  %v4231_v26 = vld [vmem:[%s6180_s27] ss:$0 sm:$0xff] }
 0x25c   : > { %v3716_v37 = vsel %vm5676_vm13, %v4220_v29, %v3715_v30 }
 0x25d   : > { %4811 = vmatpush3.bf16.msra.mxu1 %v5112_v38  ;;  %v4222_v28 = vcombine.low %v3712_v27, %v3716_v37 }
 0x25e   : > { %4831 = vmatpush3.bf16.msra.mxu0 %v5113_v40  ;;  %4812 = vmatprep.subr.bf16.mxu1 %v5114_v16 }
 0x25f   : > { %4832 = vmatprep.subr.bf16.mxu0 %v5115_v0 }
 0x261   : > { %4813 = vmatpush3.bf16.msra.mxu1 %v5114_v16 }
 0x262   : > { %4833 = vmatpush3.bf16.msra.mxu0 %v5115_v0  ;;  %4814 = vmatprep.subr.bf16.mxu1 %v5116_v33 }
 0x263   : > { %4834 = vmatprep.subr.bf16.mxu0 %v5117_v36 }
 0x265   : > { %4815 = vmatpush3.bf16.msra.mxu1 %v5116_v33 }
 0x266   : > { %4835 = vmatpush3.bf16.msra.mxu0 %v5117_v36  ;;  %4816 = vmatprep.subr.bf16.mxu1 %v5118_v50 }
 0x267   : > { %4836 = vmatprep.subr.bf16.mxu0 %v5119_v47 }
 0x269   : > { %4817 = vmatpush3.bf16.msra.mxu1 %v5118_v50 }
 0x26a   : > { %4837 = vmatpush3.bf16.msra.mxu0 %v5119_v47  ;;  %4818 = vmatprep.subr.bf16.mxu1 %v5120_v48 }
 0x26b   : > { %4838 = vmatprep.subr.bf16.mxu0 %v5121_v60 }
 0x26d   : > { %4819 = vmatpush3.bf16.msra.mxu1 %v5120_v48 }
 0x26e   : > { %4839 = vmatpush3.bf16.msra.mxu0 %v5121_v60  ;;  %4820 = vmatprep.subr.bf16.mxu1 %v5122_v3 }
 0x26f   : > { %4840 = vmatprep.subr.bf16.mxu0 %v5123_v59 }
 0x271   : > { %4821 = vmatpush3.bf16.msra.mxu1 %v5122_v3 }
 0x272   : > { %4841 = vmatpush3.bf16.msra.mxu0 %v5123_v59  ;;  %4846 = vmatprep.subr.bf16.mxu1 %v5126_v9 }
 0x274   : > { %4823 = vmatmul.mubr.bf16.vlgmr.msra.gmra.mxu1 %v5125_v35 }
 0x275   : > { %4847 = vmatpush3.bf16.msra.mxu1 %v5126_v9  ;;  %4843 = vmatmul.mubr.bf16.vlgmr.msra.gmra.mxu0 %v4208_v4 }
 0x276   : > { %4848 = vmatprep.subr.bf16.mxu1 %v5127_v18  ;;  %4862 = vmatprep.mubr.bf16.mxu1 %v4221_v1 }
 0x279   : > { %4849 = vmatpush3.bf16.msra.mxu1 %v5127_v18 }
 0x27a   : > { %4850 = vmatprep.subr.bf16.mxu1 %v5128_v62 }
 0x27d   : > { %4851 = vmatpush3.bf16.msra.mxu1 %v5128_v62 }
 0x27e   : > { %4852 = vmatprep.subr.bf16.mxu1 %v5129_v20 }
 0x281   : > { %4853 = vmatpush3.bf16.msra.mxu1 %v5129_v20 }
 0x282   : > { %4854 = vmatprep.subr.bf16.mxu1 %v5130_v21 }
 0x285   : > { %4855 = vmatpush3.bf16.msra.mxu1 %v5130_v21 }
 0x286   : > { %4856 = vmatprep.subr.bf16.mxu1 %v5131_v23 }
 0x289   : > { %4857 = vmatpush3.bf16.msra.mxu1 %v5131_v23 }
 0x28a   : > { %4858 = vmatprep.subr.bf16.mxu1 %v5132_v13 }
 0x28d   : > { %4859 = vmatpush3.bf16.msra.mxu1 %v5132_v13 }
 0x28e   : > { %4860 = vmatprep.subr.bf16.mxu1 %v5133_v32 }
 0x291   : > { %4861 = vmatpush3.bf16.msra.mxu1 %v5133_v32 }
 0x294   : > { %4863 = vmatmul.mubr.bf16.vlgmr.msra.gmra.mxu1 %v4222_v28 }
 0x2d4   : > { %v4704_v19 = vpop.f32.mrf.mxu1 }
 0x2d5   : > { %v4724_v38 = vpop.f32.mrf.mxu0 }
 0x2d6   : > { %v2607_v40 = vpop.f32.mrf.mxu1  ;;  %v2725_v54 = vadd.f32 %v4724_v38, %v4704_v19 }
 0x2d7   : > { %v2716_v16 = vpop.f32.mrf.mxu0 }
 0x2d8   : > { %v4705_v0 = vpop.f32.mrf.mxu1  ;;  %v2717_v48 = vadd.f32 %v2716_v16, %v2607_v40 }
 0x2d9   : > { %v4725_v43 = vpop.f32.mrf.mxu0 }
 0x2da   : > { %v2610_v42 = vpop.f32.mrf.mxu1  ;;  %v2728_v58 = vadd.f32 %v4725_v43, %v4705_v0 }
 0x2db   : > { %v2719_v41 = vpop.f32.mrf.mxu0 }
 0x2dc   : > { %v2720_v63 = vadd.f32 %v2719_v41, %v2610_v42 }
 0x2f4   : > { %v4744_v33 = vpop.f32.mrf.mxu1 }
 0x2f5   : > { %v4764_v39 = vpop.f32.mrf.mxu0  ;;  %v2883_v8 = vadd.f32 %v4744_v33, %v2725_v54 }
 0x2f6   : > { %v2866_v46 = vpop.f32.mrf.mxu1 }
 0x2f7   : > { %v3001_v36 = vpop.f32.mrf.mxu0  ;;  %v2881_v60 = vadd.f32 %v2866_v46, %v2717_v48  ;;  %v3018_v3 = vadd.f32 %v4764_v39, %v2883_v8 }
 0x2f8   : > { %v4745_v31 = vpop.f32.mrf.mxu1 }
 0x2f9   : > { %v4765_v44 = vpop.f32.mrf.mxu0  ;;  %v2884_v22 = vadd.f32 %v4745_v31, %v2728_v58  ;;  %v3016_v6 = vadd.f32 %v3001_v36, %v2881_v60 }
 0x2fa   : > { %v2869_v50 = vpop.f32.mrf.mxu1 }
 0x2fb   : > { %v3004_v52 = vpop.f32.mrf.mxu0  ;;  %v2882_v10 = vadd.f32 %v2869_v50, %v2720_v63  ;;  %v3019_v12 = vadd.f32 %v4765_v44, %v2884_v22 }
 0x2fd   : > { %v3017_v9 = vadd.f32 %v3004_v52, %v2882_v10 }
 0x314   : > { %v4784_v51 = vpop.f32.mrf.mxu1 }
 0x315   : > { %v4804_v45 = vpop.f32.mrf.mxu0  ;;  %v3208_v59 = vadd.f32 %v4784_v51, %v3018_v3 }
 0x316   : > { %v3191_v34 = vpop.f32.mrf.mxu1 }
 0x317   : > { %v3345_v53 = vpop.f32.mrf.mxu0  ;;  %v3206_v49 = vadd.f32 %v3191_v34, %v3016_v6  ;;  %v3362_v14 = vadd.f32 %v4804_v45, %v3208_v59 }
 0x318   : > { %v4785_v47 = vpop.f32.mrf.mxu1 }
 0x319   : > { %v4805_v57 = vpop.f32.mrf.mxu0  ;;  %v3209_v15 = vadd.f32 %v4785_v47, %v3019_v12  ;;  %v3360_v35 = vadd.f32 %v3345_v53, %v3206_v49 }
 0x31a   : > { %v3194_v56 = vpop.f32.mrf.mxu1 }
 0x31b   : > { %v3348_v5 = vpop.f32.mrf.mxu0  ;;  %v3207_v4 = vadd.f32 %v3194_v56, %v3017_v9  ;;  %v3363_v1 = vadd.f32 %v4805_v57, %v3209_v15 }
 0x31d   : > { %v3361_v23 = vadd.f32 %v3348_v5, %v3207_v4 }
 0x334   : > { %v4824_v55 = vpop.f32.mrf.mxu1 }
 0x335   : > { %v4844_v11 = vpop.f32.mrf.mxu0  ;;  %v3497_v18 = vadd.f32 %v4824_v55, %v3362_v14 }
 0x336   : > { %v3480_v7 = vpop.f32.mrf.mxu1 }
 0x337   : > { %v3670_v2 = vpop.f32.mrf.mxu0  ;;  %v3495_v62 = vadd.f32 %v3480_v7, %v3360_v35  ;;  %v3687_v13 = vadd.f32 %v4844_v11, %v3497_v18 }
 0x338   : > { %v4825_v61 = vpop.f32.mrf.mxu1 }
 0x339   : > { %v4845_v21 = vpop.f32.mrf.mxu0  ;;  %v3498_v24 = vadd.f32 %v4825_v61, %v3363_v1  ;;  %v3685_v17 = vadd.f32 %v3670_v2, %v3495_v62 }
 0x33a   : > { %v3483_v20 = vpop.f32.mrf.mxu1 }
 0x33b   : > { %v3496_v29 = vadd.f32 %v3483_v20, %v3361_v23  ;;  %v3673_v32 = vpop.f32.mrf.mxu0  ;;  %v3688_v37 = vadd.f32 %v4845_v21, %v3498_v24 }
 0x33d   : > { %v3686_v40 = vadd.f32 %v3673_v32, %v3496_v29 }
 0x354   : > { %v4864_v25 = vpop.f32.mrf.mxu1 }
 0x355   : > { %v3841_v30 = vadd.f32 %v4864_v25, %v3687_v13 }
 0x356   : > { %v3824_v27 = vpop.f32.mrf.mxu1 }
 0x357   : > { %v3852_v28 = vadd.f32 %v4231_v26, %v3841_v30  ;;  %v3839_v19 = vadd.f32 %v3824_v27, %v3685_v17 }
 0x358   : > { %v4865_v38 = vpop.f32.mrf.mxu1 }
 0x359   : > { %v3856_v16 = vmax.f32 %v3852_v28, 0.0  ;;  %v3850_v0 = vadd.f32 %v4231_v26, %v3839_v19  ;;  %v3842_v43 = vadd.f32 %v4865_v38, %v3688_v37 }
 0x35a   : > { %v3827_v42 = vpop.f32.mrf.mxu1 }
 0x35b   : > { %3860 = vst [vmem:[%s5977_s7 + $0x10] sm:$0xff] %v3856_v16  ;;  %v3854_v33 = vmax.f32 %v3850_v0, 0.0  ;;  %v3853_v41 = vadd.f32 %v4231_v26, %v3842_v43  ;;  %v3840_v46 = vadd.f32 %v3827_v42, %v3686_v40 }
 0x35d   : > { %3858 = vst [vmem:[%s5977_s7] sm:$0xff] %v3854_v33  ;;  %v3857_v39 = vmax.f32 %v3853_v41, 0.0  ;;  %v3851_v31 = vadd.f32 %v4231_v26, %v3840_v46 }
 0x35f   : > { %3861 = vst [vmem:[%s5977_s7 + $0x18] sm:$0xff] %v3857_v39  ;;  %v3855_v36 = vmax.f32 %v3851_v31, 0.0 }
 0x361   : > { %3859 = vst [vmem:[%s5977_s7 + $0x8] sm:$0xff] %v3855_v36 }
 0x362   : > { %5227 = shalt.err (!%p5224_p4)
}
 0x363   : > { %s5228_s28 = scalar_lea.hbm %s6077_s5, 512  ;;  %s5232_s12 = scalar_lea.hbm %s6182_s10, 2048 }
 0x364   : > { %p5229_p6 = scmp.ne.s32.totalorder %s6077_s5, %s5228_s28  ;;  %p5233_p7 = scmp.lt.s32.totalorder %s6077_s5, %s6182_s10 }
 0x365   : > { %p5234_p8 = scmp.lt.s32.totalorder %s5232_s12, %s5228_s28 }
 0x366   : > { %p5230_p10 = pnand %p5229_p6, %p5471_p5 }
 0x367   : > { %p5235_p9 = por %p5234_p8, %p5233_p7 }
 0x368   : > { %p5231_p11 = pneg %p5230_p10 }
 0x36a   : > { %p5236_p2 = pnand %p5235_p9, %p5231_p11 }
 0x36c   : > { %5239 = shalt.err (!%p5236_p2)
}
 0x36d   : > { %s5328_s8 = smov 128   ;;  %s5329_s29 = smov 8  }
 0x36e   : > { %4876 = dma.vmem_to_hbm [thread:$0]  (%p5471_p5), %s6079_s15, 512, %s6077_s5, %s3863_s18, %s5328_s8, %s5328_s8, %s5329_s29  }
 0x36f PF: > { %s6183_s13 = sld [smem:[#allocation14_spill]]  ;;  %p4898_p12 = scmp.ge.s32.totalorder %s5314_s25, 2 }
 0x370   : > { %s6184_s22 = sld [smem:[#allocation15_spill]] }
 0x375   : > { %s3893_s1 = sand.u32 1, %s6183_s13  }
 0x376   : > { %p6185_p13 = scmp.ne.s32.totalorder %s6184_s22, 0  ;;  %s3894_s3 = scalar_lea.sflag [#allocation6], %s3893_s1 }
 0x378   : > { %p4890_p3 = pnand %p4898_p12, %p6185_p13 }
 0x37a   : > { %p4891_p0 = pneg %p4890_p3 }
 0x37c   : > { %5281 = dma.done.wait (%p4891_p0), %s3894_s3, 512  }
 0x37d   : > { %5283 = vsyncadd (%p4891_p0), %s3894_s3, 4294966784  ;;  %s22_s25 = sadd.s32 1, %s5314_s25   ;;  %s6186_s6 = sld [smem:[#allocation16_spill]] }
 0x37e   : > { %p19_p1 = scmp.ge.s32.totalorder %s22_s25, 6   ;;  %s6187_s18 = smov %s5290_s19 }
 0x37f   : > { %s6188_s19 = smov %s5294_s20  ;;  %s6189_s20 = smov %s5484_s9 }
 0x380   : > { %s6190_s21 = smov %s5306_s23  ;;  %s6191_s22 = smov %s5310_s24 }
 0x381   : > { %s6193_s24 = smov %s6199_s11  ;;  %21 = sbr.rel (!%p19_p1) target bundleno = 13 (0xd), region = 122 }
 0x383   : > { %s6192_s23 = smov %s6186_s6 }
 0x386   :  { %3899 = vsyncpa [#allocation5], 1 }
 0x387   :  { %3901 = vsyncpa [#allocation5 + $0x1], 1 }
 0x388   :  { %3902 = vsyncpa [#allocation8], 1 }
 0x389   :  { %3903 = vsyncpa [#allocation6], 1 }
 0x38a   :  { %3905 = vsyncpa [#allocation6 + $0x1], 1 }

</bundles_post_ra>
